<compile_context>
chip_gen: v7x
topology: tpu7x:2x2x1
jax: 0.10.0
libtpu: 0.0.40
codegen_flags: <defaults>
</compile_context>

<pallas_src>
import functools

import numpy as np

import jax
import jax.numpy as jnp
from jax.experimental import pallas as pl
from jax.experimental.pallas import tpu as pltpu

# ----------------------------- model config ---------------------------------
X_SIZE = 6
Y_SIZE = 2
HIDDEN = 32              # hidden_size
NHEAD = 8
HD = HIDDEN // NHEAD     # head_dim = 4
NLAYERS = 2
DFF = HIDDEN * 8         # dim_feedforward = 256
MIN_STD = 0.01
NAN_VALUE = 0.0
LN_EPS = 1e-5
NEG_INF = -1e30          # stand-in for float('-inf') in masked attention logits
SLAB_W = DFF             # slab lane width (256, multiple of 128)
F32_MAX = 3.4028235e38


# ----------------------------- weight slab layout ----------------------------
def _make_layout():
    layout = {}
    row = [0]

    def add_mat(name, r, c):
        layout[name] = (row[0], (r, c))
        row[0] += -(-r // 8) * 8          # 8-row aligned slots

    def add_vec(name, c):
        layout[name] = (row[0], (1, c))
        row[0] += 1

    # --- matrices ---
    add_mat("enc_emb_wx", X_SIZE, HIDDEN)
    add_mat("enc_emb_wy", Y_SIZE, HIDDEN)
    add_mat("dec_emb_w", X_SIZE, HIDDEN)
    add_mat("head_w", HIDDEN, 2 * Y_SIZE)
    for side in ("enc", "dec"):
        for l in range(NLAYERS):
            p = f"{side}{l}"
            add_mat(p + "_wqkv", HIDDEN, 3 * HIDDEN)
            add_mat(p + "_wo", HIDDEN, HIDDEN)
            if side == "dec":
                add_mat(p + "_cv_w", HIDDEN, HIDDEN)
                add_mat(p + "_co_w", HIDDEN, HIDDEN)
            add_mat(p + "_ff_w1", HIDDEN, DFF)
            add_mat(p + "_ff_w2t", HIDDEN, DFF)     # stored transposed
    # --- vectors (one row each) ---
    for n in ("enc_emb_b", "dec_emb_b", "enc_norm_g", "enc_norm_b",
              "dec_norm_g", "dec_norm_b"):
        add_vec(n, HIDDEN)
    add_vec("head_b", 2 * Y_SIZE)
    for side in ("enc", "dec"):
        for l in range(NLAYERS):
            p = f"{side}{l}"
            add_vec(p + "_bqkv", 3 * HIDDEN)
            add_vec(p + "_bo", HIDDEN)
            if side == "dec":
                add_vec(p + "_cv_b", HIDDEN)
                add_vec(p + "_co_b", HIDDEN)
            n_ln = 2 if side == "enc" else 3
            for i in range(1, n_ln + 1):
                add_vec(p + f"_ln{i}_g", HIDDEN)
                add_vec(p + f"_ln{i}_b", HIDDEN)
            add_vec(p + "_ff_b1", DFF)
            add_vec(p + "_ff_b2", HIDDEN)
    total = -(-row[0] // 8) * 8
    return layout, total


_LAYOUT, _SLAB_ROWS = _make_layout()


def pack_params(params):
    """One-time packing of all weights into a single (rows, 256) f32 slab."""
    slab = np.zeros((_SLAB_ROWS, SLAB_W), np.float32)

    def put(name, arr):
        off, (r, c) = _LAYOUT[name]
        slab[off:off + r, :c] = np.asarray(arr, np.float32).reshape(r, c)

    scale = float(HD) ** -0.5

    enc_emb_w = np.asarray(params["enc_emb_w"], np.float32)
    put("enc_emb_wx", enc_emb_w[:X_SIZE])
    put("enc_emb_wy", enc_emb_w[X_SIZE:X_SIZE + Y_SIZE])
    put("enc_emb_b", params["enc_emb_b"])
    put("dec_emb_w", params["dec_emb_w"])
    put("dec_emb_b", params["dec_emb_b"])
    put("enc_norm_g", params["enc_norm_g"]); put("enc_norm_b", params["enc_norm_b"])
    put("dec_norm_g", params["dec_norm_g"]); put("dec_norm_b", params["dec_norm_b"])
    put("head_w", np.concatenate([np.asarray(params["mean_w"], np.float32),
                                  np.asarray(params["std_w"], np.float32)], axis=1))
    put("head_b", np.concatenate([np.asarray(params["mean_b"], np.float32),
                                  np.asarray(params["std_b"], np.float32)]))

    def put_attn(prefix, ap):
        wqkv = np.concatenate([np.asarray(ap["wq"], np.float32) * scale,
                               np.asarray(ap["wk"], np.float32),
                               np.asarray(ap["wv"], np.float32)], axis=1)
        bqkv = np.concatenate([np.asarray(ap["bq"], np.float32) * scale,
                               np.asarray(ap["bk"], np.float32),
                               np.asarray(ap["bv"], np.float32)])
        put(prefix + "_wqkv", wqkv)
        put(prefix + "_bqkv", bqkv)
        put(prefix + "_wo", ap["wo"])
        put(prefix + "_bo", ap["bo"])

    for l, lp in enumerate(params["enc_layers"]):
        p = f"enc{l}"
        put_attn(p, lp["attn"])
        put(p + "_ff_w1", lp["ff_w1"]); put(p + "_ff_b1", lp["ff_b1"])
        put(p + "_ff_w2t", np.asarray(lp["ff_w2"], np.float32).T)
        put(p + "_ff_b2", lp["ff_b2"])
        for i in (1, 2):
            put(p + f"_ln{i}_g", lp[f"ln{i}_g"]); put(p + f"_ln{i}_b", lp[f"ln{i}_b"])

    for l, lp in enumerate(params["dec_layers"]):
        p = f"dec{l}"
        put_attn(p, lp["self_attn"])
        ca = lp["cross_attn"]
        put(p + "_cv_w", ca["wv"]); put(p + "_cv_b", ca["bv"])
        put(p + "_co_w", ca["wo"]); put(p + "_co_b", ca["bo"])
        put(p + "_ff_w1", lp["ff_w1"]); put(p + "_ff_b1", lp["ff_b1"])
        put(p + "_ff_w2t", np.asarray(lp["ff_w2"], np.float32).T)
        put(p + "_ff_b2", lp["ff_b2"])
        for i in (1, 2, 3):
            put(p + f"_ln{i}_g", lp[f"ln{i}_g"]); put(p + f"_ln{i}_b", lp[f"ln{i}_b"])

    return jnp.asarray(slab)


# ----------------------- shape-only attention constants ----------------------
def _attn_consts(sp, sf):
    """Block-diagonal head masks / indicators (compile-time constants)."""
    d_head = np.arange(HIDDEN) // HD                      # head owning each dim

    def block(s_len):
        h_of_row = np.arange(NHEAD * s_len) // s_len
        kv = (h_of_row[:, None] == d_head[None, :]).astype(np.float32)      # (NH*S, H)
        ind = np.zeros((NHEAD * s_len, HIDDEN), np.float32)                  # (NH*S, H), first NH cols used
        ind[np.arange(NHEAD * s_len), h_of_row] = 1.0
        return kv, ind

    kv_s, ind_s = block(sp)
    kv_t, ind_t = block(sf)
    head_exp = (np.arange(NHEAD)[:, None] == d_head[None, :]).astype(np.float32)  # (NH, H)
    return np.concatenate([kv_s, ind_s, kv_t, ind_t, head_exp], axis=0)


# ----------------------------- fused kernel ---------------------------------
def _fused_forward_kernel(layout, sp, sf,
                          px_ref, py_ref, fx_ref, consts_ref, slab_ref, out_ref):
    f32 = jnp.float32

    def mat(name):
        off, (r, c) = layout[name]
        return slab_ref[off:off + r, :c]

    def vec(name):
        off, (_, c) = layout[name]
        return slab_ref[off:off + 1, :c]                       # (1, c) broadcast row

    def linear(x, wname, bname):
        return jnp.dot(x, mat(wname), preferred_element_type=f32) + vec(bname)

    def linear_t(x, wtname, bname):                            # weight stored (out, in)
        return (jax.lax.dot_general(x, mat(wtname), (((1,), (1,)), ((), ())),
                                    preferred_element_type=f32) + vec(bname))

    def layer_norm(x, gname, bname):
        mu = jnp.mean(x, axis=-1, keepdims=True)
        var = jnp.mean(jnp.square(x - mu), axis=-1, keepdims=True)
        return (x - mu) * jax.lax.rsqrt(var + LN_EPS) * vec(gname) + vec(bname)

    def ffn(x, p):
        h = jnp.maximum(linear(x, p + "_ff_w1", p + "_ff_b1"), 0.0)   # relu
        return linear_t(h, p + "_ff_w2t", p + "_ff_b2")

    def mha(x, p, key_bias, kv_mask, ind, head_exp):
        # x: (S, H).  All-heads attention via block-diagonal masking:
        # one matmul each for scores, softmax denominator and A@V.
        qkv = linear(x, p + "_wqkv", p + "_bqkv")               # (S, 3H); Q pre-scaled
        q = qkv[:, :HIDDEN]
        k = qkv[:, HIDDEN:2 * HIDDEN]
        v = qkv[:, 2 * HIDDEN:3 * HIDDEN]
        k_blk = jnp.concatenate([k] * NHEAD, axis=0) * kv_mask  # (NH*S, H)
        v_blk = jnp.concatenate([v] * NHEAD, axis=0) * kv_mask  # (NH*S, H)
        s = jax.lax.dot_general(q, k_blk, (((1,), (1,)), ((), ())),
                                preferred_element_type=f32)     # (S, NH*S)
        s = s + key_bias
        s = s - jnp.max(s, axis=-1, keepdims=True)              # row max (exact per-head softmax)
        e = jnp.exp(s)
        denom = jnp.dot(e, ind, preferred_element_type=f32)     # (S, NH) per-head sums
        o_un = jnp.dot(e, v_blk, preferred_element_type=f32)    # (S, H) unnormalized
        inv = pl.reciprocal(denom, approx=True)                 # EUP
        o = o_un * jnp.dot(inv, head_exp, preferred_element_type=f32)
        return linear(o, p + "_wo", p + "_bo")

    px = px_ref[0]                                              # (SP, X)
    py = py_ref[0]                                              # (SP, Y)
    fx = fx_ref[0]                                              # (SF, X)

    # attention constants
    o0 = NHEAD * sp
    kv_src = consts_ref[0:o0, :]
    ind_src = consts_ref[o0:2 * o0, :NHEAD]
    o1 = 2 * o0
    kv_tgt = consts_ref[o1:o1 + NHEAD * sf, :]
    ind_tgt = consts_ref[o1 + NHEAD * sf:o1 + 2 * NHEAD * sf, :NHEAD]
    o2 = o1 + 2 * NHEAD * sf
    head_exp = consts_ref[o2:o2 + NHEAD, :]

    # key-padding biases, computed in-kernel (matches torch mask derivation).
    fmax = jnp.float32(F32_MAX)

    def valid_count_row(a):
        # (S, F) -> (1, S): #features that are finite and != nan_value, on lanes.
        va = jnp.where((jnp.abs(a) <= fmax) & (a != NAN_VALUE), 1.0, 0.0)
        ones = jnp.ones((1, a.shape[-1]), f32)
        return jax.lax.dot_general(ones, va, (((1,), (1,)), ((), ())),
                                   preferred_element_type=f32)

    src_bias = jnp.where(valid_count_row(px) + valid_count_row(py) > 0.0, 0.0, NEG_INF)
    tgt_bias = jnp.where(valid_count_row(fx) > 0.0, 0.0, NEG_INF)
    src_bias = jnp.concatenate([src_bias] * NHEAD, axis=1)      # (1, NH*SP)
    tgt_bias = jnp.concatenate([tgt_bias] * NHEAD, axis=1)      # (1, NH*SF)

    # embeddings (enc_emb applied to [past_x | past_y] via split weights)
    x = (jnp.dot(px, mat("enc_emb_wx"), preferred_element_type=f32)
         + jnp.dot(py, mat("enc_emb_wy"), preferred_element_type=f32)
         + vec("enc_emb_b"))                                    # (SP, H)
    t = linear(fx, "dec_emb_w", "dec_emb_b")                    # (SF, H)

    # encoder (post-norm TransformerEncoderLayer)
    for l in range(NLAYERS):
        p = f"enc{l}"
        a = mha(x, p, src_bias, kv_src, ind_src, head_exp)
        x = layer_norm(x + a, p + "_ln1_g", p + "_ln1_b")
        x = layer_norm(x + ffn(x, p), p + "_ln2_g", p + "_ln2_b")
    x = layer_norm(x, "enc_norm_g", "enc_norm_b")

    # memory.max over the sequence axis (pooled encoder state)
    pooled = jnp.max(x, axis=0, keepdims=True)                  # (1, H)

    # decoder (post-norm TransformerDecoderLayer)
    for l in range(NLAYERS):
        p = f"dec{l}"
        a = mha(t, p, tgt_bias, kv_tgt, ind_tgt, head_exp)
        t = layer_norm(t + a, p + "_ln1_g", p + "_ln1_b")
        # cross-attention over identical pooled memory rows -> uniform softmax
        c = linear(linear(pooled, p + "_cv_w", p + "_cv_b"),
                   p + "_co_w", p + "_co_b")                    # (1, H)
        t = layer_norm(t + c, p + "_ln2_g", p + "_ln2_b")
        t = layer_norm(t + ffn(t, p), p + "_ln3_g", p + "_ln3_b")
    t = layer_norm(t, "dec_norm_g", "dec_norm_b")

    # distribution head: [mean | sigma]
    ms = linear(t, "head_w", "head_b")                          # (SF, 2*Y)
    mean = ms[:, :Y_SIZE]
    ls = ms[:, Y_SIZE:]
    # softplus with PyTorch's threshold=20 behaviour
    softp = jnp.where(ls > 20.0, ls, jnp.log(1.0 + jnp.exp(jnp.minimum(ls, 20.0))))
    sigma = MIN_STD + (1.0 - MIN_STD) * softp
    out_ref[0] = jnp.concatenate([mean, sigma], axis=-1)


# --------------------------------- forward -----------------------------------
def forward(slab, past_x, past_y, future_x):
    b, sp, _ = past_x.shape
    sf = future_x.shape[1]

    consts = _attn_consts(sp, sf)                               # trace-time constant

    kernel = functools.partial(_fused_forward_kernel, _LAYOUT, sp, sf)
    out = pl.pallas_call(
        kernel,
        out_shape=jax.ShapeDtypeStruct((b, sf, 2 * Y_SIZE), jnp.float32),
        grid=(b,),
        in_specs=[
            pl.BlockSpec((1, sp, X_SIZE), lambda i: (i, 0, 0)),
            pl.BlockSpec((1, sp, Y_SIZE), lambda i: (i, 0, 0)),
            pl.BlockSpec((1, sf, X_SIZE), lambda i: (i, 0, 0)),
            pl.BlockSpec(consts.shape, lambda i: (0, 0)),       # DMA'd once (constant index)
            pl.BlockSpec(slab.shape, lambda i: (0, 0)),         # single weight slab, DMA'd once
        ],
        out_specs=pl.BlockSpec((1, sf, 2 * Y_SIZE), lambda i: (i, 0, 0)),
        compiler_params=pltpu.CompilerParams(
            dimension_semantics=("parallel",)),                  # v7x: 2 TCs split the batch
    )(past_x.astype(jnp.float32), past_y.astype(jnp.float32),
      future_x.astype(jnp.float32), consts, slab)

    return out[..., :Y_SIZE], out[..., Y_SIZE:]


# ----------------------------- parameter init --------------------------------
def _linear_init(key, fan_in, fan_out):
    kw, kb = jax.random.split(key)
    bound = 1.0 / (fan_in ** 0.5)
    w = jax.random.uniform(kw, (fan_in, fan_out), jnp.float32, -bound, bound)
    b = jax.random.uniform(kb, (fan_out,), jnp.float32, -bound, bound)
    return w, b


def _attn_init(key, h):
    keys = jax.random.split(key, 4)
    bound = (6.0 / (2.0 * h)) ** 0.5          # xavier-uniform for in_proj
    p = {}
    for name, kk in zip(("wq", "wk", "wv"), keys[:3]):
        p[name] = jax.random.uniform(kk, (h, h), jnp.float32, -bound, bound)
        p["b" + name[1]] = jnp.zeros((h,), jnp.float32)
    wo, _ = _linear_init(keys[3], h, h)
    p["wo"] = wo
    p["bo"] = jnp.zeros((h,), jnp.float32)
    return p


def _enc_layer_init(key, h, dff):
    k = jax.random.split(key, 3)
    p = {"attn": _attn_init(k[0], h)}
    p["ff_w1"], p["ff_b1"] = _linear_init(k[1], h, dff)
    p["ff_w2"], p["ff_b2"] = _linear_init(k[2], dff, h)
    for i in (1, 2):
        p[f"ln{i}_g"] = jnp.ones((h,), jnp.float32)
        p[f"ln{i}_b"] = jnp.zeros((h,), jnp.float32)
    return p


def _dec_layer_init(key, h, dff):
    k = jax.random.split(key, 4)
    p = {"self_attn": _attn_init(k[0], h), "cross_attn": _attn_init(k[1], h)}
    p["ff_w1"], p["ff_b1"] = _linear_init(k[2], h, dff)
    p["ff_w2"], p["ff_b2"] = _linear_init(k[3], dff, h)
    for i in (1, 2, 3):
        p[f"ln{i}_g"] = jnp.ones((h,), jnp.float32)
        p[f"ln{i}_b"] = jnp.zeros((h,), jnp.float32)
    return p


def init_params(key):
    keys = jax.random.split(key, 6)
    p = {}
    p["enc_emb_w"], p["enc_emb_b"] = _linear_init(keys[0], X_SIZE + Y_SIZE, HIDDEN)
    p["dec_emb_w"], p["dec_emb_b"] = _linear_init(keys[1], X_SIZE, HIDDEN)
    p["enc_layers"] = [_enc_layer_init(k, HIDDEN, DFF)
                       for k in jax.random.split(keys[2], NLAYERS)]
    p["dec_layers"] = [_dec_layer_init(k, HIDDEN, DFF)
                       for k in jax.random.split(keys[3], NLAYERS)]
    p["enc_norm_g"] = jnp.ones((HIDDEN,), jnp.float32)
    p["enc_norm_b"] = jnp.zeros((HIDDEN,), jnp.float32)
    p["dec_norm_g"] = jnp.ones((HIDDEN,), jnp.float32)
    p["dec_norm_b"] = jnp.zeros((HIDDEN,), jnp.float32)
    p["mean_w"], p["mean_b"] = _linear_init(keys[4], HIDDEN, Y_SIZE)
    p["std_w"], p["std_b"] = _linear_init(keys[5], HIDDEN, Y_SIZE)
    return p


# --------------------------------- main ---------------------------------------
if __name__ == "__main__":
    key = jax.random.PRNGKey(0)
    kp, k1, k2, k3 = jax.random.split(key, 4)
    params = init_params(kp)
    slab = pack_params(params)          # one-time weight packing (hoisted out of forward)

    B, SP, SF = 2, 12, 8
    past_x = jax.random.normal(k1, (B, SP, X_SIZE), jnp.float32)
    past_y = jax.random.normal(k2, (B, SP, Y_SIZE), jnp.float32)
    future_x = jax.random.normal(k3, (B, SF, X_SIZE), jnp.float32)

    fwd = jax.jit(forward)
    mean, sigma = fwd(slab, past_x, past_y, future_x)
    jax.block_until_ready((mean, sigma))

    assert mean.shape == (B, SF, Y_SIZE) and sigma.shape == (B, SF, Y_SIZE)
    assert bool(jnp.all(jnp.isfinite(mean))) and bool(jnp.all(sigma > MIN_STD * 0.5))
    print("KERNEL_OK")
</pallas_src>

<mosaic_0001>
module attributes {stable_mosaic.version = 11 : i64} {
  func.func @_fused_forward_kernel(%arg0: i32, %arg1: memref<1x12x6xf32, #tpu.memory_space<vmem>>, %arg2: memref<1x12x2xf32, #tpu.memory_space<vmem>>, %arg3: memref<1x8x6xf32, #tpu.memory_space<vmem>>, %arg4: memref<328x32xf32, #tpu.memory_space<vmem>>, %arg5: memref<744x256xf32, #tpu.memory_space<vmem>>, %arg6: memref<1x8x4xf32, #tpu.memory_space<vmem>>) attributes {dimension_semantics = [#tpu.dimension_semantics<parallel>], iteration_bounds = array<i64: 2>, scalar_prefetch = 0 : i64, scratch_operands = 0 : i64, tpu.core_type = #tpu.core_type<tc>, window_params = [{transform_indices = @transform_0, window_bounds = array<i64: 1, 12, 6>}, {transform_indices = @transform_1, window_bounds = array<i64: 1, 12, 2>}, {transform_indices = @transform_2, window_bounds = array<i64: 1, 8, 6>}, {pipeline_mode = #tpu.pipeline_mode<synchronous>, transform_indices = @transform_3, window_bounds = array<i64: 328, 32>}, {pipeline_mode = #tpu.pipeline_mode<synchronous>, transform_indices = @transform_4, window_bounds = array<i64: 744, 256>}, {transform_indices = @transform_5, window_bounds = array<i64: 1, 8, 4>}]} {
    %c0 = arith.constant 0 : index
    %c0_0 = arith.constant 0 : index
    %c0_1 = arith.constant 0 : index
    %0 = vector.load %arg1[%c0, %c0_0, %c0_1] : memref<1x12x6xf32, #tpu.memory_space<vmem>>, vector<1x12x6xf32>
    %1 = vector.shape_cast %0 : vector<1x12x6xf32> to vector<12x6xf32>
    %c0_2 = arith.constant 0 : index
    %c0_3 = arith.constant 0 : index
    %c0_4 = arith.constant 0 : index
    %2 = vector.load %arg2[%c0_2, %c0_3, %c0_4] : memref<1x12x2xf32, #tpu.memory_space<vmem>>, vector<1x12x2xf32>
    %3 = vector.shape_cast %2 : vector<1x12x2xf32> to vector<12x2xf32>
    %c0_5 = arith.constant 0 : index
    %c0_6 = arith.constant 0 : index
    %c0_7 = arith.constant 0 : index
    %4 = vector.load %arg3[%c0_5, %c0_6, %c0_7] : memref<1x8x6xf32, #tpu.memory_space<vmem>>, vector<1x8x6xf32>
    %5 = vector.shape_cast %4 : vector<1x8x6xf32> to vector<8x6xf32>
    %c0_8 = arith.constant 0 : index
    %c0_9 = arith.constant 0 : index
    %6 = vector.load %arg4[%c0_8, %c0_9] : memref<328x32xf32, #tpu.memory_space<vmem>>, vector<96x32xf32>
    %c96 = arith.constant 96 : index
    %c0_10 = arith.constant 0 : index
    %7 = vector.load %arg4[%c96, %c0_10] : memref<328x32xf32, #tpu.memory_space<vmem>>, vector<96x8xf32>
    %c192 = arith.constant 192 : index
    %c0_11 = arith.constant 0 : index
    %8 = vector.load %arg4[%c192, %c0_11] : memref<328x32xf32, #tpu.memory_space<vmem>>, vector<64x32xf32>
    %c256 = arith.constant 256 : index
    %c0_12 = arith.constant 0 : index
    %9 = vector.load %arg4[%c256, %c0_12] : memref<328x32xf32, #tpu.memory_space<vmem>>, vector<64x8xf32>
    %c320 = arith.constant 320 : index
    %c0_13 = arith.constant 0 : index
    %10 = vector.load %arg4[%c320, %c0_13] : memref<328x32xf32, #tpu.memory_space<vmem>>, vector<8x32xf32>
    %11 = math.absf %1 : vector<12x6xf32>
    %cst = arith.constant 3.40282347E+38 : f32
    %12 = vector.broadcast %cst : f32 to vector<12x6xf32>
    %13 = arith.cmpf ole, %11, %12 : vector<12x6xf32>
    %cst_14 = arith.constant 0.000000e+00 : f32
    %14 = vector.broadcast %cst_14 : f32 to vector<12x6xf32>
    %15 = arith.cmpf one, %1, %14 : vector<12x6xf32>
    %16 = arith.andi %13, %15 : vector<12x6xi1>
    %cst_15 = arith.constant 1.000000e+00 : f32
    %cst_16 = arith.constant 0.000000e+00 : f32
    %17 = vector.broadcast %cst_15 : f32 to vector<12x6xf32>
    %18 = vector.broadcast %cst_16 : f32 to vector<12x6xf32>
    %19 = arith.select %16, %17, %18 : vector<12x6xi1>, vector<12x6xf32>
    %cst_17 = arith.constant 1.000000e+00 : f32
    %20 = vector.broadcast %cst_17 : f32 to vector<1x6xf32>
    %cst_18 = arith.constant dense<0.000000e+00> : vector<1x12xf32>
    %21 = tpu.matmul %20, %19, %cst_18 {dimension_numbers = #tpu.dot_dimension_numbers<[1], [1], [0], [0], [0, 0, 1, 0], [], []>} : vector<1x6xf32>, vector<12x6xf32>, vector<1x12xf32> -> vector<1x12xf32>
    %22 = math.absf %3 : vector<12x2xf32>
    %cst_19 = arith.constant 3.40282347E+38 : f32
    %23 = vector.broadcast %cst_19 : f32 to vector<12x2xf32>
    %24 = arith.cmpf ole, %22, %23 : vector<12x2xf32>
    %cst_20 = arith.constant 0.000000e+00 : f32
    %25 = vector.broadcast %cst_20 : f32 to vector<12x2xf32>
    %26 = arith.cmpf one, %3, %25 : vector<12x2xf32>
    %27 = arith.andi %24, %26 : vector<12x2xi1>
    %cst_21 = arith.constant 1.000000e+00 : f32
    %cst_22 = arith.constant 0.000000e+00 : f32
    %28 = vector.broadcast %cst_21 : f32 to vector<12x2xf32>
    %29 = vector.broadcast %cst_22 : f32 to vector<12x2xf32>
    %30 = arith.select %27, %28, %29 : vector<12x2xi1>, vector<12x2xf32>
    %cst_23 = arith.constant 1.000000e+00 : f32
    %31 = vector.broadcast %cst_23 : f32 to vector<1x2xf32>
    %cst_24 = arith.constant dense<0.000000e+00> : vector<1x12xf32>
    %32 = tpu.matmul %31, %30, %cst_24 {dimension_numbers = #tpu.dot_dimension_numbers<[1], [1], [0], [0], [0, 0, 1, 0], [], []>} : vector<1x2xf32>, vector<12x2xf32>, vector<1x12xf32> -> vector<1x12xf32>
    %33 = arith.addf %21, %32 : vector<1x12xf32>
    %cst_25 = arith.constant 0.000000e+00 : f32
    %34 = vector.broadcast %cst_25 : f32 to vector<1x12xf32>
    %35 = arith.cmpf ogt, %33, %34 : vector<1x12xf32>
    %cst_26 = arith.constant 0.000000e+00 : f32
    %cst_27 = arith.constant -1.000000e+30 : f32
    %36 = vector.broadcast %cst_26 : f32 to vector<1x12xf32>
    %37 = vector.broadcast %cst_27 : f32 to vector<1x12xf32>
    %38 = arith.select %35, %36, %37 : vector<1x12xi1>, vector<1x12xf32>
    %39 = math.absf %5 : vector<8x6xf32>
    %cst_28 = arith.constant 3.40282347E+38 : f32
    %40 = vector.broadcast %cst_28 : f32 to vector<8x6xf32>
    %41 = arith.cmpf ole, %39, %40 : vector<8x6xf32>
    %cst_29 = arith.constant 0.000000e+00 : f32
    %42 = vector.broadcast %cst_29 : f32 to vector<8x6xf32>
    %43 = arith.cmpf one, %5, %42 : vector<8x6xf32>
    %44 = arith.andi %41, %43 : vector<8x6xi1>
    %cst_30 = arith.constant 1.000000e+00 : f32
    %cst_31 = arith.constant 0.000000e+00 : f32
    %45 = vector.broadcast %cst_30 : f32 to vector<8x6xf32>
    %46 = vector.broadcast %cst_31 : f32 to vector<8x6xf32>
    %47 = arith.select %44, %45, %46 : vector<8x6xi1>, vector<8x6xf32>
    %cst_32 = arith.constant 1.000000e+00 : f32
    %48 = vector.broadcast %cst_32 : f32 to vector<1x6xf32>
    %cst_33 = arith.constant dense<0.000000e+00> : vector<1x8xf32>
    %49 = tpu.matmul %48, %47, %cst_33 {dimension_numbers = #tpu.dot_dimension_numbers<[1], [1], [0], [0], [0, 0, 1, 0], [], []>} : vector<1x6xf32>, vector<8x6xf32>, vector<1x8xf32> -> vector<1x8xf32>
    %cst_34 = arith.constant 0.000000e+00 : f32
    %50 = vector.broadcast %cst_34 : f32 to vector<1x8xf32>
    %51 = arith.cmpf ogt, %49, %50 : vector<1x8xf32>
    %cst_35 = arith.constant 0.000000e+00 : f32
    %cst_36 = arith.constant -1.000000e+30 : f32
    %52 = vector.broadcast %cst_35 : f32 to vector<1x8xf32>
    %53 = vector.broadcast %cst_36 : f32 to vector<1x8xf32>
    %54 = arith.select %51, %52, %53 : vector<1x8xi1>, vector<1x8xf32>
    %55 = tpu.concatenate %38, %38, %38, %38, %38, %38, %38, %38 in 1 : vector<1x12xf32>, vector<1x12xf32>, vector<1x12xf32>, vector<1x12xf32>, vector<1x12xf32>, vector<1x12xf32>, vector<1x12xf32>, vector<1x12xf32> -> vector<1x96xf32>
    %56 = tpu.concatenate %54, %54, %54, %54, %54, %54, %54, %54 in 1 : vector<1x8xf32>, vector<1x8xf32>, vector<1x8xf32>, vector<1x8xf32>, vector<1x8xf32>, vector<1x8xf32>, vector<1x8xf32>, vector<1x8xf32> -> vector<1x64xf32>
    %c0_37 = arith.constant 0 : index
    %c0_38 = arith.constant 0 : index
    %57 = vector.load %arg5[%c0_37, %c0_38] : memref<744x256xf32, #tpu.memory_space<vmem>>, vector<6x32xf32>
    %cst_39 = arith.constant dense<0.000000e+00> : vector<12x32xf32>
    %58 = tpu.matmul %1, %57, %cst_39 {dimension_numbers = #tpu.dot_dimension_numbers<[1], [0], [0], [1], [0, 0, 1, 1], [], []>} : vector<12x6xf32>, vector<6x32xf32>, vector<12x32xf32> -> vector<12x32xf32>
    %c8 = arith.constant 8 : index
    %c0_40 = arith.constant 0 : index
    %59 = vector.load %arg5[%c8, %c0_40] : memref<744x256xf32, #tpu.memory_space<vmem>>, vector<2x32xf32>
    %cst_41 = arith.constant dense<0.000000e+00> : vector<12x32xf32>
    %60 = tpu.matmul %3, %59, %cst_41 {dimension_numbers = #tpu.dot_dimension_numbers<[1], [0], [0], [1], [0, 0, 1, 1], [], []>} : vector<12x2xf32>, vector<2x32xf32>, vector<12x32xf32> -> vector<12x32xf32>
    %61 = arith.addf %58, %60 : vector<12x32xf32>
    %c696 = arith.constant 696 : index
    %c0_42 = arith.constant 0 : index
    %62 = vector.load %arg5[%c696, %c0_42] : memref<744x256xf32, #tpu.memory_space<vmem>>, vector<1x32xf32>
    %63 = vector.broadcast %62 : vector<1x32xf32> to vector<12x32xf32>
    %64 = arith.addf %61, %63 : vector<12x32xf32>
    %c16 = arith.constant 16 : index
    %c0_43 = arith.constant 0 : index
    %65 = vector.load %arg5[%c16, %c0_43] : memref<744x256xf32, #tpu.memory_space<vmem>>, vector<6x32xf32>
    %cst_44 = arith.constant dense<0.000000e+00> : vector<8x32xf32>
    %66 = tpu.matmul %5, %65, %cst_44 {dimension_numbers = #tpu.dot_dimension_numbers<[1], [0], [0], [1], [0, 0, 1, 1], [], []>} : vector<8x6xf32>, vector<6x32xf32>, vector<8x32xf32> -> vector<8x32xf32>
    %c697 = arith.constant 697 : index
    %c0_45 = arith.constant 0 : index
    %67 = vector.load %arg5[%c697, %c0_45] : memref<744x256xf32, #tpu.memory_space<vmem>>, vector<1x32xf32>
    %68 = vector.broadcast %67 : vector<1x32xf32> to vector<8x32xf32>
    %69 = arith.addf %66, %68 : vector<8x32xf32>
    %c56 = arith.constant 56 : index
    %c0_46 = arith.constant 0 : index
    %70 = vector.load %arg5[%c56, %c0_46] : memref<744x256xf32, #tpu.memory_space<vmem>>, vector<32x96xf32>
    %cst_47 = arith.constant dense<0.000000e+00> : vector<12x96xf32>
    %71 = tpu.matmul %64, %70, %cst_47 {dimension_numbers = #tpu.dot_dimension_numbers<[1], [0], [0], [1], [0, 0, 1, 1], [], []>} : vector<12x32xf32>, vector<32x96xf32>, vector<12x96xf32> -> vector<12x96xf32>
    %c703 = arith.constant 703 : index
    %c0_48 = arith.constant 0 : index
    %72 = vector.load %arg5[%c703, %c0_48] : memref<744x256xf32, #tpu.memory_space<vmem>>, vector<1x96xf32>
    %73 = vector.broadcast %72 : vector<1x96xf32> to vector<12x96xf32>
    %74 = arith.addf %71, %73 : vector<12x96xf32>
    %75 = vector.extract_strided_slice %74 {offsets = [0, 0], sizes = [12, 32], strides = [1, 1]} : vector<12x96xf32> to vector<12x32xf32>
    %76 = vector.extract_strided_slice %74 {offsets = [0, 32], sizes = [12, 32], strides = [1, 1]} : vector<12x96xf32> to vector<12x32xf32>
    %77 = vector.extract_strided_slice %74 {offsets = [0, 64], sizes = [12, 32], strides = [1, 1]} : vector<12x96xf32> to vector<12x32xf32>
    %78 = tpu.concatenate %76, %76, %76, %76, %76, %76, %76, %76 in 0 : vector<12x32xf32>, vector<12x32xf32>, vector<12x32xf32>, vector<12x32xf32>, vector<12x32xf32>, vector<12x32xf32>, vector<12x32xf32>, vector<12x32xf32> -> vector<96x32xf32>
    %79 = arith.mulf %78, %6 : vector<96x32xf32>
    %80 = tpu.concatenate %77, %77, %77, %77, %77, %77, %77, %77 in 0 : vector<12x32xf32>, vector<12x32xf32>, vector<12x32xf32>, vector<12x32xf32>, vector<12x32xf32>, vector<12x32xf32>, vector<12x32xf32>, vector<12x32xf32> -> vector<96x32xf32>
    %81 = arith.mulf %80, %6 : vector<96x32xf32>
    %cst_49 = arith.constant dense<0.000000e+00> : vector<12x96xf32>
    %82 = tpu.matmul %75, %79, %cst_49 {dimension_numbers = #tpu.dot_dimension_numbers<[1], [1], [0], [0], [0, 0, 1, 0], [], []>} : vector<12x32xf32>, vector<96x32xf32>, vector<12x96xf32> -> vector<12x96xf32>
    %83 = vector.broadcast %55 : vector<1x96xf32> to vector<12x96xf32>
    %84 = arith.addf %82, %83 : vector<12x96xf32>
    %cst_50 = arith.constant dense<0xFF800000> : vector<12xf32>
    %85 = vector.multi_reduction <maximumf>, %84, %cst_50 [1] : vector<12x96xf32> to vector<12xf32>
    %86 = vector.shape_cast %85 : vector<12xf32> to vector<12x1xf32>
    %87 = vector.broadcast %86 : vector<12x1xf32> to vector<12x96xf32>
    %88 = arith.subf %84, %87 : vector<12x96xf32>
    %89 = math.exp %88 : vector<12x96xf32>
    %cst_51 = arith.constant dense<0.000000e+00> : vector<12x8xf32>
    %90 = tpu.matmul %89, %7, %cst_51 {dimension_numbers = #tpu.dot_dimension_numbers<[1], [0], [0], [1], [0, 0, 1, 1], [], []>} : vector<12x96xf32>, vector<96x8xf32>, vector<12x8xf32> -> vector<12x8xf32>
    %cst_52 = arith.constant dense<0.000000e+00> : vector<12x32xf32>
    %91 = tpu.matmul %89, %81, %cst_52 {dimension_numbers = #tpu.dot_dimension_numbers<[1], [0], [0], [1], [0, 0, 1, 1], [], []>} : vector<12x96xf32>, vector<96x32xf32>, vector<12x32xf32> -> vector<12x32xf32>
    %92 = tpu.reciprocal %90 {approx = true} : vector<12x8xf32> -> vector<12x8xf32>
    %cst_53 = arith.constant dense<0.000000e+00> : vector<12x32xf32>
    %93 = tpu.matmul %92, %10, %cst_53 {dimension_numbers = #tpu.dot_dimension_numbers<[1], [0], [0], [1], [0, 0, 1, 1], [], []>} : vector<12x8xf32>, vector<8x32xf32>, vector<12x32xf32> -> vector<12x32xf32>
    %94 = arith.mulf %91, %93 : vector<12x32xf32>
    %c88 = arith.constant 88 : index
    %c0_54 = arith.constant 0 : index
    %95 = vector.load %arg5[%c88, %c0_54] : memref<744x256xf32, #tpu.memory_space<vmem>>, vector<32x32xf32>
    %cst_55 = arith.constant dense<0.000000e+00> : vector<12x32xf32>
    %96 = tpu.matmul %94, %95, %cst_55 {dimension_numbers = #tpu.dot_dimension_numbers<[1], [0], [0], [1], [0, 0, 1, 1], [], []>} : vector<12x32xf32>, vector<32x32xf32>, vector<12x32xf32> -> vector<12x32xf32>
    %c704 = arith.constant 704 : index
    %c0_56 = arith.constant 0 : index
    %97 = vector.load %arg5[%c704, %c0_56] : memref<744x256xf32, #tpu.memory_space<vmem>>, vector<1x32xf32>
    %98 = vector.broadcast %97 : vector<1x32xf32> to vector<12x32xf32>
    %99 = arith.addf %96, %98 : vector<12x32xf32>
    %100 = arith.addf %64, %99 : vector<12x32xf32>
    %cst_57 = arith.constant dense<0.000000e+00> : vector<12xf32>
    %101 = vector.multi_reduction <add>, %100, %cst_57 [1] : vector<12x32xf32> to vector<12xf32>
    %102 = vector.shape_cast %101 : vector<12xf32> to vector<12x1xf32>
    %cst_58 = arith.constant 3.200000e+01 : f32
    %103 = vector.broadcast %cst_58 : f32 to vector<12x1xf32>
    %104 = arith.divf %102, %103 : vector<12x1xf32>
    %105 = vector.broadcast %104 : vector<12x1xf32> to vector<12x32xf32>
    %106 = arith.subf %100, %105 : vector<12x32xf32>
    %107 = arith.mulf %106, %106 : vector<12x32xf32>
    %cst_59 = arith.constant dense<0.000000e+00> : vector<12xf32>
    %108 = vector.multi_reduction <add>, %107, %cst_59 [1] : vector<12x32xf32> to vector<12xf32>
    %109 = vector.shape_cast %108 : vector<12xf32> to vector<12x1xf32>
    %cst_60 = arith.constant 3.200000e+01 : f32
    %110 = vector.broadcast %cst_60 : f32 to vector<12x1xf32>
    %111 = arith.divf %109, %110 : vector<12x1xf32>
    %112 = vector.broadcast %104 : vector<12x1xf32> to vector<12x32xf32>
    %113 = arith.subf %100, %112 : vector<12x32xf32>
    %cst_61 = arith.constant 9.99999974E-6 : f32
    %114 = vector.broadcast %cst_61 : f32 to vector<12x1xf32>
    %115 = arith.addf %111, %114 : vector<12x1xf32>
    %116 = math.rsqrt %115 : vector<12x1xf32>
    %117 = vector.broadcast %116 : vector<12x1xf32> to vector<12x32xf32>
    %118 = arith.mulf %113, %117 : vector<12x32xf32>
    %c705 = arith.constant 705 : index
    %c0_62 = arith.constant 0 : index
    %119 = vector.load %arg5[%c705, %c0_62] : memref<744x256xf32, #tpu.memory_space<vmem>>, vector<1x32xf32>
    %120 = vector.broadcast %119 : vector<1x32xf32> to vector<12x32xf32>
    %121 = arith.mulf %118, %120 : vector<12x32xf32>
    %c706 = arith.constant 706 : index
    %c0_63 = arith.constant 0 : index
    %122 = vector.load %arg5[%c706, %c0_63] : memref<744x256xf32, #tpu.memory_space<vmem>>, vector<1x32xf32>
    %123 = vector.broadcast %122 : vector<1x32xf32> to vector<12x32xf32>
    %124 = arith.addf %121, %123 : vector<12x32xf32>
    %c120 = arith.constant 120 : index
    %c0_64 = arith.constant 0 : index
    %125 = vector.load %arg5[%c120, %c0_64] : memref<744x256xf32, #tpu.memory_space<vmem>>, vector<32x256xf32>
    %cst_65 = arith.constant dense<0.000000e+00> : vector<12x256xf32>
    %126 = tpu.matmul %124, %125, %cst_65 {dimension_numbers = #tpu.dot_dimension_numbers<[1], [0], [0], [1], [0, 0, 1, 1], [], []>} : vector<12x32xf32>, vector<32x256xf32>, vector<12x256xf32> -> vector<12x256xf32>
    %c709 = arith.constant 709 : index
    %c0_66 = arith.constant 0 : index
    %127 = vector.load %arg5[%c709, %c0_66] : memref<744x256xf32, #tpu.memory_space<vmem>>, vector<1x256xf32>
    %128 = vector.broadcast %127 : vector<1x256xf32> to vector<12x256xf32>
    %129 = arith.addf %126, %128 : vector<12x256xf32>
    %cst_67 = arith.constant 0.000000e+00 : f32
    %130 = vector.broadcast %cst_67 : f32 to vector<12x256xf32>
    %131 = arith.maximumf %129, %130 : vector<12x256xf32>
    %c152 = arith.constant 152 : index
    %c0_68 = arith.constant 0 : index
    %132 = vector.load %arg5[%c152, %c0_68] : memref<744x256xf32, #tpu.memory_space<vmem>>, vector<32x256xf32>
    %cst_69 = arith.constant dense<0.000000e+00> : vector<12x32xf32>
    %133 = tpu.matmul %131, %132, %cst_69 {dimension_numbers = #tpu.dot_dimension_numbers<[1], [1], [0], [0], [0, 0, 1, 0], [], []>} : vector<12x256xf32>, vector<32x256xf32>, vector<12x32xf32> -> vector<12x32xf32>
    %c710 = arith.constant 710 : index
    %c0_70 = arith.constant 0 : index
    %134 = vector.load %arg5[%c710, %c0_70] : memref<744x256xf32, #tpu.memory_space<vmem>>, vector<1x32xf32>
    %135 = vector.broadcast %134 : vector<1x32xf32> to vector<12x32xf32>
    %136 = arith.addf %133, %135 : vector<12x32xf32>
    %137 = arith.addf %124, %136 : vector<12x32xf32>
    %cst_71 = arith.constant dense<0.000000e+00> : vector<12xf32>
    %138 = vector.multi_reduction <add>, %137, %cst_71 [1] : vector<12x32xf32> to vector<12xf32>
    %139 = vector.shape_cast %138 : vector<12xf32> to vector<12x1xf32>
    %cst_72 = arith.constant 3.200000e+01 : f32
    %140 = vector.broadcast %cst_72 : f32 to vector<12x1xf32>
    %141 = arith.divf %139, %140 : vector<12x1xf32>
    %142 = vector.broadcast %141 : vector<12x1xf32> to vector<12x32xf32>
    %143 = arith.subf %137, %142 : vector<12x32xf32>
    %144 = arith.mulf %143, %143 : vector<12x32xf32>
    %cst_73 = arith.constant dense<0.000000e+00> : vector<12xf32>
    %145 = vector.multi_reduction <add>, %144, %cst_73 [1] : vector<12x32xf32> to vector<12xf32>
    %146 = vector.shape_cast %145 : vector<12xf32> to vector<12x1xf32>
    %cst_74 = arith.constant 3.200000e+01 : f32
    %147 = vector.broadcast %cst_74 : f32 to vector<12x1xf32>
    %148 = arith.divf %146, %147 : vector<12x1xf32>
    %149 = vector.broadcast %141 : vector<12x1xf32> to vector<12x32xf32>
    %150 = arith.subf %137, %149 : vector<12x32xf32>
    %cst_75 = arith.constant 9.99999974E-6 : f32
    %151 = vector.broadcast %cst_75 : f32 to vector<12x1xf32>
    %152 = arith.addf %148, %151 : vector<12x1xf32>
    %153 = math.rsqrt %152 : vector<12x1xf32>
    %154 = vector.broadcast %153 : vector<12x1xf32> to vector<12x32xf32>
    %155 = arith.mulf %150, %154 : vector<12x32xf32>
    %c707 = arith.constant 707 : index
    %c0_76 = arith.constant 0 : index
    %156 = vector.load %arg5[%c707, %c0_76] : memref<744x256xf32, #tpu.memory_space<vmem>>, vector<1x32xf32>
    %157 = vector.broadcast %156 : vector<1x32xf32> to vector<12x32xf32>
    %158 = arith.mulf %155, %157 : vector<12x32xf32>
    %c708 = arith.constant 708 : index
    %c0_77 = arith.constant 0 : index
    %159 = vector.load %arg5[%c708, %c0_77] : memref<744x256xf32, #tpu.memory_space<vmem>>, vector<1x32xf32>
    %160 = vector.broadcast %159 : vector<1x32xf32> to vector<12x32xf32>
    %161 = arith.addf %158, %160 : vector<12x32xf32>
    %c184 = arith.constant 184 : index
    %c0_78 = arith.constant 0 : index
    %162 = vector.load %arg5[%c184, %c0_78] : memref<744x256xf32, #tpu.memory_space<vmem>>, vector<32x96xf32>
    %cst_79 = arith.constant dense<0.000000e+00> : vector<12x96xf32>
    %163 = tpu.matmul %161, %162, %cst_79 {dimension_numbers = #tpu.dot_dimension_numbers<[1], [0], [0], [1], [0, 0, 1, 1], [], []>} : vector<12x32xf32>, vector<32x96xf32>, vector<12x96xf32> -> vector<12x96xf32>
    %c711 = arith.constant 711 : index
    %c0_80 = arith.constant 0 : index
    %164 = vector.load %arg5[%c711, %c0_80] : memref<744x256xf32, #tpu.memory_space<vmem>>, vector<1x96xf32>
    %165 = vector.broadcast %164 : vector<1x96xf32> to vector<12x96xf32>
    %166 = arith.addf %163, %165 : vector<12x96xf32>
    %167 = vector.extract_strided_slice %166 {offsets = [0, 0], sizes = [12, 32], strides = [1, 1]} : vector<12x96xf32> to vector<12x32xf32>
    %168 = vector.extract_strided_slice %166 {offsets = [0, 32], sizes = [12, 32], strides = [1, 1]} : vector<12x96xf32> to vector<12x32xf32>
    %169 = vector.extract_strided_slice %166 {offsets = [0, 64], sizes = [12, 32], strides = [1, 1]} : vector<12x96xf32> to vector<12x32xf32>
    %170 = tpu.concatenate %168, %168, %168, %168, %168, %168, %168, %168 in 0 : vector<12x32xf32>, vector<12x32xf32>, vector<12x32xf32>, vector<12x32xf32>, vector<12x32xf32>, vector<12x32xf32>, vector<12x32xf32>, vector<12x32xf32> -> vector<96x32xf32>
    %171 = arith.mulf %170, %6 : vector<96x32xf32>
    %172 = tpu.concatenate %169, %169, %169, %169, %169, %169, %169, %169 in 0 : vector<12x32xf32>, vector<12x32xf32>, vector<12x32xf32>, vector<12x32xf32>, vector<12x32xf32>, vector<12x32xf32>, vector<12x32xf32>, vector<12x32xf32> -> vector<96x32xf32>
    %173 = arith.mulf %172, %6 : vector<96x32xf32>
    %cst_81 = arith.constant dense<0.000000e+00> : vector<12x96xf32>
    %174 = tpu.matmul %167, %171, %cst_81 {dimension_numbers = #tpu.dot_dimension_numbers<[1], [1], [0], [0], [0, 0, 1, 0], [], []>} : vector<12x32xf32>, vector<96x32xf32>, vector<12x96xf32> -> vector<12x96xf32>
    %175 = vector.broadcast %55 : vector<1x96xf32> to vector<12x96xf32>
    %176 = arith.addf %174, %175 : vector<12x96xf32>
    %cst_82 = arith.constant dense<0xFF800000> : vector<12xf32>
    %177 = vector.multi_reduction <maximumf>, %176, %cst_82 [1] : vector<12x96xf32> to vector<12xf32>
    %178 = vector.shape_cast %177 : vector<12xf32> to vector<12x1xf32>
    %179 = vector.broadcast %178 : vector<12x1xf32> to vector<12x96xf32>
    %180 = arith.subf %176, %179 : vector<12x96xf32>
    %181 = math.exp %180 : vector<12x96xf32>
    %cst_83 = arith.constant dense<0.000000e+00> : vector<12x8xf32>
    %182 = tpu.matmul %181, %7, %cst_83 {dimension_numbers = #tpu.dot_dimension_numbers<[1], [0], [0], [1], [0, 0, 1, 1], [], []>} : vector<12x96xf32>, vector<96x8xf32>, vector<12x8xf32> -> vector<12x8xf32>
    %cst_84 = arith.constant dense<0.000000e+00> : vector<12x32xf32>
    %183 = tpu.matmul %181, %173, %cst_84 {dimension_numbers = #tpu.dot_dimension_numbers<[1], [0], [0], [1], [0, 0, 1, 1], [], []>} : vector<12x96xf32>, vector<96x32xf32>, vector<12x32xf32> -> vector<12x32xf32>
    %184 = tpu.reciprocal %182 {approx = true} : vector<12x8xf32> -> vector<12x8xf32>
    %cst_85 = arith.constant dense<0.000000e+00> : vector<12x32xf32>
    %185 = tpu.matmul %184, %10, %cst_85 {dimension_numbers = #tpu.dot_dimension_numbers<[1], [0], [0], [1], [0, 0, 1, 1], [], []>} : vector<12x8xf32>, vector<8x32xf32>, vector<12x32xf32> -> vector<12x32xf32>
    %186 = arith.mulf %183, %185 : vector<12x32xf32>
    %c216 = arith.constant 216 : index
    %c0_86 = arith.constant 0 : index
    %187 = vector.load %arg5[%c216, %c0_86] : memref<744x256xf32, #tpu.memory_space<vmem>>, vector<32x32xf32>
    %cst_87 = arith.constant dense<0.000000e+00> : vector<12x32xf32>
    %188 = tpu.matmul %186, %187, %cst_87 {dimension_numbers = #tpu.dot_dimension_numbers<[1], [0], [0], [1], [0, 0, 1, 1], [], []>} : vector<12x32xf32>, vector<32x32xf32>, vector<12x32xf32> -> vector<12x32xf32>
    %c712 = arith.constant 712 : index
    %c0_88 = arith.constant 0 : index
    %189 = vector.load %arg5[%c712, %c0_88] : memref<744x256xf32, #tpu.memory_space<vmem>>, vector<1x32xf32>
    %190 = vector.broadcast %189 : vector<1x32xf32> to vector<12x32xf32>
    %191 = arith.addf %188, %190 : vector<12x32xf32>
    %192 = arith.addf %161, %191 : vector<12x32xf32>
    %cst_89 = arith.constant dense<0.000000e+00> : vector<12xf32>
    %193 = vector.multi_reduction <add>, %192, %cst_89 [1] : vector<12x32xf32> to vector<12xf32>
    %194 = vector.shape_cast %193 : vector<12xf32> to vector<12x1xf32>
    %cst_90 = arith.constant 3.200000e+01 : f32
    %195 = vector.broadcast %cst_90 : f32 to vector<12x1xf32>
    %196 = arith.divf %194, %195 : vector<12x1xf32>
    %197 = vector.broadcast %196 : vector<12x1xf32> to vector<12x32xf32>
    %198 = arith.subf %192, %197 : vector<12x32xf32>
    %199 = arith.mulf %198, %198 : vector<12x32xf32>
    %cst_91 = arith.constant dense<0.000000e+00> : vector<12xf32>
    %200 = vector.multi_reduction <add>, %199, %cst_91 [1] : vector<12x32xf32> to vector<12xf32>
    %201 = vector.shape_cast %200 : vector<12xf32> to vector<12x1xf32>
    %cst_92 = arith.constant 3.200000e+01 : f32
    %202 = vector.broadcast %cst_92 : f32 to vector<12x1xf32>
    %203 = arith.divf %201, %202 : vector<12x1xf32>
    %204 = vector.broadcast %196 : vector<12x1xf32> to vector<12x32xf32>
    %205 = arith.subf %192, %204 : vector<12x32xf32>
    %cst_93 = arith.constant 9.99999974E-6 : f32
    %206 = vector.broadcast %cst_93 : f32 to vector<12x1xf32>
    %207 = arith.addf %203, %206 : vector<12x1xf32>
    %208 = math.rsqrt %207 : vector<12x1xf32>
    %209 = vector.broadcast %208 : vector<12x1xf32> to vector<12x32xf32>
    %210 = arith.mulf %205, %209 : vector<12x32xf32>
    %c713 = arith.constant 713 : index
    %c0_94 = arith.constant 0 : index
    %211 = vector.load %arg5[%c713, %c0_94] : memref<744x256xf32, #tpu.memory_space<vmem>>, vector<1x32xf32>
    %212 = vector.broadcast %211 : vector<1x32xf32> to vector<12x32xf32>
    %213 = arith.mulf %210, %212 : vector<12x32xf32>
    %c714 = arith.constant 714 : index
    %c0_95 = arith.constant 0 : index
    %214 = vector.load %arg5[%c714, %c0_95] : memref<744x256xf32, #tpu.memory_space<vmem>>, vector<1x32xf32>
    %215 = vector.broadcast %214 : vector<1x32xf32> to vector<12x32xf32>
    %216 = arith.addf %213, %215 : vector<12x32xf32>
    %c248 = arith.constant 248 : index
    %c0_96 = arith.constant 0 : index
    %217 = vector.load %arg5[%c248, %c0_96] : memref<744x256xf32, #tpu.memory_space<vmem>>, vector<32x256xf32>
    %cst_97 = arith.constant dense<0.000000e+00> : vector<12x256xf32>
    %218 = tpu.matmul %216, %217, %cst_97 {dimension_numbers = #tpu.dot_dimension_numbers<[1], [0], [0], [1], [0, 0, 1, 1], [], []>} : vector<12x32xf32>, vector<32x256xf32>, vector<12x256xf32> -> vector<12x256xf32>
    %c717 = arith.constant 717 : index
    %c0_98 = arith.constant 0 : index
    %219 = vector.load %arg5[%c717, %c0_98] : memref<744x256xf32, #tpu.memory_space<vmem>>, vector<1x256xf32>
    %220 = vector.broadcast %219 : vector<1x256xf32> to vector<12x256xf32>
    %221 = arith.addf %218, %220 : vector<12x256xf32>
    %cst_99 = arith.constant 0.000000e+00 : f32
    %222 = vector.broadcast %cst_99 : f32 to vector<12x256xf32>
    %223 = arith.maximumf %221, %222 : vector<12x256xf32>
    %c280 = arith.constant 280 : index
    %c0_100 = arith.constant 0 : index
    %224 = vector.load %arg5[%c280, %c0_100] : memref<744x256xf32, #tpu.memory_space<vmem>>, vector<32x256xf32>
    %cst_101 = arith.constant dense<0.000000e+00> : vector<12x32xf32>
    %225 = tpu.matmul %223, %224, %cst_101 {dimension_numbers = #tpu.dot_dimension_numbers<[1], [1], [0], [0], [0, 0, 1, 0], [], []>} : vector<12x256xf32>, vector<32x256xf32>, vector<12x32xf32> -> vector<12x32xf32>
    %c718 = arith.constant 718 : index
    %c0_102 = arith.constant 0 : index
    %226 = vector.load %arg5[%c718, %c0_102] : memref<744x256xf32, #tpu.memory_space<vmem>>, vector<1x32xf32>
    %227 = vector.broadcast %226 : vector<1x32xf32> to vector<12x32xf32>
    %228 = arith.addf %225, %227 : vector<12x32xf32>
    %229 = arith.addf %216, %228 : vector<12x32xf32>
    %cst_103 = arith.constant dense<0.000000e+00> : vector<12xf32>
    %230 = vector.multi_reduction <add>, %229, %cst_103 [1] : vector<12x32xf32> to vector<12xf32>
    %231 = vector.shape_cast %230 : vector<12xf32> to vector<12x1xf32>
    %cst_104 = arith.constant 3.200000e+01 : f32
    %232 = vector.broadcast %cst_104 : f32 to vector<12x1xf32>
    %233 = arith.divf %231, %232 : vector<12x1xf32>
    %234 = vector.broadcast %233 : vector<12x1xf32> to vector<12x32xf32>
    %235 = arith.subf %229, %234 : vector<12x32xf32>
    %236 = arith.mulf %235, %235 : vector<12x32xf32>
    %cst_105 = arith.constant dense<0.000000e+00> : vector<12xf32>
    %237 = vector.multi_reduction <add>, %236, %cst_105 [1] : vector<12x32xf32> to vector<12xf32>
    %238 = vector.shape_cast %237 : vector<12xf32> to vector<12x1xf32>
    %cst_106 = arith.constant 3.200000e+01 : f32
    %239 = vector.broadcast %cst_106 : f32 to vector<12x1xf32>
    %240 = arith.divf %238, %239 : vector<12x1xf32>
    %241 = vector.broadcast %233 : vector<12x1xf32> to vector<12x32xf32>
    %242 = arith.subf %229, %241 : vector<12x32xf32>
    %cst_107 = arith.constant 9.99999974E-6 : f32
    %243 = vector.broadcast %cst_107 : f32 to vector<12x1xf32>
    %244 = arith.addf %240, %243 : vector<12x1xf32>
    %245 = math.rsqrt %244 : vector<12x1xf32>
    %246 = vector.broadcast %245 : vector<12x1xf32> to vector<12x32xf32>
    %247 = arith.mulf %242, %246 : vector<12x32xf32>
    %c715 = arith.constant 715 : index
    %c0_108 = arith.constant 0 : index
    %248 = vector.load %arg5[%c715, %c0_108] : memref<744x256xf32, #tpu.memory_space<vmem>>, vector<1x32xf32>
    %249 = vector.broadcast %248 : vector<1x32xf32> to vector<12x32xf32>
    %250 = arith.mulf %247, %249 : vector<12x32xf32>
    %c716 = arith.constant 716 : index
    %c0_109 = arith.constant 0 : index
    %251 = vector.load %arg5[%c716, %c0_109] : memref<744x256xf32, #tpu.memory_space<vmem>>, vector<1x32xf32>
    %252 = vector.broadcast %251 : vector<1x32xf32> to vector<12x32xf32>
    %253 = arith.addf %250, %252 : vector<12x32xf32>
    %cst_110 = arith.constant dense<0.000000e+00> : vector<12xf32>
    %254 = vector.multi_reduction <add>, %253, %cst_110 [1] : vector<12x32xf32> to vector<12xf32>
    %255 = vector.shape_cast %254 : vector<12xf32> to vector<12x1xf32>
    %cst_111 = arith.constant 3.200000e+01 : f32
    %256 = vector.broadcast %cst_111 : f32 to vector<12x1xf32>
    %257 = arith.divf %255, %256 : vector<12x1xf32>
    %258 = vector.broadcast %257 : vector<12x1xf32> to vector<12x32xf32>
    %259 = arith.subf %253, %258 : vector<12x32xf32>
    %260 = arith.mulf %259, %259 : vector<12x32xf32>
    %cst_112 = arith.constant dense<0.000000e+00> : vector<12xf32>
    %261 = vector.multi_reduction <add>, %260, %cst_112 [1] : vector<12x32xf32> to vector<12xf32>
    %262 = vector.shape_cast %261 : vector<12xf32> to vector<12x1xf32>
    %cst_113 = arith.constant 3.200000e+01 : f32
    %263 = vector.broadcast %cst_113 : f32 to vector<12x1xf32>
    %264 = arith.divf %262, %263 : vector<12x1xf32>
    %265 = vector.broadcast %257 : vector<12x1xf32> to vector<12x32xf32>
    %266 = arith.subf %253, %265 : vector<12x32xf32>
    %cst_114 = arith.constant 9.99999974E-6 : f32
    %267 = vector.broadcast %cst_114 : f32 to vector<12x1xf32>
    %268 = arith.addf %264, %267 : vector<12x1xf32>
    %269 = math.rsqrt %268 : vector<12x1xf32>
    %270 = vector.broadcast %269 : vector<12x1xf32> to vector<12x32xf32>
    %271 = arith.mulf %266, %270 : vector<12x32xf32>
    %c698 = arith.constant 698 : index
    %c0_115 = arith.constant 0 : index
    %272 = vector.load %arg5[%c698, %c0_115] : memref<744x256xf32, #tpu.memory_space<vmem>>, vector<1x32xf32>
    %273 = vector.broadcast %272 : vector<1x32xf32> to vector<12x32xf32>
    %274 = arith.mulf %271, %273 : vector<12x32xf32>
    %c699 = arith.constant 699 : index
    %c0_116 = arith.constant 0 : index
    %275 = vector.load %arg5[%c699, %c0_116] : memref<744x256xf32, #tpu.memory_space<vmem>>, vector<1x32xf32>
    %276 = vector.broadcast %275 : vector<1x32xf32> to vector<12x32xf32>
    %277 = arith.addf %274, %276 : vector<12x32xf32>
    %cst_117 = arith.constant dense<0xFF800000> : vector<32xf32>
    %278 = vector.multi_reduction <maximumf>, %277, %cst_117 [0] : vector<12x32xf32> to vector<32xf32>
    %279 = vector.shape_cast %278 : vector<32xf32> to vector<1x32xf32>
    %c312 = arith.constant 312 : index
    %c0_118 = arith.constant 0 : index
    %280 = vector.load %arg5[%c312, %c0_118] : memref<744x256xf32, #tpu.memory_space<vmem>>, vector<32x96xf32>
    %cst_119 = arith.constant dense<0.000000e+00> : vector<8x96xf32>
    %281 = tpu.matmul %69, %280, %cst_119 {dimension_numbers = #tpu.dot_dimension_numbers<[1], [0], [0], [1], [0, 0, 1, 1], [], []>} : vector<8x32xf32>, vector<32x96xf32>, vector<8x96xf32> -> vector<8x96xf32>
    %c719 = arith.constant 719 : index
    %c0_120 = arith.constant 0 : index
    %282 = vector.load %arg5[%c719, %c0_120] : memref<744x256xf32, #tpu.memory_space<vmem>>, vector<1x96xf32>
    %283 = vector.broadcast %282 : vector<1x96xf32> to vector<8x96xf32>
    %284 = arith.addf %281, %283 : vector<8x96xf32>
    %285 = vector.extract_strided_slice %284 {offsets = [0, 0], sizes = [8, 32], strides = [1, 1]} : vector<8x96xf32> to vector<8x32xf32>
    %286 = vector.extract_strided_slice %284 {offsets = [0, 32], sizes = [8, 32], strides = [1, 1]} : vector<8x96xf32> to vector<8x32xf32>
    %287 = vector.extract_strided_slice %284 {offsets = [0, 64], sizes = [8, 32], strides = [1, 1]} : vector<8x96xf32> to vector<8x32xf32>
    %288 = tpu.concatenate %286, %286, %286, %286, %286, %286, %286, %286 in 0 : vector<8x32xf32>, vector<8x32xf32>, vector<8x32xf32>, vector<8x32xf32>, vector<8x32xf32>, vector<8x32xf32>, vector<8x32xf32>, vector<8x32xf32> -> vector<64x32xf32>
    %289 = arith.mulf %288, %8 : vector<64x32xf32>
    %290 = tpu.concatenate %287, %287, %287, %287, %287, %287, %287, %287 in 0 : vector<8x32xf32>, vector<8x32xf32>, vector<8x32xf32>, vector<8x32xf32>, vector<8x32xf32>, vector<8x32xf32>, vector<8x32xf32>, vector<8x32xf32> -> vector<64x32xf32>
    %291 = arith.mulf %290, %8 : vector<64x32xf32>
    %cst_121 = arith.constant dense<0.000000e+00> : vector<8x64xf32>
    %292 = tpu.matmul %285, %289, %cst_121 {dimension_numbers = #tpu.dot_dimension_numbers<[1], [1], [0], [0], [0, 0, 1, 0], [], []>} : vector<8x32xf32>, vector<64x32xf32>, vector<8x64xf32> -> vector<8x64xf32>
    %293 = vector.broadcast %56 : vector<1x64xf32> to vector<8x64xf32>
    %294 = arith.addf %292, %293 : vector<8x64xf32>
    %cst_122 = arith.constant dense<0xFF800000> : vector<8xf32>
    %295 = vector.multi_reduction <maximumf>, %294, %cst_122 [1] : vector<8x64xf32> to vector<8xf32>
    %296 = vector.shape_cast %295 : vector<8xf32> to vector<8x1xf32>
    %297 = vector.broadcast %296 : vector<8x1xf32> to vector<8x64xf32>
    %298 = arith.subf %294, %297 : vector<8x64xf32>
    %299 = math.exp %298 : vector<8x64xf32>
    %cst_123 = arith.constant dense<0.000000e+00> : vector<8x8xf32>
    %300 = tpu.matmul %299, %9, %cst_123 {dimension_numbers = #tpu.dot_dimension_numbers<[1], [0], [0], [1], [0, 0, 1, 1], [], []>} : vector<8x64xf32>, vector<64x8xf32>, vector<8x8xf32> -> vector<8x8xf32>
    %cst_124 = arith.constant dense<0.000000e+00> : vector<8x32xf32>
    %301 = tpu.matmul %299, %291, %cst_124 {dimension_numbers = #tpu.dot_dimension_numbers<[1], [0], [0], [1], [0, 0, 1, 1], [], []>} : vector<8x64xf32>, vector<64x32xf32>, vector<8x32xf32> -> vector<8x32xf32>
    %302 = tpu.reciprocal %300 {approx = true} : vector<8x8xf32> -> vector<8x8xf32>
    %cst_125 = arith.constant dense<0.000000e+00> : vector<8x32xf32>
    %303 = tpu.matmul %302, %10, %cst_125 {dimension_numbers = #tpu.dot_dimension_numbers<[1], [0], [0], [1], [0, 0, 1, 1], [], []>} : vector<8x8xf32>, vector<8x32xf32>, vector<8x32xf32> -> vector<8x32xf32>
    %304 = arith.mulf %301, %303 : vector<8x32xf32>
    %c344 = arith.constant 344 : index
    %c0_126 = arith.constant 0 : index
    %305 = vector.load %arg5[%c344, %c0_126] : memref<744x256xf32, #tpu.memory_space<vmem>>, vector<32x32xf32>
    %cst_127 = arith.constant dense<0.000000e+00> : vector<8x32xf32>
    %306 = tpu.matmul %304, %305, %cst_127 {dimension_numbers = #tpu.dot_dimension_numbers<[1], [0], [0], [1], [0, 0, 1, 1], [], []>} : vector<8x32xf32>, vector<32x32xf32>, vector<8x32xf32> -> vector<8x32xf32>
    %c720 = arith.constant 720 : index
    %c0_128 = arith.constant 0 : index
    %307 = vector.load %arg5[%c720, %c0_128] : memref<744x256xf32, #tpu.memory_space<vmem>>, vector<1x32xf32>
    %308 = vector.broadcast %307 : vector<1x32xf32> to vector<8x32xf32>
    %309 = arith.addf %306, %308 : vector<8x32xf32>
    %310 = arith.addf %69, %309 : vector<8x32xf32>
    %cst_129 = arith.constant dense<0.000000e+00> : vector<8xf32>
    %311 = vector.multi_reduction <add>, %310, %cst_129 [1] : vector<8x32xf32> to vector<8xf32>
    %312 = vector.shape_cast %311 : vector<8xf32> to vector<8x1xf32>
    %cst_130 = arith.constant 3.200000e+01 : f32
    %313 = vector.broadcast %cst_130 : f32 to vector<8x1xf32>
    %314 = arith.divf %312, %313 : vector<8x1xf32>
    %315 = vector.broadcast %314 : vector<8x1xf32> to vector<8x32xf32>
    %316 = arith.subf %310, %315 : vector<8x32xf32>
    %317 = arith.mulf %316, %316 : vector<8x32xf32>
    %cst_131 = arith.constant dense<0.000000e+00> : vector<8xf32>
    %318 = vector.multi_reduction <add>, %317, %cst_131 [1] : vector<8x32xf32> to vector<8xf32>
    %319 = vector.shape_cast %318 : vector<8xf32> to vector<8x1xf32>
    %cst_132 = arith.constant 3.200000e+01 : f32
    %320 = vector.broadcast %cst_132 : f32 to vector<8x1xf32>
    %321 = arith.divf %319, %320 : vector<8x1xf32>
    %322 = vector.broadcast %314 : vector<8x1xf32> to vector<8x32xf32>
    %323 = arith.subf %310, %322 : vector<8x32xf32>
    %cst_133 = arith.constant 9.99999974E-6 : f32
    %324 = vector.broadcast %cst_133 : f32 to vector<8x1xf32>
    %325 = arith.addf %321, %324 : vector<8x1xf32>
    %326 = math.rsqrt %325 : vector<8x1xf32>
    %327 = vector.broadcast %326 : vector<8x1xf32> to vector<8x32xf32>
    %328 = arith.mulf %323, %327 : vector<8x32xf32>
    %c723 = arith.constant 723 : index
    %c0_134 = arith.constant 0 : index
    %329 = vector.load %arg5[%c723, %c0_134] : memref<744x256xf32, #tpu.memory_space<vmem>>, vector<1x32xf32>
    %330 = vector.broadcast %329 : vector<1x32xf32> to vector<8x32xf32>
    %331 = arith.mulf %328, %330 : vector<8x32xf32>
    %c724 = arith.constant 724 : index
    %c0_135 = arith.constant 0 : index
    %332 = vector.load %arg5[%c724, %c0_135] : memref<744x256xf32, #tpu.memory_space<vmem>>, vector<1x32xf32>
    %333 = vector.broadcast %332 : vector<1x32xf32> to vector<8x32xf32>
    %334 = arith.addf %331, %333 : vector<8x32xf32>
    %c376 = arith.constant 376 : index
    %c0_136 = arith.constant 0 : index
    %335 = vector.load %arg5[%c376, %c0_136] : memref<744x256xf32, #tpu.memory_space<vmem>>, vector<32x32xf32>
    %cst_137 = arith.constant dense<0.000000e+00> : vector<1x32xf32>
    %336 = tpu.matmul %279, %335, %cst_137 {dimension_numbers = #tpu.dot_dimension_numbers<[1], [0], [0], [1], [0, 0, 1, 1], [], []>} : vector<1x32xf32>, vector<32x32xf32>, vector<1x32xf32> -> vector<1x32xf32>
    %c721 = arith.constant 721 : index
    %c0_138 = arith.constant 0 : index
    %337 = vector.load %arg5[%c721, %c0_138] : memref<744x256xf32, #tpu.memory_space<vmem>>, vector<1x32xf32>
    %338 = arith.addf %336, %337 : vector<1x32xf32>
    %c408 = arith.constant 408 : index
    %c0_139 = arith.constant 0 : index
    %339 = vector.load %arg5[%c408, %c0_139] : memref<744x256xf32, #tpu.memory_space<vmem>>, vector<32x32xf32>
    %cst_140 = arith.constant dense<0.000000e+00> : vector<1x32xf32>
    %340 = tpu.matmul %338, %339, %cst_140 {dimension_numbers = #tpu.dot_dimension_numbers<[1], [0], [0], [1], [0, 0, 1, 1], [], []>} : vector<1x32xf32>, vector<32x32xf32>, vector<1x32xf32> -> vector<1x32xf32>
    %c722 = arith.constant 722 : index
    %c0_141 = arith.constant 0 : index
    %341 = vector.load %arg5[%c722, %c0_141] : memref<744x256xf32, #tpu.memory_space<vmem>>, vector<1x32xf32>
    %342 = arith.addf %340, %341 : vector<1x32xf32>
    %343 = vector.broadcast %342 : vector<1x32xf32> to vector<8x32xf32>
    %344 = arith.addf %334, %343 : vector<8x32xf32>
    %cst_142 = arith.constant dense<0.000000e+00> : vector<8xf32>
    %345 = vector.multi_reduction <add>, %344, %cst_142 [1] : vector<8x32xf32> to vector<8xf32>
    %346 = vector.shape_cast %345 : vector<8xf32> to vector<8x1xf32>
    %cst_143 = arith.constant 3.200000e+01 : f32
    %347 = vector.broadcast %cst_143 : f32 to vector<8x1xf32>
    %348 = arith.divf %346, %347 : vector<8x1xf32>
    %349 = vector.broadcast %348 : vector<8x1xf32> to vector<8x32xf32>
    %350 = arith.subf %344, %349 : vector<8x32xf32>
    %351 = arith.mulf %350, %350 : vector<8x32xf32>
    %cst_144 = arith.constant dense<0.000000e+00> : vector<8xf32>
    %352 = vector.multi_reduction <add>, %351, %cst_144 [1] : vector<8x32xf32> to vector<8xf32>
    %353 = vector.shape_cast %352 : vector<8xf32> to vector<8x1xf32>
    %cst_145 = arith.constant 3.200000e+01 : f32
    %354 = vector.broadcast %cst_145 : f32 to vector<8x1xf32>
    %355 = arith.divf %353, %354 : vector<8x1xf32>
    %356 = vector.broadcast %348 : vector<8x1xf32> to vector<8x32xf32>
    %357 = arith.subf %344, %356 : vector<8x32xf32>
    %cst_146 = arith.constant 9.99999974E-6 : f32
    %358 = vector.broadcast %cst_146 : f32 to vector<8x1xf32>
    %359 = arith.addf %355, %358 : vector<8x1xf32>
    %360 = math.rsqrt %359 : vector<8x1xf32>
    %361 = vector.broadcast %360 : vector<8x1xf32> to vector<8x32xf32>
    %362 = arith.mulf %357, %361 : vector<8x32xf32>
    %c725 = arith.constant 725 : index
    %c0_147 = arith.constant 0 : index
    %363 = vector.load %arg5[%c725, %c0_147] : memref<744x256xf32, #tpu.memory_space<vmem>>, vector<1x32xf32>
    %364 = vector.broadcast %363 : vector<1x32xf32> to vector<8x32xf32>
    %365 = arith.mulf %362, %364 : vector<8x32xf32>
    %c726 = arith.constant 726 : index
    %c0_148 = arith.constant 0 : index
    %366 = vector.load %arg5[%c726, %c0_148] : memref<744x256xf32, #tpu.memory_space<vmem>>, vector<1x32xf32>
    %367 = vector.broadcast %366 : vector<1x32xf32> to vector<8x32xf32>
    %368 = arith.addf %365, %367 : vector<8x32xf32>
    %c440 = arith.constant 440 : index
    %c0_149 = arith.constant 0 : index
    %369 = vector.load %arg5[%c440, %c0_149] : memref<744x256xf32, #tpu.memory_space<vmem>>, vector<32x256xf32>
    %cst_150 = arith.constant dense<0.000000e+00> : vector<8x256xf32>
    %370 = tpu.matmul %368, %369, %cst_150 {dimension_numbers = #tpu.dot_dimension_numbers<[1], [0], [0], [1], [0, 0, 1, 1], [], []>} : vector<8x32xf32>, vector<32x256xf32>, vector<8x256xf32> -> vector<8x256xf32>
    %c729 = arith.constant 729 : index
    %c0_151 = arith.constant 0 : index
    %371 = vector.load %arg5[%c729, %c0_151] : memref<744x256xf32, #tpu.memory_space<vmem>>, vector<1x256xf32>
    %372 = vector.broadcast %371 : vector<1x256xf32> to vector<8x256xf32>
    %373 = arith.addf %370, %372 : vector<8x256xf32>
    %cst_152 = arith.constant 0.000000e+00 : f32
    %374 = vector.broadcast %cst_152 : f32 to vector<8x256xf32>
    %375 = arith.maximumf %373, %374 : vector<8x256xf32>
    %c472 = arith.constant 472 : index
    %c0_153 = arith.constant 0 : index
    %376 = vector.load %arg5[%c472, %c0_153] : memref<744x256xf32, #tpu.memory_space<vmem>>, vector<32x256xf32>
    %cst_154 = arith.constant dense<0.000000e+00> : vector<8x32xf32>
    %377 = tpu.matmul %375, %376, %cst_154 {dimension_numbers = #tpu.dot_dimension_numbers<[1], [1], [0], [0], [0, 0, 1, 0], [], []>} : vector<8x256xf32>, vector<32x256xf32>, vector<8x32xf32> -> vector<8x32xf32>
    %c730 = arith.constant 730 : index
    %c0_155 = arith.constant 0 : index
    %378 = vector.load %arg5[%c730, %c0_155] : memref<744x256xf32, #tpu.memory_space<vmem>>, vector<1x32xf32>
    %379 = vector.broadcast %378 : vector<1x32xf32> to vector<8x32xf32>
    %380 = arith.addf %377, %379 : vector<8x32xf32>
    %381 = arith.addf %368, %380 : vector<8x32xf32>
    %cst_156 = arith.constant dense<0.000000e+00> : vector<8xf32>
    %382 = vector.multi_reduction <add>, %381, %cst_156 [1] : vector<8x32xf32> to vector<8xf32>
    %383 = vector.shape_cast %382 : vector<8xf32> to vector<8x1xf32>
    %cst_157 = arith.constant 3.200000e+01 : f32
    %384 = vector.broadcast %cst_157 : f32 to vector<8x1xf32>
    %385 = arith.divf %383, %384 : vector<8x1xf32>
    %386 = vector.broadcast %385 : vector<8x1xf32> to vector<8x32xf32>
    %387 = arith.subf %381, %386 : vector<8x32xf32>
    %388 = arith.mulf %387, %387 : vector<8x32xf32>
    %cst_158 = arith.constant dense<0.000000e+00> : vector<8xf32>
    %389 = vector.multi_reduction <add>, %388, %cst_158 [1] : vector<8x32xf32> to vector<8xf32>
    %390 = vector.shape_cast %389 : vector<8xf32> to vector<8x1xf32>
    %cst_159 = arith.constant 3.200000e+01 : f32
    %391 = vector.broadcast %cst_159 : f32 to vector<8x1xf32>
    %392 = arith.divf %390, %391 : vector<8x1xf32>
    %393 = vector.broadcast %385 : vector<8x1xf32> to vector<8x32xf32>
    %394 = arith.subf %381, %393 : vector<8x32xf32>
    %cst_160 = arith.constant 9.99999974E-6 : f32
    %395 = vector.broadcast %cst_160 : f32 to vector<8x1xf32>
    %396 = arith.addf %392, %395 : vector<8x1xf32>
    %397 = math.rsqrt %396 : vector<8x1xf32>
    %398 = vector.broadcast %397 : vector<8x1xf32> to vector<8x32xf32>
    %399 = arith.mulf %394, %398 : vector<8x32xf32>
    %c727 = arith.constant 727 : index
    %c0_161 = arith.constant 0 : index
    %400 = vector.load %arg5[%c727, %c0_161] : memref<744x256xf32, #tpu.memory_space<vmem>>, vector<1x32xf32>
    %401 = vector.broadcast %400 : vector<1x32xf32> to vector<8x32xf32>
    %402 = arith.mulf %399, %401 : vector<8x32xf32>
    %c728 = arith.constant 728 : index
    %c0_162 = arith.constant 0 : index
    %403 = vector.load %arg5[%c728, %c0_162] : memref<744x256xf32, #tpu.memory_space<vmem>>, vector<1x32xf32>
    %404 = vector.broadcast %403 : vector<1x32xf32> to vector<8x32xf32>
    %405 = arith.addf %402, %404 : vector<8x32xf32>
    %c504 = arith.constant 504 : index
    %c0_163 = arith.constant 0 : index
    %406 = vector.load %arg5[%c504, %c0_163] : memref<744x256xf32, #tpu.memory_space<vmem>>, vector<32x96xf32>
    %cst_164 = arith.constant dense<0.000000e+00> : vector<8x96xf32>
    %407 = tpu.matmul %405, %406, %cst_164 {dimension_numbers = #tpu.dot_dimension_numbers<[1], [0], [0], [1], [0, 0, 1, 1], [], []>} : vector<8x32xf32>, vector<32x96xf32>, vector<8x96xf32> -> vector<8x96xf32>
    %c731 = arith.constant 731 : index
    %c0_165 = arith.constant 0 : index
    %408 = vector.load %arg5[%c731, %c0_165] : memref<744x256xf32, #tpu.memory_space<vmem>>, vector<1x96xf32>
    %409 = vector.broadcast %408 : vector<1x96xf32> to vector<8x96xf32>
    %410 = arith.addf %407, %409 : vector<8x96xf32>
    %411 = vector.extract_strided_slice %410 {offsets = [0, 0], sizes = [8, 32], strides = [1, 1]} : vector<8x96xf32> to vector<8x32xf32>
    %412 = vector.extract_strided_slice %410 {offsets = [0, 32], sizes = [8, 32], strides = [1, 1]} : vector<8x96xf32> to vector<8x32xf32>
    %413 = vector.extract_strided_slice %410 {offsets = [0, 64], sizes = [8, 32], strides = [1, 1]} : vector<8x96xf32> to vector<8x32xf32>
    %414 = tpu.concatenate %412, %412, %412, %412, %412, %412, %412, %412 in 0 : vector<8x32xf32>, vector<8x32xf32>, vector<8x32xf32>, vector<8x32xf32>, vector<8x32xf32>, vector<8x32xf32>, vector<8x32xf32>, vector<8x32xf32> -> vector<64x32xf32>
    %415 = arith.mulf %414, %8 : vector<64x32xf32>
    %416 = tpu.concatenate %413, %413, %413, %413, %413, %413, %413, %413 in 0 : vector<8x32xf32>, vector<8x32xf32>, vector<8x32xf32>, vector<8x32xf32>, vector<8x32xf32>, vector<8x32xf32>, vector<8x32xf32>, vector<8x32xf32> -> vector<64x32xf32>
    %417 = arith.mulf %416, %8 : vector<64x32xf32>
    %cst_166 = arith.constant dense<0.000000e+00> : vector<8x64xf32>
    %418 = tpu.matmul %411, %415, %cst_166 {dimension_numbers = #tpu.dot_dimension_numbers<[1], [1], [0], [0], [0, 0, 1, 0], [], []>} : vector<8x32xf32>, vector<64x32xf32>, vector<8x64xf32> -> vector<8x64xf32>
    %419 = vector.broadcast %56 : vector<1x64xf32> to vector<8x64xf32>
    %420 = arith.addf %418, %419 : vector<8x64xf32>
    %cst_167 = arith.constant dense<0xFF800000> : vector<8xf32>
    %421 = vector.multi_reduction <maximumf>, %420, %cst_167 [1] : vector<8x64xf32> to vector<8xf32>
    %422 = vector.shape_cast %421 : vector<8xf32> to vector<8x1xf32>
    %423 = vector.broadcast %422 : vector<8x1xf32> to vector<8x64xf32>
    %424 = arith.subf %420, %423 : vector<8x64xf32>
    %425 = math.exp %424 : vector<8x64xf32>
    %cst_168 = arith.constant dense<0.000000e+00> : vector<8x8xf32>
    %426 = tpu.matmul %425, %9, %cst_168 {dimension_numbers = #tpu.dot_dimension_numbers<[1], [0], [0], [1], [0, 0, 1, 1], [], []>} : vector<8x64xf32>, vector<64x8xf32>, vector<8x8xf32> -> vector<8x8xf32>
    %cst_169 = arith.constant dense<0.000000e+00> : vector<8x32xf32>
    %427 = tpu.matmul %425, %417, %cst_169 {dimension_numbers = #tpu.dot_dimension_numbers<[1], [0], [0], [1], [0, 0, 1, 1], [], []>} : vector<8x64xf32>, vector<64x32xf32>, vector<8x32xf32> -> vector<8x32xf32>
    %428 = tpu.reciprocal %426 {approx = true} : vector<8x8xf32> -> vector<8x8xf32>
    %cst_170 = arith.constant dense<0.000000e+00> : vector<8x32xf32>
    %429 = tpu.matmul %428, %10, %cst_170 {dimension_numbers = #tpu.dot_dimension_numbers<[1], [0], [0], [1], [0, 0, 1, 1], [], []>} : vector<8x8xf32>, vector<8x32xf32>, vector<8x32xf32> -> vector<8x32xf32>
    %430 = arith.mulf %427, %429 : vector<8x32xf32>
    %c536 = arith.constant 536 : index
    %c0_171 = arith.constant 0 : index
    %431 = vector.load %arg5[%c536, %c0_171] : memref<744x256xf32, #tpu.memory_space<vmem>>, vector<32x32xf32>
    %cst_172 = arith.constant dense<0.000000e+00> : vector<8x32xf32>
    %432 = tpu.matmul %430, %431, %cst_172 {dimension_numbers = #tpu.dot_dimension_numbers<[1], [0], [0], [1], [0, 0, 1, 1], [], []>} : vector<8x32xf32>, vector<32x32xf32>, vector<8x32xf32> -> vector<8x32xf32>
    %c732 = arith.constant 732 : index
    %c0_173 = arith.constant 0 : index
    %433 = vector.load %arg5[%c732, %c0_173] : memref<744x256xf32, #tpu.memory_space<vmem>>, vector<1x32xf32>
    %434 = vector.broadcast %433 : vector<1x32xf32> to vector<8x32xf32>
    %435 = arith.addf %432, %434 : vector<8x32xf32>
    %436 = arith.addf %405, %435 : vector<8x32xf32>
    %cst_174 = arith.constant dense<0.000000e+00> : vector<8xf32>
    %437 = vector.multi_reduction <add>, %436, %cst_174 [1] : vector<8x32xf32> to vector<8xf32>
    %438 = vector.shape_cast %437 : vector<8xf32> to vector<8x1xf32>
    %cst_175 = arith.constant 3.200000e+01 : f32
    %439 = vector.broadcast %cst_175 : f32 to vector<8x1xf32>
    %440 = arith.divf %438, %439 : vector<8x1xf32>
    %441 = vector.broadcast %440 : vector<8x1xf32> to vector<8x32xf32>
    %442 = arith.subf %436, %441 : vector<8x32xf32>
    %443 = arith.mulf %442, %442 : vector<8x32xf32>
    %cst_176 = arith.constant dense<0.000000e+00> : vector<8xf32>
    %444 = vector.multi_reduction <add>, %443, %cst_176 [1] : vector<8x32xf32> to vector<8xf32>
    %445 = vector.shape_cast %444 : vector<8xf32> to vector<8x1xf32>
    %cst_177 = arith.constant 3.200000e+01 : f32
    %446 = vector.broadcast %cst_177 : f32 to vector<8x1xf32>
    %447 = arith.divf %445, %446 : vector<8x1xf32>
    %448 = vector.broadcast %440 : vector<8x1xf32> to vector<8x32xf32>
    %449 = arith.subf %436, %448 : vector<8x32xf32>
    %cst_178 = arith.constant 9.99999974E-6 : f32
    %450 = vector.broadcast %cst_178 : f32 to vector<8x1xf32>
    %451 = arith.addf %447, %450 : vector<8x1xf32>
    %452 = math.rsqrt %451 : vector<8x1xf32>
    %453 = vector.broadcast %452 : vector<8x1xf32> to vector<8x32xf32>
    %454 = arith.mulf %449, %453 : vector<8x32xf32>
    %c735 = arith.constant 735 : index
    %c0_179 = arith.constant 0 : index
    %455 = vector.load %arg5[%c735, %c0_179] : memref<744x256xf32, #tpu.memory_space<vmem>>, vector<1x32xf32>
    %456 = vector.broadcast %455 : vector<1x32xf32> to vector<8x32xf32>
    %457 = arith.mulf %454, %456 : vector<8x32xf32>
    %c736 = arith.constant 736 : index
    %c0_180 = arith.constant 0 : index
    %458 = vector.load %arg5[%c736, %c0_180] : memref<744x256xf32, #tpu.memory_space<vmem>>, vector<1x32xf32>
    %459 = vector.broadcast %458 : vector<1x32xf32> to vector<8x32xf32>
    %460 = arith.addf %457, %459 : vector<8x32xf32>
    %c568 = arith.constant 568 : index
    %c0_181 = arith.constant 0 : index
    %461 = vector.load %arg5[%c568, %c0_181] : memref<744x256xf32, #tpu.memory_space<vmem>>, vector<32x32xf32>
    %cst_182 = arith.constant dense<0.000000e+00> : vector<1x32xf32>
    %462 = tpu.matmul %279, %461, %cst_182 {dimension_numbers = #tpu.dot_dimension_numbers<[1], [0], [0], [1], [0, 0, 1, 1], [], []>} : vector<1x32xf32>, vector<32x32xf32>, vector<1x32xf32> -> vector<1x32xf32>
    %c733 = arith.constant 733 : index
    %c0_183 = arith.constant 0 : index
    %463 = vector.load %arg5[%c733, %c0_183] : memref<744x256xf32, #tpu.memory_space<vmem>>, vector<1x32xf32>
    %464 = arith.addf %462, %463 : vector<1x32xf32>
    %c600 = arith.constant 600 : index
    %c0_184 = arith.constant 0 : index
    %465 = vector.load %arg5[%c600, %c0_184] : memref<744x256xf32, #tpu.memory_space<vmem>>, vector<32x32xf32>
    %cst_185 = arith.constant dense<0.000000e+00> : vector<1x32xf32>
    %466 = tpu.matmul %464, %465, %cst_185 {dimension_numbers = #tpu.dot_dimension_numbers<[1], [0], [0], [1], [0, 0, 1, 1], [], []>} : vector<1x32xf32>, vector<32x32xf32>, vector<1x32xf32> -> vector<1x32xf32>
    %c734 = arith.constant 734 : index
    %c0_186 = arith.constant 0 : index
    %467 = vector.load %arg5[%c734, %c0_186] : memref<744x256xf32, #tpu.memory_space<vmem>>, vector<1x32xf32>
    %468 = arith.addf %466, %467 : vector<1x32xf32>
    %469 = vector.broadcast %468 : vector<1x32xf32> to vector<8x32xf32>
    %470 = arith.addf %460, %469 : vector<8x32xf32>
    %cst_187 = arith.constant dense<0.000000e+00> : vector<8xf32>
    %471 = vector.multi_reduction <add>, %470, %cst_187 [1] : vector<8x32xf32> to vector<8xf32>
    %472 = vector.shape_cast %471 : vector<8xf32> to vector<8x1xf32>
    %cst_188 = arith.constant 3.200000e+01 : f32
    %473 = vector.broadcast %cst_188 : f32 to vector<8x1xf32>
    %474 = arith.divf %472, %473 : vector<8x1xf32>
    %475 = vector.broadcast %474 : vector<8x1xf32> to vector<8x32xf32>
    %476 = arith.subf %470, %475 : vector<8x32xf32>
    %477 = arith.mulf %476, %476 : vector<8x32xf32>
    %cst_189 = arith.constant dense<0.000000e+00> : vector<8xf32>
    %478 = vector.multi_reduction <add>, %477, %cst_189 [1] : vector<8x32xf32> to vector<8xf32>
    %479 = vector.shape_cast %478 : vector<8xf32> to vector<8x1xf32>
    %cst_190 = arith.constant 3.200000e+01 : f32
    %480 = vector.broadcast %cst_190 : f32 to vector<8x1xf32>
    %481 = arith.divf %479, %480 : vector<8x1xf32>
    %482 = vector.broadcast %474 : vector<8x1xf32> to vector<8x32xf32>
    %483 = arith.subf %470, %482 : vector<8x32xf32>
    %cst_191 = arith.constant 9.99999974E-6 : f32
    %484 = vector.broadcast %cst_191 : f32 to vector<8x1xf32>
    %485 = arith.addf %481, %484 : vector<8x1xf32>
    %486 = math.rsqrt %485 : vector<8x1xf32>
    %487 = vector.broadcast %486 : vector<8x1xf32> to vector<8x32xf32>
    %488 = arith.mulf %483, %487 : vector<8x32xf32>
    %c737 = arith.constant 737 : index
    %c0_192 = arith.constant 0 : index
    %489 = vector.load %arg5[%c737, %c0_192] : memref<744x256xf32, #tpu.memory_space<vmem>>, vector<1x32xf32>
    %490 = vector.broadcast %489 : vector<1x32xf32> to vector<8x32xf32>
    %491 = arith.mulf %488, %490 : vector<8x32xf32>
    %c738 = arith.constant 738 : index
    %c0_193 = arith.constant 0 : index
    %492 = vector.load %arg5[%c738, %c0_193] : memref<744x256xf32, #tpu.memory_space<vmem>>, vector<1x32xf32>
    %493 = vector.broadcast %492 : vector<1x32xf32> to vector<8x32xf32>
    %494 = arith.addf %491, %493 : vector<8x32xf32>
    %c632 = arith.constant 632 : index
    %c0_194 = arith.constant 0 : index
    %495 = vector.load %arg5[%c632, %c0_194] : memref<744x256xf32, #tpu.memory_space<vmem>>, vector<32x256xf32>
    %cst_195 = arith.constant dense<0.000000e+00> : vector<8x256xf32>
    %496 = tpu.matmul %494, %495, %cst_195 {dimension_numbers = #tpu.dot_dimension_numbers<[1], [0], [0], [1], [0, 0, 1, 1], [], []>} : vector<8x32xf32>, vector<32x256xf32>, vector<8x256xf32> -> vector<8x256xf32>
    %c741 = arith.constant 741 : index
    %c0_196 = arith.constant 0 : index
    %497 = vector.load %arg5[%c741, %c0_196] : memref<744x256xf32, #tpu.memory_space<vmem>>, vector<1x256xf32>
    %498 = vector.broadcast %497 : vector<1x256xf32> to vector<8x256xf32>
    %499 = arith.addf %496, %498 : vector<8x256xf32>
    %cst_197 = arith.constant 0.000000e+00 : f32
    %500 = vector.broadcast %cst_197 : f32 to vector<8x256xf32>
    %501 = arith.maximumf %499, %500 : vector<8x256xf32>
    %c664 = arith.constant 664 : index
    %c0_198 = arith.constant 0 : index
    %502 = vector.load %arg5[%c664, %c0_198] : memref<744x256xf32, #tpu.memory_space<vmem>>, vector<32x256xf32>
    %cst_199 = arith.constant dense<0.000000e+00> : vector<8x32xf32>
    %503 = tpu.matmul %501, %502, %cst_199 {dimension_numbers = #tpu.dot_dimension_numbers<[1], [1], [0], [0], [0, 0, 1, 0], [], []>} : vector<8x256xf32>, vector<32x256xf32>, vector<8x32xf32> -> vector<8x32xf32>
    %c742 = arith.constant 742 : index
    %c0_200 = arith.constant 0 : index
    %504 = vector.load %arg5[%c742, %c0_200] : memref<744x256xf32, #tpu.memory_space<vmem>>, vector<1x32xf32>
    %505 = vector.broadcast %504 : vector<1x32xf32> to vector<8x32xf32>
    %506 = arith.addf %503, %505 : vector<8x32xf32>
    %507 = arith.addf %494, %506 : vector<8x32xf32>
    %cst_201 = arith.constant dense<0.000000e+00> : vector<8xf32>
    %508 = vector.multi_reduction <add>, %507, %cst_201 [1] : vector<8x32xf32> to vector<8xf32>
    %509 = vector.shape_cast %508 : vector<8xf32> to vector<8x1xf32>
    %cst_202 = arith.constant 3.200000e+01 : f32
    %510 = vector.broadcast %cst_202 : f32 to vector<8x1xf32>
    %511 = arith.divf %509, %510 : vector<8x1xf32>
    %512 = vector.broadcast %511 : vector<8x1xf32> to vector<8x32xf32>
    %513 = arith.subf %507, %512 : vector<8x32xf32>
    %514 = arith.mulf %513, %513 : vector<8x32xf32>
    %cst_203 = arith.constant dense<0.000000e+00> : vector<8xf32>
    %515 = vector.multi_reduction <add>, %514, %cst_203 [1] : vector<8x32xf32> to vector<8xf32>
    %516 = vector.shape_cast %515 : vector<8xf32> to vector<8x1xf32>
    %cst_204 = arith.constant 3.200000e+01 : f32
    %517 = vector.broadcast %cst_204 : f32 to vector<8x1xf32>
    %518 = arith.divf %516, %517 : vector<8x1xf32>
    %519 = vector.broadcast %511 : vector<8x1xf32> to vector<8x32xf32>
    %520 = arith.subf %507, %519 : vector<8x32xf32>
    %cst_205 = arith.constant 9.99999974E-6 : f32
    %521 = vector.broadcast %cst_205 : f32 to vector<8x1xf32>
    %522 = arith.addf %518, %521 : vector<8x1xf32>
    %523 = math.rsqrt %522 : vector<8x1xf32>
    %524 = vector.broadcast %523 : vector<8x1xf32> to vector<8x32xf32>
    %525 = arith.mulf %520, %524 : vector<8x32xf32>
    %c739 = arith.constant 739 : index
    %c0_206 = arith.constant 0 : index
    %526 = vector.load %arg5[%c739, %c0_206] : memref<744x256xf32, #tpu.memory_space<vmem>>, vector<1x32xf32>
    %527 = vector.broadcast %526 : vector<1x32xf32> to vector<8x32xf32>
    %528 = arith.mulf %525, %527 : vector<8x32xf32>
    %c740 = arith.constant 740 : index
    %c0_207 = arith.constant 0 : index
    %529 = vector.load %arg5[%c740, %c0_207] : memref<744x256xf32, #tpu.memory_space<vmem>>, vector<1x32xf32>
    %530 = vector.broadcast %529 : vector<1x32xf32> to vector<8x32xf32>
    %531 = arith.addf %528, %530 : vector<8x32xf32>
    %cst_208 = arith.constant dense<0.000000e+00> : vector<8xf32>
    %532 = vector.multi_reduction <add>, %531, %cst_208 [1] : vector<8x32xf32> to vector<8xf32>
    %533 = vector.shape_cast %532 : vector<8xf32> to vector<8x1xf32>
    %cst_209 = arith.constant 3.200000e+01 : f32
    %534 = vector.broadcast %cst_209 : f32 to vector<8x1xf32>
    %535 = arith.divf %533, %534 : vector<8x1xf32>
    %536 = vector.broadcast %535 : vector<8x1xf32> to vector<8x32xf32>
    %537 = arith.subf %531, %536 : vector<8x32xf32>
    %538 = arith.mulf %537, %537 : vector<8x32xf32>
    %cst_210 = arith.constant dense<0.000000e+00> : vector<8xf32>
    %539 = vector.multi_reduction <add>, %538, %cst_210 [1] : vector<8x32xf32> to vector<8xf32>
    %540 = vector.shape_cast %539 : vector<8xf32> to vector<8x1xf32>
    %cst_211 = arith.constant 3.200000e+01 : f32
    %541 = vector.broadcast %cst_211 : f32 to vector<8x1xf32>
    %542 = arith.divf %540, %541 : vector<8x1xf32>
    %543 = vector.broadcast %535 : vector<8x1xf32> to vector<8x32xf32>
    %544 = arith.subf %531, %543 : vector<8x32xf32>
    %cst_212 = arith.constant 9.99999974E-6 : f32
    %545 = vector.broadcast %cst_212 : f32 to vector<8x1xf32>
    %546 = arith.addf %542, %545 : vector<8x1xf32>
    %547 = math.rsqrt %546 : vector<8x1xf32>
    %548 = vector.broadcast %547 : vector<8x1xf32> to vector<8x32xf32>
    %549 = arith.mulf %544, %548 : vector<8x32xf32>
    %c700 = arith.constant 700 : index
    %c0_213 = arith.constant 0 : index
    %550 = vector.load %arg5[%c700, %c0_213] : memref<744x256xf32, #tpu.memory_space<vmem>>, vector<1x32xf32>
    %551 = vector.broadcast %550 : vector<1x32xf32> to vector<8x32xf32>
    %552 = arith.mulf %549, %551 : vector<8x32xf32>
    %c701 = arith.constant 701 : index
    %c0_214 = arith.constant 0 : index
    %553 = vector.load %arg5[%c701, %c0_214] : memref<744x256xf32, #tpu.memory_space<vmem>>, vector<1x32xf32>
    %554 = vector.broadcast %553 : vector<1x32xf32> to vector<8x32xf32>
    %555 = arith.addf %552, %554 : vector<8x32xf32>
    %c24 = arith.constant 24 : index
    %c0_215 = arith.constant 0 : index
    %556 = vector.load %arg5[%c24, %c0_215] : memref<744x256xf32, #tpu.memory_space<vmem>>, vector<32x4xf32>
    %cst_216 = arith.constant dense<0.000000e+00> : vector<8x4xf32>
    %557 = tpu.matmul %555, %556, %cst_216 {dimension_numbers = #tpu.dot_dimension_numbers<[1], [0], [0], [1], [0, 0, 1, 1], [], []>} : vector<8x32xf32>, vector<32x4xf32>, vector<8x4xf32> -> vector<8x4xf32>
    %c702 = arith.constant 702 : index
    %c0_217 = arith.constant 0 : index
    %558 = vector.load %arg5[%c702, %c0_217] : memref<744x256xf32, #tpu.memory_space<vmem>>, vector<1x4xf32>
    %559 = vector.broadcast %558 : vector<1x4xf32> to vector<8x4xf32>
    %560 = arith.addf %557, %559 : vector<8x4xf32>
    %561 = vector.extract_strided_slice %560 {offsets = [0, 0], sizes = [8, 2], strides = [1, 1]} : vector<8x4xf32> to vector<8x2xf32>
    %562 = vector.extract_strided_slice %560 {offsets = [0, 2], sizes = [8, 2], strides = [1, 1]} : vector<8x4xf32> to vector<8x2xf32>
    %cst_218 = arith.constant 2.000000e+01 : f32
    %563 = vector.broadcast %cst_218 : f32 to vector<8x2xf32>
    %564 = arith.cmpf ogt, %562, %563 : vector<8x2xf32>
    %cst_219 = arith.constant 2.000000e+01 : f32
    %565 = vector.broadcast %cst_219 : f32 to vector<8x2xf32>
    %566 = arith.minimumf %562, %565 : vector<8x2xf32>
    %567 = math.exp %566 : vector<8x2xf32>
    %cst_220 = arith.constant 1.000000e+00 : f32
    %568 = vector.broadcast %cst_220 : f32 to vector<8x2xf32>
    %569 = arith.addf %568, %567 : vector<8x2xf32>
    %570 = math.log %569 : vector<8x2xf32>
    %571 = arith.select %564, %562, %570 : vector<8x2xi1>, vector<8x2xf32>
    %cst_221 = arith.constant 9.900000e-01 : f32
    %572 = vector.broadcast %cst_221 : f32 to vector<8x2xf32>
    %573 = arith.mulf %572, %571 : vector<8x2xf32>
    %cst_222 = arith.constant 0.00999999977 : f32
    %574 = vector.broadcast %cst_222 : f32 to vector<8x2xf32>
    %575 = arith.addf %574, %573 : vector<8x2xf32>
    %576 = tpu.concatenate %561, %575 in 1 : vector<8x2xf32>, vector<8x2xf32> -> vector<8x4xf32>
    %c0_223 = arith.constant 0 : index
    %c0_224 = arith.constant 0 : index
    %c0_225 = arith.constant 0 : index
    %577 = vector.load %arg6[%c0_223, %c0_224, %c0_225] : memref<1x8x4xf32, #tpu.memory_space<vmem>>, vector<1x8x4xf32>
    %578 = vector.shape_cast %577 : vector<1x8x4xf32> to vector<8x4xf32>
    %579 = vector.shape_cast %576 : vector<8x4xf32> to vector<1x8x4xf32>
    tpu.vector_store %arg6[%c0_223, %c0_224, %c0_225], %579 {strides = array<i32>} : memref<1x8x4xf32, #tpu.memory_space<vmem>>, vector<1x8x4xf32>,
    return
  }
  func.func @transform_0(%arg0: i32) -> (i32, i32, i32) {
    %c0_i32 = arith.constant 0 : i32
    %c0_i32_0 = arith.constant 0 : i32
    %c0_i32_1 = arith.constant 0 : i32
    return %arg0, %c0_i32, %c0_i32_0 : i32, i32, i32
  }
  func.func @transform_1(%arg0: i32) -> (i32, i32, i32) {
    %c0_i32 = arith.constant 0 : i32
    %c0_i32_0 = arith.constant 0 : i32
    %c0_i32_1 = arith.constant 0 : i32
    return %arg0, %c0_i32, %c0_i32_0 : i32, i32, i32
  }
  func.func @transform_2(%arg0: i32) -> (i32, i32, i32) {
    %c0_i32 = arith.constant 0 : i32
    %c0_i32_0 = arith.constant 0 : i32
    %c0_i32_1 = arith.constant 0 : i32
    return %arg0, %c0_i32, %c0_i32_0 : i32, i32, i32
  }
  func.func @transform_3(%arg0: i32) -> (i32, i32) {
    %c0_i32 = arith.constant 0 : i32
    %c0_i32_0 = arith.constant 0 : i32
    %c0_i32_1 = arith.constant 0 : i32
    return %c0_i32, %c0_i32_0 : i32, i32
  }
  func.func @transform_4(%arg0: i32) -> (i32, i32) {
    %c0_i32 = arith.constant 0 : i32
    %c0_i32_0 = arith.constant 0 : i32
    %c0_i32_1 = arith.constant 0 : i32
    return %c0_i32, %c0_i32_0 : i32, i32
  }
  func.func @transform_5(%arg0: i32) -> (i32, i32, i32) {
    %c0_i32 = arith.constant 0 : i32
    %c0_i32_0 = arith.constant 0 : i32
    %c0_i32_1 = arith.constant 0 : i32
    return %arg0, %c0_i32, %c0_i32_0 : i32, i32, i32
  }
}

</mosaic_0001>

<bundles_post_ra>
// kernel: forward.1
= control target key start
LH: loop header
LB: loop body
LE: loop exit
PB: predicated region body
PF: predicated region fallthrough
CT: control target
= control target key end

     0   :  { %10 = vsyncpa [#allocation3], 0  ;;  %s7672_s0 = inlined_call_operand.vmem [shape: f32[2,12,6], index: 0, kind: input, shape index: {}]   ;;  %s7673_s1 = inlined_call_operand.vmem [shape: f32[2,12,2], index: 1, kind: input, shape index: {}]   ;;  %s7674_s2 = inlined_call_operand.vmem [shape: f32[2,8,6], index: 2, kind: input, shape index: {}]   ;;  %s7675_s3 = inlined_call_operand.hbm [shape: f32[328,32], index: 3, kind: input, shape index: {}]   ;;  %s7676_s4 = inlined_call_operand.hbm [shape: f32[744,256], index: 4, kind: input, shape index: {}]   ;;  %s7677_s5 = inlined_call_operand.vmem [shape: f32[2,8,4], index: 5, kind: output, shape index: {}]  }
   0x1   :  { %11 = vsyncpa [#allocation5], 0  ;;  %s6669_s18 = smov 0  }
   0x2 LB: > { %s6614_s19 = smov [#allocation2]   ;;  %s6675_s21 = sadd.s32 4294967295, %s6612_s18   ;;  %s6612_s18 = sphi %s6669_s18, %s17_s18  }
   0x3   : > { %s180_s20 = sshll.u32 %s6614_s19, 4  ;;  %p4991_p0 = scmp.ge.s32.totalorder %s6612_s18, 1  ;;  %s181_s20 = int_to_ptr.vmem [resolvable:$true] %s180_s20 }
   0x4   : > { %p168_p1 = scmp.lt.s32.totalorder %s6612_s18, 3  ;;  %p7678_p3 = scmp.eq.s32.totalorder %s6675_s21, 0 }
   0x5   : > { %s6615_s23 = smov [#allocation4]   ;;  %s6542_s28 = scalar_lea.hbm %s7675_s3, 5248 }
   0x6   : > { %p6679_p2 = pnand %p4991_p0, %p168_p1  ;;  %s193_s24 = sshll.u32 %s6615_s23, 4  ;;  %s6692_s24 = int_to_ptr.vmem [resolvable:$true] %s193_s24 }
   0x7   : > { %p6543_p6 = scmp.ne.s32.totalorder %s7675_s3, %s6542_s28  ;;  %p6549_p10 = scmp.lt.u32.totalorder %s6542_s28, %s7675_s3 }
   0x8   : > { %s7680_s22 = scalar_select %p6679_p2, 1, 0 }
   0x9   : > { %p6235_p4 = pneg %p6679_p2 }
   0xb   : > { %p6688_p5 = pnand %p7678_p3, %p6235_p4 }
   0xd   : > { %p6544_p7 = pneg %p6688_p5 }
   0xf   : > { %p6545_p8 = pnand %p6544_p7, %p6543_p6 }
  0x11   : > { %p6546_p9 = pneg %p6545_p8 }
  0x13   : > { %p6551_p11 = pnand %p6549_p10, %p6546_p9 }
  0x15   : > { %6554 = shalt.err (!%p6551_p11)
}
  0x16   : > { %s6555_s8 = scalar_lea.vmem %s181_s20, 5248  ;;  %p6563_p1 = scmp.lt.s32.totalorder %s181_s20, %s181_s20 }
  0x17   : > { %p6556_p12 = scmp.ne.s32.totalorder %s181_s20, %s6555_s8  ;;  %p6564_p4 = scmp.lt.s32.totalorder %s6555_s8, %s6555_s8 }
  0x19   : > { %p6558_p13 = pnand %p6556_p12, %p6544_p7  ;;  %p6565_p3 = por %p6564_p4, %p6563_p1 }
  0x1b   : > { %p6559_p0 = pneg %p6558_p13 }
  0x1d   : > { %p6566_p2 = pnand %p6565_p3, %p6559_p0 }
  0x1f   : > { %6569 = shalt.err (!%p6566_p2)
}
  0x20   : > { %s6616_s9 = smov 128   ;;  %s6617_s10 = smov 8  }
  0x21   : > { %6238 = dma.hbm_to_vmem [thread:$0]  (!%p6688_p5), %s7675_s3, 5248, %s181_s20, [#allocation3], %s6616_s9, %s6616_s9, %s6617_s10  }
  0x22   : > { %s6570_s15 = scalar_lea.hbm %s7676_s4, 23808 }
  0x23   : > { %p6571_p6 = scmp.ne.s32.totalorder %s7676_s4, %s6570_s15  ;;  %p6577_p8 = scmp.lt.u32.totalorder %s6570_s15, %s7676_s4 }
  0x25   : > { %p6573_p2 = pnand %p6571_p6, %p6544_p7 }
  0x27   : > { %p6574_p3 = pneg %p6573_p2 }
  0x29   : > { %p6579_p9 = pnand %p6577_p8, %p6574_p3 }
  0x2b   : > { %6582 = shalt.err (!%p6579_p9)
}
  0x2c   : > { %s6583_s20 = scalar_lea.vmem %s6692_s24, 23808  ;;  %p6591_p13 = scmp.lt.s32.totalorder %s6692_s24, %s6692_s24 }
  0x2d   : > { %p6584_p10 = scmp.ne.s32.totalorder %s6692_s24, %s6583_s20  ;;  %p6592_p0 = scmp.lt.s32.totalorder %s6583_s20, %s6583_s20 }
  0x2f   : > { %p6586_p11 = pnand %p6584_p10, %p6544_p7  ;;  %p6593_p1 = por %p6592_p0, %p6591_p13 }
  0x31   : > { %p6587_p12 = pneg %p6586_p11 }
  0x33   : > { %p6594_p4 = pnand %p6593_p1, %p6587_p12 }
  0x35   : > { %6597 = shalt.err (!%p6594_p4)
}
  0x36   : > { %s6618_s26 = smov 256   ;;  %s6619_s27 = smov 16  }
  0x37   : > { %6241 = dma.hbm_to_vmem [thread:$0]  (!%p6688_p5), %s7676_s4, 23808, %s6692_s24, [#allocation5], %s6618_s26, %s6618_s26, %s6619_s27  }
  0x38   : > { %p7682_p6 = scmp.ne.s32.totalorder %s7680_s22, 0 }
  0x39   : > { %p7683_p7 = scmp.eq.s32.totalorder (!%p7682_p6), %s6675_s21, 0 }
  0x3a   : > { %232 = sbr.rel (%p7682_p6) target bundleno = 10639 (0x298f), region = 40 }
  0x41   : > { %6603 = dma.done.wait (%p7683_p7), [#allocation3], 5248   ;;  %p7684_p2 = pmov %p7683_p7 }
  0x43   : > { %6605 = vsyncadd (%p7684_p2), [#allocation3], 4294962048  ;;  %p7685_p3 = pmov %p7684_p2 }
  0x44   : > { %p7686_p8 = pmov %p7684_p2 }
  0x45   : > { %6607 = dma.done.wait (%p7685_p3), [#allocation5], 23808  }
  0x46   : > { %6609 = vsyncadd (%p7686_p8), [#allocation5], 4294943488  ;;  %p272_p9 = scmp.lt.s32.totalorder %s6675_s21, 1  ;;  %v6620_v0 = vmov 0.0   ;;  %vm6621_vm0 = vmmov 0   ;;  %v6622_v1 = vmov 0.0|0.0  }
  0x47   : > { %5358 = vmatprep.subr.mxu1 %v6620_v0  ;;  %5360 = vmatprep.mubr.msk.f32.mxu1 %vm6621_vm0, %v6620_v0  ;;  %vm436_vm1 = vcmask 48128   ;;  %vm675_vm3 = vcmask 1041408   ;;  %v668_v5 = vld [vmem:[#allocation4 + $0x10] sm:$0x3]  ;;  %vm356_vm10 = vcmask 15360   ;;  %v6623_v16 = vmov 1.0  }
  0x48   : > { %s7690_s21 = smov (!%p272_p9, %s6675_s21), 1  ;;  %5348 = vmatprep.mubr.msk.f32.mxu0 %vm6621_vm0, %v6620_v0  ;;  %5817 = vmatprep.subr.bf16.mxu0 %v6622_v1  ;;  %v667_v15 = vld [vmem:[#allocation4] sm:$0x3f]  ;;  %v920_v22 = vld [vmem:[#allocation4 + $0x70] sm:$0xff]  ;;  %v6805_v28 = vld [vmem:[#allocation2 + $0x10] sm:$0xff]  ;;  %s6624_s13 = smov 32  }
  0x49   : > { %s5002_s22 = sshll.u32 %s7690_s21, 3  ;;  %s5109_s24 = sshll.u32 %s7690_s21, 4  ;;  %v921_v23 = vld [vmem:[#allocation4 + $0x80] sm:$0xff]  ;;  %v922_v25 = vld [vmem:[#allocation4 + $0x90] sm:$0xff]  ;;  %v6807_v29 = vld [vmem:[#allocation2] sm:$0xff]  ;;  %1031 = vrot.lane.b32.xlu1 %v6805_v28, %s6624_s13 }
  0x4a   : > { %s285_s6 = scalar_lea.vmem %s7674_s2, %s5002_s22  ;;  %s281_s9 = scalar_lea.vmem %s7673_s1, %s5109_s24  ;;  %v5825_v24 = vpack.c.bf16 %v921_v23, %v920_v22  ;;  %v923_v26 = vld [vmem:[#allocation4 + $0xa0] sm:$0xff]  ;;  %1027 = vrot.lane.b32.xlu0 %v6807_v29, %s6624_s13  ;;  %v6813_v30 = vld [vmem:[#allocation2 + $0x18] sm:$0xff]  ;;  %v6823_v33 = vld [vmem:[#allocation2 + $0x20] sm:$0xff]  ;;  %v6625_v42 = vmov -1e+30  }
  0x4b   : > { %s276_s12 = scalar_lea.vmem %s7672_s0, %s5109_s24  ;;  %v6774_v2 = vld [vmem:[%s285_s6] sm:$0xff]  ;;  %v293_v10 = vld [vmem:[%s281_s9 + $0x8] sm:$0xf]  ;;  %v5829_v27 = vpack.c.bf16 %v923_v26, %v922_v25  ;;  %v6829_v34 = vld [vmem:[#allocation2 + $0x38] sm:$0xff]  ;;  %s6626_s14 = smov 96  }
  0x4c   : > { %v517_v3 = vand.u32 2147483647, %v6774_v2  ;;  %vm519_vm2 = vcmp.ne.f32.partialorder %v6774_v2, 0.0  ;;  %v292_v4 = vld [vmem:[%s281_s9] sm:$0xff]  ;;  %v291_v8 = vld [vmem:[%s276_s12 + $0x8] sm:$0xf]  ;;  %s289_s7 = scalar_lea.vmem %s7677_s5, %s5002_s22 }
  0x4d   : > { %v346_v6 = vand.u32 2147483647, %v292_v4  ;;  %vm350_vm4 = vcmp.ne.f32.partialorder %v292_v4, 0.0  ;;  %v290_v7 = vld [vmem:[%s276_s12] sm:$0xff]  ;;  %v337_v11 = vand.u32 2147483647, %v291_v8  ;;  %1033 = vrot.lane.b32.xlu1 %v6813_v30, %s6624_s13 }
  0x4e   : > { %vm518_vm5 = vcmp.le.f32.partialorder %v517_v3, 3.4028235e+38  ;;  %v336_v9 = vand.u32 2147483647, %v290_v7  ;;  %v347_v13 = vand.u32 2147483647, %v293_v10 }
  0x4f   : > { %vm520_vm6 = vmand %vm518_vm5, %vm519_vm2  ;;  %vm348_vm7 = vcmp.le.f32.partialorder %v346_v6, 3.4028235e+38  ;;  %vm351_vm8 = vcmp.ne.f32.partialorder %v293_v10, 0.0  ;;  %vm340_vm12 = vcmp.ne.f32.partialorder %v290_v7, 0.0  ;;  %vm339_vm13 = vcmp.le.f32.partialorder %v337_v11, 3.4028235e+38 }
  0x50   : > { %v521_v12 = vsel %vm520_vm6, 1.0, %v6620_v0  ;;  %vm352_vm9 = vmand %vm348_vm7, %vm350_vm4  ;;  %vm338_vm11 = vcmp.le.f32.partialorder %v336_v9, 3.4028235e+38  ;;  %vm341_vm14 = vcmp.ne.f32.partialorder %v291_v8, 0.0  ;;  %vm349_vm15 = vcmp.le.f32.partialorder %v347_v13, 3.4028235e+38 }
  0x51   : > { %5359 = vmatpush3.xpose.msk.msra.mxu1 %vm436_vm1, %v521_v12  ;;  %v354_v14 = vsel %vm352_vm9, 1.0, %v6620_v0  ;;  %vm5819_vm2 = vmpackc.low %vm356_vm10, %vm356_vm10  ;;  %vm760_vm5 = vcmask 1045504   ;;  %v6815_v31 = vld [vmem:[#allocation2 + $0x8] sm:$0xff]  ;;  %v6831_v35 = vld [vmem:[#allocation2 + $0x30] sm:$0xff]  ;;  %vm660_vm9 = vcmask 261120   ;;  %s6627_s15 = smov 12  }
  0x52   : > { %5363 = vmatprep.subr.msk.mxu1 %vm675_vm3, %v668_v5  ;;  %vm353_vm6 = vmand %vm349_vm15, %vm351_vm8  ;;  %1029 = vrot.lane.b32.xlu0 %v6815_v31, %s6624_s13  ;;  %v6821_v32 = vld [vmem:[#allocation2 + $0x28] sm:$0xff]  ;;  %v6839_v37 = vld [vmem:[#allocation2 + $0x40] sm:$0xff]  ;;  %s6628_s16 = smov 24   ;;  %s6629_s17 = smov 36   ;;  %vm623_vm15 = vcmask 293888  }
  0x53   : > { %vm342_vm4 = vmand %vm338_vm11, %vm340_vm12  ;;  %v355_v17 = vsel %vm353_vm6, 1.0, %v6620_v0  ;;  %1037 = vrot.lane.b32.xlu1 %v6821_v32, %s6624_s13  ;;  %v6837_v36 = vld [vmem:[#allocation2 + $0x48] sm:$0xff]  ;;  %v6845_v38 = vld [vmem:[#allocation2 + $0x58] sm:$0xff]  ;;  %s6630_s19 = smov 48   ;;  %s6631_s23 = smov 60   ;;  %vm629_vm6 = vcmask 588800  }
  0x54   : > { %5361 = vmatmul.mubr.msk.f32.vlgmr.msra.gmra.mrb[0].mxu1 %vm436_vm1, %v6623_v16  ;;  %vm343_vm7 = vmand %vm339_vm13, %vm341_vm14  ;;  %v5818_v18 = vpack.c.bf16 %v355_v17, %v354_v14  ;;  %v344_v19 = vsel %vm342_vm4, 1.0, %v6620_v0  ;;  %v6847_v39 = vld [vmem:[#allocation2 + $0x50] sm:$0xff]  ;;  %v839_v44 = vld [vmem:[#allocation4 + $0x570] ss:$0 sm:$0xff]  ;;  %s6632_s20 = smov 72   ;;  %s6633_s26 = smov 84  }
  0x55   : > { %5364 = vmatpush3.msk.msra.mxu1 %vm675_vm3, %v668_v5  ;;  %5365 = vmatprep.mubr.msk.f32.mxu1 %vm356_vm10, %v292_v4  ;;  %v345_v20 = vsel %vm343_vm7, 1.0, %v6620_v0  ;;  %vm5823_vm3 = vmpackc.low %vm436_vm1, %vm436_vm1  ;;  %v842_v51 = vld [vmem:[#allocation4 + $0x20] sm:$0x3f]  ;;  %v924_v58 = vld [vmem:[#allocation4 + $0x577] ss:$0 sm:$0xff]  ;;  %vm619_vm13 = vcmask 97280  }
  0x56   : > { %5368 = vmatprep.subr.msk.mxu1 %vm760_vm5, %v667_v15  ;;  %5820 = vmatpush3.bf16.xpose.msk.msra.mxu0 %vm5819_vm2, %v5818_v18  ;;  %v5822_v21 = vpack.c.bf16 %v345_v20, %v344_v19  ;;  %vm6952_vm12 = vmpackc.low %vm660_vm9, %vm660_vm9  ;;  %vm621_vm14 = vcmask 195584   ;;  %vm625_vm2 = vcmask 392192   ;;  %vm631_vm4 = vcmask 687104   ;;  %s6634_s27 = smov 64   ;;  %s6635_s28 = smov 8  }
  0x57   : > { %5821 = vmatprep.subr.bf16.mxu0 %v6622_v1  ;;  %1035 = vrot.lane.b32.xlu0 %v6823_v33, %s6624_s13  ;;  %vm1270_vm7 = vcmask 781312   ;;  %s6636_s29 = smov 16   ;;  %s6637_s24 = smov 40  }
  0x58   : > { %5366 = vmatmul.mubr.msk.f32.vlgmr.msra.gmra.mrb[2].mxu1 %vm356_vm10, %v293_v10  ;;  %1041 = vrot.lane.b32.xlu1 %v6829_v34, %s6624_s13  ;;  %s6638_s25 = smov 56  }
  0x59   : > { %5369 = vmatpush3.msk.msra.mxu1 %vm760_vm5, %v667_v15  ;;  %5370 = vmatprep.mubr.msk.f32.mxu1 %vm436_vm1, %v290_v7 }
  0x5a   : > { %5373 = vmatprep.subr.mxu1 %v6620_v0 }
  0x5b   : > { %1039 = vrot.lane.b32.xlu0 %v6831_v35, %s6624_s13 }
  0x5c   : > { %1045 = vrot.lane.b32.xlu1 %v6837_v36, %s6624_s13 }
  0x5d   : > { %5349 = vmatmul.mubr.msk.f32.vlgmr.msra.gmra.mrb[0].mxu0 %vm356_vm10, %v6623_v16 }
  0x5e   : > { %5824 = vmatpush3.bf16.xpose.msk.msra.mxu0 %vm5823_vm3, %v5822_v21  ;;  %5355 = vmatprep.mubr.msk.f32.mxu0 %vm6621_vm0, %v6620_v0  ;;  %vm1266_vm3 = vcmask 785408  }
  0x5f   : > { %5826 = vmatprep.subr.bf16.mxu0 %v5825_v24  ;;  %1043 = vrot.lane.b32.xlu0 %v6839_v37, %s6624_s13 }
  0x60   : > { %5371 = vmatmul.mubr.msk.f32.vlgmr.msra.gmra.mrb[2].mxu1 %vm436_vm1, %v291_v8  ;;  %1049 = vrot.lane.b32.xlu1 %v6845_v38, %s6624_s13 }
  0x61   : > { %5375 = vmatprep.mubr.msk.f32.mxu1 %vm6621_vm0, %v6620_v0  ;;  %5374 = vmatpush3.msk.msra.mxu1 %vm760_vm5, %v842_v51  ;;  %vm627_vm5 = vcmask 490496  }
  0x63   : > { %1047 = vrot.lane.b32.xlu0 %v6847_v39, %s6624_s13 }
  0x64   : > { %5376 = vmatmul.mubr.msk.f32.vlgmr.msra.gmra.mrb[4].mxu1 %vm436_vm1, %v6774_v2 }
  0x65   : > { %5356 = vmatmul.mubr.msk.f32.vlgmr.msra.gmra.mrb[0].mxu0 %vm436_vm1, %v6623_v16  ;;  %vm1008_vm1 = vcmask 1043456  }
  0x66   : > { %5828 = vmatpush3.bf16.msra.mxu0 %v5825_v24 }
  0x67   : > { %5830 = vmatprep.subr.bf16.mxu0 %v5829_v27 }
  0x6a   : > { %5832 = vmatpush3.bf16.msra.mxu0 %v5829_v27 }
  0xbb   : > { %v6867_v52 = vpop.permute.xlu1 %1031 }
  0xbc   : > { %v6869_v53 = vpop.permute.xlu0 %1027 }
  0xbf   : > { %v6871_v54 = vpop.permute.xlu1 %1033 }
  0xc4   : > { %v6873_v55 = vpop.permute.xlu0 %1029 }
  0xc5   : > { %v6875_v56 = vpop.permute.xlu1 %1037 }
  0xc9   : > { %v6877_v57 = vpop.permute.xlu0 %1035 }
  0xca   : > { %v6879_v59 = vpop.permute.xlu1 %1041 }
  0xcd   : > { %v6881_v60 = vpop.permute.xlu0 %1039 }
  0xce   : > { %v6891_v5 = vpop.permute.xlu1 %1045 }
  0xd1   : > { %v6893_v6 = vpop.permute.xlu0 %1043 }
  0xd2   : > { %v6916_v18 = vpop.permute.xlu1 %1049 }
  0xd5   : > { %v6918_v19 = vpop.permute.xlu0 %1047 }
 0x127   : > { %v591_v40 = vpop.f32.mrb[0].mxu1 }
 0x128   : > { %vm595_vm8 = vcmp.gt.f32.partialorder %v591_v40, 0.0  ;;  %v5362_v41 = vpop.f32.mrb[1].mxu1 }
 0x129   : > { %v6854_v43 = vsel %vm595_vm8, 0.0, %v6625_v42  ;;  %vm655_vm8 = vcmask 64512  }
 0x133   : > { %v5372_v45 = vpop.f32.mrb[2].mxu1 }
 0x134   : > { %v830_v46 = vpop.f32.mrb[3].mxu1  ;;  %v6858_v48 = vadd.f32 %v5372_v45, %v839_v44 }
 0x135   : > { %v6856_v47 = vadd.f32 %v839_v44, %v830_v46 }
 0x137   : > { %5386 = vmatprep.mubr.msk.f32.mxu0 %vm660_vm9, %v6856_v47 }
 0x138   : > { %5387 = vmatmul.mubr.msk.f32.vlgmr.msra.gmra.mrb[2].mxu0 %vm660_vm9, %v6858_v48  ;;  %v511_v49 = vpop.f32.mrb[0].mxu0 }
 0x139   : > { %v5357_v50 = vpop.f32.mrb[1].mxu0  ;;  %vm515_vm11 = vcmp.gt.f32.partialorder %v511_v49, 0.0 }
 0x13a   : > { %v6937_v41 = vsel %vm515_vm11, 0.0, %v6625_v42  ;;  %v6948_v42 = vpop.f32.mrb[4].mxu1  ;;  %vm1660_vm11 = vcmask 257024  }
 0x13b   : > { %v5377_v44 = vpop.f32.mrb[5].mxu1 }
 0x20b   : > { %v5388_v61 = vpop.f32.mrb[2].mxu0 }
 0x20c   : > { %v6883_v62 = vadd.f32 %v5388_v61, %v924_v58  ;;  %v997_v63 = vpop.f32.mrb[3].mxu0 }
 0x20d   : > { %v6885_v2 = vadd.f32 %v997_v63, %v924_v58 }
 0x20e   : > { %v1010_v3 = vrot.slane %v6883_v62, 4 }
 0x20f   : > { %v1009_v4 = vrot.slane %v6885_v2, 4  ;;  %5413 = vmatprep.mubr.msk.f32.mxu1 %vm660_vm9, %v6885_v2  ;;  %v1063_v9 = vmul.f32 %v6869_v53, %v6885_v2  ;;  %v1066_v12 = vmul.f32 %v6871_v54, %v6885_v2  ;;  %v1069_v20 = vmul.f32 %v6881_v60, %v6885_v2 }
 0x210   : > { %v1072_v26 = vmul.f32 %v6891_v5, %v6885_v2 }
 0x211   : > { %v6896_v7 = vsel %vm1008_vm1, %v1009_v4, %v1010_v3  ;;  %v6900_v8 = vsel %vm1008_vm1, %v6883_v62, %v1009_v4 }
 0x212   : > { %v1064_v10 = vmul.f32 %v6873_v55, %v6900_v8  ;;  %v1065_v11 = vmul.f32 %v6867_v52, %v6896_v7  ;;  %v1067_v14 = vmul.f32 %v6877_v57, %v6900_v8  ;;  %v1068_v15 = vmul.f32 %v6875_v56, %v6896_v7 }
 0x213   : > { %v1070_v17 = vmul.f32 %v6879_v59, %v6900_v8  ;;  %v1071_v21 = vmul.f32 %v6893_v6, %v6896_v7  ;;  %v1074_v23 = vmul.f32 %v6916_v18, %v6896_v7  ;;  %v1073_v24 = vmul.f32 %v6918_v19, %v6900_v8 }
 0x214   : > { %v6279_v13 = vpack.i.bf16 %v1064_v10, %v1063_v9  ;;  %v6284_v16 = vpack.i.bf16 %v1066_v12, %v1065_v11  ;;  %v6289_v22 = vpack.i.bf16 %v1068_v15, %v1067_v14 }
 0x215   : > { %v6294_v25 = vpack.i.bf16 %v1070_v17, %v1069_v20  ;;  %v6299_v27 = vpack.i.bf16 %v1072_v26, %v1071_v21  ;;  %v6304_v40 = vpack.i.bf16 %v1074_v23, %v1073_v24  ;;  %v307_v26 = vld [vmem:[#allocation2 + $0x60] sm:$0xff] }
 0x216   : > { %6280 = vrot.lane.b32.xlu0 %v6279_v13, %s6626_s14  ;;  %6285 = vrot.lane.b32.xlu1 %v6284_v16, %s6626_s14 }
 0x21a   : > { %6290 = vrot.lane.b32.xlu0 %v6289_v22, %s6626_s14  ;;  %6295 = vrot.lane.b32.xlu1 %v6294_v25, %s6626_s14 }
 0x21e   : > { %6300 = vrot.lane.b32.xlu0 %v6299_v27, %s6626_s14  ;;  %6305 = vrot.lane.b32.xlu1 %v6304_v40, %s6626_s14  ;;  %v308_v27 = vld [vmem:[#allocation2 + $0x68] sm:$0xff]  ;;  %v309_v40 = vld [vmem:[#allocation2 + $0x70] sm:$0xff] }
 0x21f   : > { %v6982_v44 = vpack.c.bf16 %v308_v27, %v307_v26  ;;  %v311_v26 = vld [vmem:[#allocation2 + $0x80] sm:$0xff]  ;;  %v312_v27 = vld [vmem:[#allocation2 + $0x88] sm:$0xff] }
 0x221   : > { %5870 = vmatprep.subr.bf16.mxu0 %v6982_v44 }
 0x222   : > { %598 = vrot.lane.b32.xlu0 %v6937_v41, %s6627_s15  ;;  %601 = vrot.lane.b32.xlu1 %v6937_v41, %s6628_s16 }
 0x223   : > { %5872 = vmatpush3.bf16.msra.mxu0 %v6982_v44 }
 0x226   : > { %604 = vrot.lane.b32.xlu0 %v6937_v41, %s6629_s17  ;;  %607 = vrot.lane.b32.xlu1 %v6937_v41, %s6630_s19 }
 0x22a   : > { %610 = vrot.lane.b32.xlu0 %v6937_v41, %s6631_s23  ;;  %613 = vrot.lane.b32.xlu1 %v6937_v41, %s6632_s20 }
 0x22e   : > { %616 = vrot.lane.b32.xlu0 %v6937_v41, %s6633_s26 }
 0x288   : > { %v6281_v45 = vpop.permute.xlu0 %6280  ;;  %v6286_v50 = vpop.permute.xlu1 %6285 }
 0x289   : > { %v6283_v46 = vunpack.i.h.bf16 %v6281_v45  ;;  %v6282_v49 = vunpack.i.l.bf16 %v6281_v45  ;;  %v6288_v51 = vunpack.i.h.bf16 %v6286_v50  ;;  %v6287_v58 = vunpack.i.l.bf16 %v6286_v50  ;;  %v310_v45 = vld [vmem:[#allocation2 + $0x78] sm:$0xff] }
 0x28b   : > { %v5833_v63 = vpack.c.bf16 %v6283_v46, %v6282_v49  ;;  %v5839_v3 = vpack.c.bf16 %v6288_v51, %v6287_v58  ;;  %v6984_v46 = vpack.c.bf16 %v310_v45, %v309_v40  ;;  %v7005_v40 = vpack.c.bf16 %v312_v27, %v311_v26  ;;  %v313_v45 = vld [vmem:[#allocation2 + $0x90] sm:$0xff] }
 0x28c   : > { %v6291_v4 = vpop.permute.xlu0 %6290  ;;  %v6296_v12 = vpop.permute.xlu1 %6295 }
 0x28d   : > { %5835 = vmatprep.subr.msk.bf16.mxu1 %vm6952_vm12, %v5833_v63  ;;  %v6293_v9 = vunpack.i.h.bf16 %v6291_v4  ;;  %v6292_v10 = vunpack.i.l.bf16 %v6291_v4  ;;  %v6298_v13 = vunpack.i.h.bf16 %v6296_v12  ;;  %v6297_v14 = vunpack.i.l.bf16 %v6296_v12  ;;  %5874 = vmatprep.subr.bf16.mxu0 %v6984_v46 }
 0x28e   : > { %5838 = vmatpush3.bf16.xpose.msk.msra.mxu1 %vm6952_vm12, %v5833_v63  ;;  %5876 = vmatpush3.bf16.msra.mxu0 %v6984_v46  ;;  %v1123_v4 = vlaneseq }
 0x28f   : > { %5841 = vmatprep.subr.msk.bf16.mxu1 %vm6952_vm12, %v5839_v3  ;;  %v5845_v11 = vpack.c.bf16 %v6293_v9, %v6292_v10  ;;  %v5851_v15 = vpack.c.bf16 %v6298_v13, %v6297_v14  ;;  %5878 = vmatprep.subr.bf16.mxu0 %v7005_v40 }
 0x290   : > { %v6301_v16 = vpop.permute.xlu0 %6300  ;;  %v6306_v22 = vpop.permute.xlu1 %6305 }
 0x291   : > { %v6303_v17 = vunpack.i.h.bf16 %v6301_v16  ;;  %v6302_v20 = vunpack.i.l.bf16 %v6301_v16  ;;  %v6308_v23 = vunpack.i.h.bf16 %v6306_v22  ;;  %v6307_v24 = vunpack.i.l.bf16 %v6306_v22 }
 0x292   : > { %5880 = vmatpush3.bf16.msra.mxu0 %v7005_v40 }
 0x293   : > { %v5857_v21 = vpack.c.bf16 %v6303_v17, %v6302_v20  ;;  %v5863_v25 = vpack.c.bf16 %v6308_v23, %v6307_v24 }
 0x294   : > { %v599_v49 = vpop.permute.xlu0 %598  ;;  %v602_v50 = vpop.permute.xlu1 %601 }
 0x295   : > { %v620_v51 = vsel %vm619_vm13, %v6937_v41, %v599_v49  ;;  %v314_v49 = vld [vmem:[#allocation2 + $0x98] sm:$0xff]  ;;  %vm662_vm13 = vcmask 326656  }
 0x296   : > { %5844 = vmatpush3.bf16.xpose.msk.msra.mxu1 %vm6952_vm12, %v5839_v3  ;;  %v622_v63 = vsel %vm621_vm14, %v620_v51, %v602_v50  ;;  %v7011_v50 = vpack.c.bf16 %v314_v49, %v313_v45  ;;  %v316_v51 = vld [vmem:[#allocation2 + $0xa8] sm:$0xff] }
 0x297   : > { %5847 = vmatprep.subr.msk.bf16.mxu1 %vm6952_vm12, %v5845_v11 }
 0x298   : > { %v608_v58 = vpop.permute.xlu1 %607  ;;  %5882 = vmatprep.subr.bf16.mxu0 %v7011_v50 }
 0x299   : > { %5884 = vmatpush3.bf16.msra.mxu0 %v7011_v50 }
 0x29c   : > { %v614_v13 = vpop.permute.xlu1 %613 }
 0x29e   : > { %5850 = vmatpush3.bf16.xpose.msk.msra.mxu1 %vm6952_vm12, %v5845_v11  ;;  %v6993_v11 = vshrl.u32 %v1123_v4, 7 }
 0x29f   : > { %5853 = vmatprep.subr.msk.bf16.mxu1 %vm6952_vm12, %v5851_v15 }
 0x2a6   : > { %5856 = vmatpush3.bf16.xpose.msk.msra.mxu1 %vm6952_vm12, %v5851_v15  ;;  %v6996_v15 = vsub.s32 0, %v6993_v11 }
 0x2a7   : > { %5859 = vmatprep.subr.msk.bf16.mxu1 %vm6952_vm12, %v5857_v21 }
 0x2ae   : > { %5862 = vmatpush3.bf16.xpose.msk.msra.mxu1 %vm6952_vm12, %v5857_v21 }
 0x2af   : > { %5865 = vmatprep.subr.msk.bf16.mxu1 %vm6952_vm12, %v5863_v25 }
 0x2b6   : > { %5868 = vmatpush3.bf16.xpose.msk.msra.mxu1 %vm6952_vm12, %v5863_v25 }
 0x2bd   : > { %5414 = vmatmul.mubr.msk.f32.vlgmr.msra.gmra.mrb[6].mxu1 %vm660_vm9, %v6883_v62  ;;  %v605_v62 = vpop.permute.xlu0 %604 }
 0x2be   : > { %v624_v9 = vsel %vm623_vm15, %v622_v63, %v605_v62  ;;  %v315_v62 = vld [vmem:[#allocation2 + $0xa0] sm:$0xff]  ;;  %v318_v63 = vld [vmem:[#allocation2 + $0xb8] sm:$0xff]  ;;  %vm665_vm15 = vcmask 457728  }
 0x2bf   : > { %v626_v10 = vsel %vm625_vm2, %v624_v9, %v608_v58  ;;  %v7019_v58 = vpack.c.bf16 %v316_v51, %v315_v62 }
 0x2c1   : > { %v611_v3 = vpop.permute.xlu0 %610  ;;  %5886 = vmatprep.subr.bf16.mxu0 %v7019_v58 }
 0x2c2   : > { %v628_v12 = vsel %vm627_vm5, %v626_v10, %v611_v3  ;;  %5888 = vmatpush3.bf16.msra.mxu0 %v7019_v58 }
 0x2c3   : > { %v630_v41 = vsel %vm629_vm6, %v628_v12, %v614_v13 }
 0x2c5   : > { %v617_v14 = vpop.permute.xlu0 %616 }
 0x2c6   : > { %v632_v16 = vsel %vm631_vm4, %v630_v41, %v617_v14 }
 0x2c7   : > { %v6999_v17 = vrot.slane %v632_v16, %v6996_v15 }
 0x390   : > { %v5415_v20 = vpop.f32.mrb[6].mxu1 }
 0x391   : > { %v1263_v21 = vadd.f32 %v5415_v20, %v6999_v17  ;;  %v1257_v22 = vpop.f32.mrb[7].mxu1 }
 0x392   : > { %v1258_v23 = vadd.f32 %v1257_v22, %v6999_v17 }
 0x393   : > { %v1271_v24 = vsel %vm1270_vm7, %v1263_v21, -inf }
 0x394   : > { %1272 = vmax.xlane.f32.xlu0 %v1271_v24  ;;  %v1267_v25 = vsel %vm1266_vm3, %v1258_v23, -inf }
 0x395   : > { %1268 = vmax.xlane.f32.xlu1 %v1267_v25 }
 0x3a6   : > { %1077 = vrot.lane.b32.xlu1 %v6815_v31, %s6634_s27  ;;  %v317_v31 = vld [vmem:[#allocation2 + $0xb0] sm:$0xff] }
 0x3a7   : > { %v7027_v3 = vpack.c.bf16 %v318_v63, %v317_v31 }
 0x3a9   : > { %5890 = vmatprep.subr.bf16.mxu0 %v7027_v3 }
 0x3aa   : > { %1075 = vrot.lane.b32.xlu0 %v6807_v29, %s6634_s27  ;;  %1079 = vrot.lane.b32.xlu1 %v6805_v28, %s6634_s27 }
 0x3ab   : > { %5892 = vmatpush3.bf16.msra.mxu0 %v7027_v3 }
 0x3ae   : > { %1081 = vrot.lane.b32.xlu0 %v6813_v30, %s6634_s27  ;;  %1083 = vrot.lane.b32.xlu1 %v6823_v33, %s6634_s27 }
 0x3b2   : > { %1085 = vrot.lane.b32.xlu0 %v6821_v32, %s6634_s27  ;;  %1087 = vrot.lane.b32.xlu1 %v6831_v35, %s6634_s27 }
 0x3b6   : > { %1089 = vrot.lane.b32.xlu0 %v6829_v34, %s6634_s27  ;;  %1091 = vrot.lane.b32.xlu1 %v6839_v37, %s6634_s27 }
 0x3ba   : > { %1093 = vrot.lane.b32.xlu0 %v6837_v36, %s6634_s27  ;;  %1095 = vrot.lane.b32.xlu1 %v6847_v39, %s6634_s27 }
 0x3be   : > { %1097 = vrot.lane.b32.xlu0 %v6845_v38, %s6634_s27 }
 0x421   : > { %v1273_v28 = vpop.xlane.xlu0 %1272 }
 0x422   : > { %v1275_v29 = vsub.f32 %v1263_v21, %v1273_v28  ;;  %v1269_v30 = vpop.xlane.xlu1 %1268 }
 0x423   : > { %v1274_v32 = vsub.f32 %v1258_v23, %v1269_v30 }
 0x424   : > { %v1278_v33 = vmul.f32 1.442695, %v1275_v29 }
 0x425   : > { %v1276_v35 = vmul.f32 1.442695, %v1274_v32  ;;  %v7045_v4 = vpop.permute.xlu0 %1075 }
 0x426   : > { %v1111_v34 = vmul.f32 %v7045_v4, %v6885_v2  ;;  %v7049_v37 = vpop.permute.xlu1 %1077 }
 0x427   : > { %6479 = vpow2.f32 %v1276_v35  ;;  %v1112_v36 = vmul.f32 %v7049_v37, %v6900_v8 }
 0x428   : > { %6481 = vpow2.f32 %v1278_v33  ;;  %v7102_v33 = vld [vmem:[#allocation2 + $0x140] sm:$0xff] }
 0x429   : > { %v7053_v39 = vpop.permute.xlu0 %1081  ;;  %v6309_v38 = vpack.i.bf16 %v1112_v36, %v1111_v34  ;;  %5470 = vmatprep.subr.mxu1 %v7102_v33 }
 0x42a   : > { %v1114_v9 = vmul.f32 %v7053_v39, %v6885_v2  ;;  %v7057_v10 = vpop.permute.xlu1 %1079  ;;  %5471 = vmatpush3.msra.mxu1 %v7102_v33 }
 0x42b   : > { %v1113_v12 = vmul.f32 %v7057_v10, %v6896_v7  ;;  %6310 = vrot.lane.b32.xlu1 %v6309_v38, %s6634_s27 }
 0x42d   : > { %v7062_v13 = vpop.permute.xlu0 %1085  ;;  %v6314_v14 = vpack.i.bf16 %v1114_v9, %v1113_v12 }
 0x42e   : > { %v1116_v41 = vmul.f32 %v7062_v13, %v6896_v7  ;;  %v7066_v16 = vpop.permute.xlu1 %1083 }
 0x42f   : > { %v1115_v20 = vmul.f32 %v7066_v16, %v6900_v8  ;;  %6315 = vrot.lane.b32.xlu0 %v6314_v14, %s6634_s27 }
 0x431   : > { %v6480_v21 = vpop.eup %6479  ;;  %v7071_v22 = vpop.permute.xlu0 %1089  ;;  %v6319_v23 = vpack.i.bf16 %v1116_v41, %v1115_v20 }
 0x432   : > { %v6482_v24 = vpop.eup %6481  ;;  %v1118_v25 = vmul.f32 %v7071_v22, %v6900_v8  ;;  %5440 = vmatprep.mubr.msk.f32.mxu0 %vm1266_vm3, %v6480_v21  ;;  %v7076_v26 = vpop.permute.xlu1 %1087 }
 0x433   : > { %v1117_v27 = vmul.f32 %v7076_v26, %v6885_v2  ;;  %5441 = vmatmul.mubr.msk.f32.vlgmr.msra.gmra.mrb[4].mxu0 %vm1266_vm3, %v6482_v24  ;;  %6320 = vrot.lane.b32.xlu1 %v6319_v23, %s6634_s27 }
 0x434   : > { %5467 = vmatprep.mubr.msk.f32.mxu0 %vm1266_vm3, %v6480_v21 }
 0x435   : > { %v7083_v45 = vpop.permute.xlu0 %1093  ;;  %v6324_v49 = vpack.i.bf16 %v1118_v25, %v1117_v27 }
 0x436   : > { %v1120_v62 = vmul.f32 %v7083_v45, %v6885_v2  ;;  %v7087_v51 = vpop.permute.xlu1 %1091 }
 0x437   : > { %v1119_v31 = vmul.f32 %v7087_v51, %v6896_v7  ;;  %6325 = vrot.lane.b32.xlu0 %v6324_v49, %s6634_s27 }
 0x439   : > { %v6329_v63 = vpack.i.bf16 %v1120_v62, %v1119_v31  ;;  %v7092_v28 = vpop.permute.xlu0 %1097 }
 0x43a   : > { %v1122_v29 = vmul.f32 %v7092_v28, %v6896_v7  ;;  %v7096_v30 = vpop.permute.xlu1 %1095 }
 0x43b   : > { %v1121_v32 = vmul.f32 %v7096_v30, %v6900_v8  ;;  %6330 = vrot.lane.b32.xlu1 %v6329_v63, %s6634_s27 }
 0x43d   : > { %v6334_v2 = vpack.i.bf16 %v1122_v29, %v1121_v32 }
 0x43f   : > { %6335 = vrot.lane.b32.xlu0 %v6334_v2, %s6634_s27 }
 0x49d   : > { %v6311_v35 = vpop.permute.xlu1 %6310 }
 0x49e   : > { %v6313_v34 = vunpack.i.h.bf16 %v6311_v35  ;;  %v6312_v36 = vunpack.i.l.bf16 %v6311_v35 }
 0x4a0   : > { %v5893_v7 = vpack.c.bf16 %v6313_v34, %v6312_v36 }
 0x4a1   : > { %v6316_v38 = vpop.permute.xlu0 %6315 }
 0x4a2   : > { %v6318_v9 = vunpack.i.h.bf16 %v6316_v38  ;;  %v6317_v12 = vunpack.i.l.bf16 %v6316_v38  ;;  %5894 = vmatprep.subr.bf16.mxu0 %v5893_v7  ;;  %v1569_v38 = vld [vmem:[#allocation4 + $0xb0] sm:$0xff] }
 0x4a3   : > { %5896 = vmatpush3.bf16.msra.mxu0 %v5893_v7 }
 0x4a4   : > { %v5897_v8 = vpack.c.bf16 %v6318_v9, %v6317_v12  ;;  %v1570_v9 = vld [vmem:[#allocation4 + $0xc0] sm:$0xff] }
 0x4a5   : > { %v6321_v14 = vpop.permute.xlu1 %6320  ;;  %v5917_v12 = vpack.c.bf16 %v1570_v9, %v1569_v38 }
 0x4a6   : > { %v6323_v41 = vunpack.i.h.bf16 %v6321_v14  ;;  %v6322_v20 = vunpack.i.l.bf16 %v6321_v14  ;;  %5898 = vmatprep.subr.bf16.mxu0 %v5897_v8 }
 0x4a7   : > { %5900 = vmatpush3.bf16.msra.mxu0 %v5897_v8  ;;  %5918 = vmatprep.subr.bf16.mxu1 %v5917_v12 }
 0x4a8   : > { %v5901_v21 = vpack.c.bf16 %v6323_v41, %v6322_v20  ;;  %v1571_v41 = vld [vmem:[#allocation4 + $0xd0] sm:$0xff] }
 0x4a9   : > { %v6326_v23 = vpop.permute.xlu0 %6325 }
 0x4aa   : > { %v6328_v25 = vunpack.i.h.bf16 %v6326_v23  ;;  %v6327_v27 = vunpack.i.l.bf16 %v6326_v23  ;;  %5902 = vmatprep.subr.bf16.mxu0 %v5901_v21 }
 0x4ab   : > { %5904 = vmatpush3.bf16.msra.mxu0 %v5901_v21 }
 0x4ac   : > { %v5905_v49 = vpack.c.bf16 %v6328_v25, %v6327_v27 }
 0x4ad   : > { %v6331_v62 = vpop.permute.xlu1 %6330 }
 0x4ae   : > { %v6333_v31 = vunpack.i.h.bf16 %v6331_v62  ;;  %v6332_v63 = vunpack.i.l.bf16 %v6331_v62  ;;  %5906 = vmatprep.subr.bf16.mxu0 %v5905_v49 }
 0x4af   : > { %5908 = vmatpush3.bf16.msra.mxu0 %v5905_v49 }
 0x4b0   : > { %v5909_v29 = vpack.c.bf16 %v6333_v31, %v6332_v63  ;;  %v1573_v31 = vld [vmem:[#allocation4 + $0x580] ss:$0 sm:$0xff] }
 0x4b1   : > { %v6336_v32 = vpop.permute.xlu0 %6335 }
 0x4b2   : > { %v6338_v2 = vunpack.i.h.bf16 %v6336_v32  ;;  %v6337_v35 = vunpack.i.l.bf16 %v6336_v32  ;;  %5910 = vmatprep.subr.bf16.mxu0 %v5909_v29 }
 0x4b3   : > { %5912 = vmatpush3.bf16.msra.mxu0 %v5909_v29 }
 0x4b4   : > { %v5913_v34 = vpack.c.bf16 %v6338_v2, %v6337_v35 }
 0x4b6   : > { %5914 = vmatprep.subr.bf16.mxu0 %v5913_v34 }
 0x4b7   : > { %5916 = vmatpush3.bf16.msra.mxu0 %v5913_v34 }
 0x4ba   : > { %5468 = vmatmul.mubr.msk.f32.vlgmr.msra.gmra.mrb[6].mxu0 %vm1266_vm3, %v6482_v24  ;;  %v1572_v24 = vld [vmem:[#allocation4 + $0xe0] sm:$0xff] }
 0x4bb   : > { %1782 = vmatprep.mubr.f32.mxu0 %v6620_v0  ;;  %v5921_v20 = vpack.c.bf16 %v1572_v24, %v1571_v41 }
 0x506   : > { %v5442_v36 = vpop.f32.mrb[4].mxu0 }
 0x507   : > { %v1352_v7 = vpop.f32.mrb[5].mxu0 }
 0x508   : > { %6483 = vrcp.f32 %v1352_v7 }
 0x509   : > { %6485 = vrcp.f32 %v5442_v36 }
 0x512   : > { %v6484_v8 = vpop.eup %6483 }
 0x513   : > { %v6486_v14 = vpop.eup %6485  ;;  %5472 = vmatprep.mubr.msk.f32.mxu1 %vm655_vm8, %v6484_v8 }
 0x514   : > { %5473 = vmatmul.mubr.msk.f32.vlgmr.msra.gmra.mrb[8].mxu1 %vm655_vm8, %v6486_v14 }
 0x515   : > { %5920 = vmatpush3.bf16.msra.mxu1 %v5917_v12 }
 0x516   : > { %5922 = vmatprep.subr.bf16.mxu1 %v5921_v20 }
 0x519   : > { %5924 = vmatpush3.bf16.msra.mxu1 %v5921_v20 }
 0x58d   : > { %v5469_v21 = vpop.f32.mrb[6].mxu0 }
 0x58e   : > { %v1475_v23 = vpop.f32.mrb[7].mxu0 }
 0x5e7   : > { %v5474_v25 = vpop.f32.mrb[8].mxu1 }
 0x5e8   : > { %v1568_v27 = vmul.f32 %v5474_v25, %v5469_v21  ;;  %v1558_v49 = vpop.f32.mrb[9].mxu1 }
 0x5e9   : > { %v1567_v62 = vmul.f32 %v1558_v49, %v1475_v23  ;;  %v1694_v23 = vld [vmem:[#allocation4 + $0x108] sm:$0xff]  ;;  %v1693_v49 = vld [vmem:[#allocation4 + $0x100] sm:$0xff] }
 0x5eb   : > { %5483 = vmatprep.mubr.msk.f32.mxu1 %vm660_vm9, %v1567_v62 }
 0x5ec   : > { %5484 = vmatmul.mubr.msk.f32.vlgmr.msra.gmra.mrb[10].mxu1 %vm660_vm9, %v1568_v27  ;;  %v1691_v27 = vld [vmem:[#allocation4 + $0xf0] sm:$0xff] }
 0x5ed   : > { %v5927_v62 = vpack.c.bf16 %v1693_v49, %v1691_v27 }
 0x6bf   : > { %v5485_v63 = vpop.f32.mrb[10].mxu1 }
 0x6c0   : > { %v1652_v29 = vadd.f32 %v5485_v63, %v1573_v31  ;;  %v1646_v32 = vpop.f32.mrb[11].mxu1  ;;  %v1698_v63 = vld [vmem:[#allocation4 + $0x128] sm:$0xff] }
 0x6c1   : > { %v1647_v2 = vadd.f32 %v1646_v32, %v1573_v31  ;;  %v1696_v31 = vld [vmem:[#allocation4 + $0x118] sm:$0xff] }
 0x6c2   : > { %v1656_v35 = vadd.f32 %v1652_v29, %v6858_v48  ;;  %v1695_v29 = vld [vmem:[#allocation4 + $0x110] sm:$0xff]  ;;  %v5929_v32 = vpack.c.bf16 %v1698_v63, %v1696_v31  ;;  %v1685_v31 = vld [vmem:[#allocation4 + $0x581] ss:$0 sm:$0xff] }
 0x6c3   : > { %v1655_v34 = vadd.f32 %v1647_v2, %v6856_v47  ;;  %v1692_v47 = vld [vmem:[#allocation4 + $0xf8] sm:$0xff]  ;;  %v1697_v2 = vld [vmem:[#allocation4 + $0x120] sm:$0xff] }
 0x6c4   : > { %v1661_v36 = vsel %vm1660_vm11, %v1656_v35, 0.0  ;;  %v5925_v25 = vpack.c.bf16 %v1694_v23, %v1692_v47 }
 0x6c5   : > { %1662 = vadd.xlane.f32.xlu0 %v1661_v36  ;;  %v1657_v7 = vsel %vm660_vm9, %v1655_v34, 0.0  ;;  %v1802_v36 = vld [vmem:[#allocation4 + $0x148] sm:$0xff] }
 0x6c6   : > { %1658 = vadd.xlane.f32.xlu1 %v1657_v7  ;;  %5926 = vmatprep.subr.bf16.mxu0 %v5925_v25  ;;  %v1799_v7 = vld [vmem:[#allocation4 + $0x130] sm:$0xff] }
 0x6c7   : > { %5928 = vmatpush1.bf16.msra.mxu0 %v5927_v62 }
 0x6c8   : > { %5930 = vmatprep.subr.bf16.mxu0 %v5929_v32  ;;  %v1688_v32 = vld [vmem:[#allocation4 + $0x582] ss:$0 sm:$0xff] }
 0x752   : > { %v1663_v38 = vpop.xlane.xlu0 %1662 }
 0x753   : > { %v1666_v9 = vmul.f32 0.03125, %v1663_v38  ;;  %v1659_v12 = vpop.xlane.xlu1 %1658 }
 0x754   : > { %v1665_v8 = vmul.f32 0.03125, %v1659_v12  ;;  %v1804_v12 = vld [vmem:[#allocation4 + $0x158] sm:$0xff] }
 0x755   : > { %v1668_v14 = vsub.f32 %v1656_v35, %v1666_v9  ;;  %v5931_v35 = vpack.c.bf16 %v1697_v2, %v1695_v29  ;;  %v1801_v9 = vld [vmem:[#allocation4 + $0x140] sm:$0xff] }
 0x756   : > { %v1667_v41 = vsub.f32 %v1655_v34, %v1665_v8  ;;  %v1800_v34 = vld [vmem:[#allocation4 + $0x138] sm:$0xff]  ;;  %v1806_v8 = vld [vmem:[#allocation4 + $0x168] sm:$0xff] }
 0x757   : > { %v1670_v24 = vmul.f32 %v1668_v14, %v1668_v14  ;;  %5932 = vmatpush1.bf16.msra.mxu0 %v5931_v35  ;;  %v5933_v38 = vpack.c.bf16 %v1802_v36, %v1800_v34 }
 0x758   : > { %v1669_v20 = vmul.f32 %v1667_v41, %v1667_v41 }
 0x759   : > { %v1674_v21 = vsel %vm1660_vm11, %v1670_v24, 0.0  ;;  %v5935_v24 = vpack.c.bf16 %v1801_v9, %v1799_v7  ;;  %5934 = vmatprep.subr.bf16.mxu1 %v5933_v38  ;;  %v1803_v7 = vld [vmem:[#allocation4 + $0x150] sm:$0xff]  ;;  %v1805_v38 = vld [vmem:[#allocation4 + $0x160] sm:$0xff] }
 0x75a   : > { %1675 = vadd.xlane.f32.xlu1 %v1674_v21  ;;  %v1671_v48 = vsel %vm660_vm9, %v1669_v20, 0.0  ;;  %v5937_v20 = vpack.c.bf16 %v1806_v8, %v1804_v12  ;;  %v5939_v9 = vpack.c.bf16 %v1805_v38, %v1803_v7  ;;  %v1700_v12 = vld [vmem:[#allocation4 + $0x585] ss:$8 sm:$0x3] }
 0x75b   : > { %1672 = vadd.xlane.f32.xlu0 %v1671_v48  ;;  %5936 = vmatpush1.bf16.xpose.msra.mxu1 %v5935_v24 }
 0x75c   : > { %5938 = vmatprep.subr.bf16.mxu1 %v5937_v20 }
 0x763   : > { %5940 = vmatpush1.bf16.xpose.msra.mxu1 %v5939_v9 }
 0x764   : > { %5986 = vmatprep.subr.bf16.mxu1 %v6982_v44 }
 0x7e7   : > { %v1676_v21 = vpop.xlane.xlu1 %1675 }
 0x7e8   : > { %v1678_v48 = vmul.f32 0.03125, %v1676_v21  ;;  %v1673_v47 = vpop.xlane.xlu0 %1672 }
 0x7e9   : > { %v1677_v23 = vmul.f32 0.03125, %v1673_v47 }
 0x7ea   : > { %v1680_v25 = vadd.f32 1e-05, %v1678_v48 }
 0x7eb   : > { %v1679_v27 = vadd.f32 1e-05, %v1677_v23 }
 0x7ec   : > { %6487 = vrsqrt.f32 %v1680_v25 }
 0x7ed   : > { %6489 = vrsqrt.f32 %v1679_v27 }
 0x7f6   : > { %v6488_v49 = vpop.eup %6487 }
 0x7f7   : > { %v6490_v62 = vpop.eup %6489  ;;  %v1684_v29 = vmul.f32 %v6488_v49, %v1668_v14  ;;  %v7123_v14 = vsub.s32 1, %v6993_v11 }
 0x7f8   : > { %v1683_v63 = vmul.f32 %v6490_v62, %v1667_v41  ;;  %v1705_v41 = vrot.slane %v1700_v12, %v6996_v15 }
 0x7f9   : > { %v1687_v34 = vmul.f32 %v1685_v31, %v1684_v29  ;;  %v1709_v8 = vrot.slane %v1700_v12, %v7123_v14 }
 0x7fa   : > { %v1686_v2 = vmul.f32 %v1685_v31, %v1683_v63 }
 0x7fb   : > { %v1690_v36 = vadd.f32 %v1688_v32, %v1687_v34 }
 0x7fc   : > { %v1689_v35 = vadd.f32 %v1688_v32, %v1686_v2 }
 0x7fe   : > { %5044 = vmatmul.mubr.msk.f32.vlgmr.msra.gmra.mrb[8].mxu0 %vm660_vm9, %v1689_v35 }
 0x7ff   : > { %1788 = vmatprep.mubr.f32.mxu0 %v6620_v0 }
 0x802   : > { %5045 = vmatmul.mubr.msk.f32.gmra.mrb[10].mxu0 %vm660_vm9, %v1690_v36 }
 0x8d1   : > { %v1784_v24 = vpop.f32.mrb[8].mxu0 }
 0x8d2   : > { %v1785_v20 = vadd.f32 %v1784_v24, %v1705_v41  ;;  %v1786_v21 = vpop.f32.mrb[9].mxu0 }
 0x8d3   : > { %v1787_v48 = vadd.f32 %v1786_v21, %v1709_v8 }
 0x8d4   : > { %v1795_v25 = vmax.f32 %v1785_v20, 0.0 }
 0x8d5   : > { %v1796_v47 = vmax.f32 %v1787_v48, 0.0  ;;  %v1790_v23 = vpop.f32.mrb[10].mxu0  ;;  %v1917_v48 = vld [vmem:[#allocation4 + $0x170] sm:$0xff] }
 0x8d6   : > { %v1791_v27 = vadd.f32 %v1790_v23, %v1705_v41  ;;  %v1792_v49 = vpop.f32.mrb[11].mxu0  ;;  %v1919_v23 = vld [vmem:[#allocation4 + $0x190] sm:$0xff] }
 0x8d7   : > { %v1793_v62 = vadd.f32 %v1792_v49, %v1709_v8  ;;  %1872 = vmatprep.mubr.f32.mxu1 %v1796_v47  ;;  %v1918_v47 = vld [vmem:[#allocation4 + $0x180] sm:$0xff] }
 0x8d8   : > { %1873 = vmatmul.mubr.f32.vlgmr.msra.gmra.mrb[12].mxu1 %v1795_v25  ;;  %v1797_v11 = vmax.f32 %v1791_v27, 0.0  ;;  %v1920_v25 = vld [vmem:[#allocation4 + $0x1a0] sm:$0xff] }
 0x8d9   : > { %v1798_v31 = vmax.f32 %v1793_v62, 0.0  ;;  %5988 = vmatpush3.bf16.msra.mxu1 %v6982_v44  ;;  %v1807_v44 = vld [vmem:[#allocation4 + $0x586] ss:$0 sm:$0xff]  ;;  %v5945_v27 = vpack.c.bf16 %v1920_v25, %v1919_v23 }
 0x8da   : > { %5990 = vmatprep.subr.bf16.mxu1 %v6984_v46 }
 0x8db   : > { %1877 = vmatprep.mubr.f32.mxu1 %v1798_v31 }
 0x8dc   : > { %1878 = vmatmul.mubr.f32.gmra.mrb[14].mxu1 %v1797_v11 }
 0x8dd   : > { %5992 = vmatpush3.bf16.msra.mxu1 %v6984_v46 }
 0x8de   : > { %5994 = vmatprep.subr.bf16.mxu1 %v7005_v40 }
 0x8e1   : > { %5996 = vmatpush3.bf16.msra.mxu1 %v7005_v40 }
 0x8e2   : > { %5998 = vmatprep.subr.bf16.mxu1 %v7011_v50 }
 0x8e5   : > { %6000 = vmatpush3.bf16.msra.mxu1 %v7011_v50 }
 0x8e6   : > { %6002 = vmatprep.subr.bf16.mxu1 %v7019_v58 }
 0x8e9   : > { %6004 = vmatpush3.bf16.msra.mxu1 %v7019_v58 }
 0x8ea   : > { %6006 = vmatprep.subr.bf16.mxu1 %v7027_v3 }
 0x8ed   : > { %6008 = vmatpush3.bf16.msra.mxu1 %v7027_v3 }
 0x9ab   : > { %v1874_v63 = vpop.f32.mrb[12].mxu1 }
 0x9ac   : > { %v1875_v29 = vadd.f32 %v1874_v63, %v1807_v44  ;;  %v1876_v46 = vpop.f32.mrb[13].mxu1 }
 0x9ad   : > { %v1911_v46 = vld [vmem:[#allocation4 + $0x583] ss:$0 sm:$0xff] }
 0x9ae   : > { %v1883_v32 = vadd.f32 %v1875_v29, %v1689_v35 }
 0x9af   : > { %v1879_v2 = vpop.f32.mrb[14].mxu1 }
 0x9b0   : > { %v1880_v34 = vadd.f32 %v1879_v2, %v1807_v44  ;;  %v1881_v40 = vpop.f32.mrb[15].mxu1  ;;  %v1885_v7 = vsel %vm660_vm9, %v1883_v32, 0.0  ;;  %v1914_v2 = vld [vmem:[#allocation4 + $0x584] ss:$0 sm:$0xff] }
 0x9b1   : > { %1886 = vadd.xlane.f32.xlu0 %v1885_v7 }
 0x9b2   : > { %v1884_v50 = vadd.f32 %v1880_v34, %v1690_v36  ;;  %v5941_v36 = vpack.c.bf16 %v1918_v47, %v1917_v48 }
 0x9b4   : > { %v1888_v38 = vsel %vm1660_vm11, %v1884_v50, 0.0  ;;  %5942 = vmatprep.subr.bf16.mxu0 %v5941_v36 }
 0x9b5   : > { %1889 = vadd.xlane.f32.xlu1 %v1888_v38  ;;  %5944 = vmatpush3.bf16.msra.mxu0 %v5941_v36 }
 0x9b6   : > { %5946 = vmatprep.subr.bf16.mxu0 %v5945_v27 }
 0x9b9   : > { %5948 = vmatpush3.bf16.msra.mxu0 %v5945_v27 }
 0xa3e   : > { %v1887_v58 = vpop.xlane.xlu0 %1886 }
 0xa3f   : > { %v1891_v9 = vmul.f32 0.03125, %v1887_v58 }
 0xa41   : > { %v1893_v12 = vsub.f32 %v1883_v32, %v1891_v9  ;;  %v1921_v9 = vld [vmem:[#allocation4 + $0x587] ss:$0 sm:$0xff] }
 0xa42   : > { %v1890_v41 = vpop.xlane.xlu1 %1889 }
 0xa43   : > { %v1892_v3 = vmul.f32 0.03125, %v1890_v41  ;;  %v1895_v8 = vmul.f32 %v1893_v12, %v1893_v12 }
 0xa45   : > { %v1894_v24 = vsub.f32 %v1884_v50, %v1892_v3  ;;  %v1897_v20 = vsel %vm660_vm9, %v1895_v8, 0.0 }
 0xa46   : > { %1898 = vadd.xlane.f32.xlu0 %v1897_v20 }
 0xa47   : > { %v1896_v35 = vmul.f32 %v1894_v24, %v1894_v24 }
 0xa49   : > { %v1900_v21 = vsel %vm1660_vm11, %v1896_v35, 0.0 }
 0xa4a   : > { %1901 = vadd.xlane.f32.xlu1 %v1900_v21 }
 0xad3   : > { %v1899_v49 = vpop.xlane.xlu0 %1898 }
 0xad4   : > { %v1903_v62 = vmul.f32 0.03125, %v1899_v49 }
 0xad6   : > { %v1905_v31 = vadd.f32 1e-05, %v1903_v62 }
 0xad7   : > { %v1902_v11 = vpop.xlane.xlu1 %1901 }
 0xad8   : > { %6491 = vrsqrt.f32 %v1905_v31  ;;  %v1904_v44 = vmul.f32 0.03125, %v1902_v11 }
 0xada   : > { %v1906_v63 = vadd.f32 1e-05, %v1904_v44 }
 0xadc   : > { %6493 = vrsqrt.f32 %v1906_v63 }
 0xae2   : > { %v6492_v29 = vpop.eup %6491 }
 0xae3   : > { %v1909_v32 = vmul.f32 %v6492_v29, %v1893_v12 }
 0xae5   : > { %v1912_v34 = vmul.f32 %v1911_v46, %v1909_v32 }
 0xae6   : > { %v6494_v40 = vpop.eup %6493 }
 0xae7   : > { %v1910_v7 = vmul.f32 %v6494_v40, %v1894_v24  ;;  %v7142_v50 = vadd.f32 %v1914_v2, %v1912_v34 }
 0xae9   : > { %v1913_v38 = vmul.f32 %v1911_v46, %v1910_v7  ;;  %5494 = vmatprep.mubr.msk.f32.mxu0 %vm660_vm9, %v7142_v50 }
 0xaeb   : > { %v7146_v58 = vadd.f32 %v1914_v2, %v1913_v38 }
 0xaed   : > { %5495 = vmatmul.mubr.msk.f32.vlgmr.msra.gmra.mrb[12].mxu0 %vm660_vm9, %v7146_v58 }
 0xbc0   : > { %v5496_v41 = vpop.f32.mrb[12].mxu0 }
 0xbc1   : > { %v7150_v3 = vadd.f32 %v5496_v41, %v1921_v9  ;;  %v1994_v12 = vpop.f32.mrb[13].mxu0 }
 0xbc2   : > { %v1995_v8 = vadd.f32 %v1994_v12, %v1921_v9 }
 0xbc3   : > { %v2006_v20 = vrot.slane %v7150_v3, 4 }
 0xbc4   : > { %5521 = vmatprep.mubr.msk.f32.mxu0 %vm660_vm9, %v1995_v8  ;;  %v2005_v24 = vrot.slane %v1995_v8, 4  ;;  %v2011_v35 = vmul.f32 %v1995_v8, %v6869_v53  ;;  %v2014_v47 = vmul.f32 %v1995_v8, %v6871_v54  ;;  %v2017_v36 = vmul.f32 %v1995_v8, %v6881_v60 }
 0xbc5   : > { %v7163_v27 = vmul.f32 %v1995_v8, %v7053_v39  ;;  %v7166_v49 = vmul.f32 %v1995_v8, %v7045_v4  ;;  %v7171_v31 = vmul.f32 %v1995_v8, %v7076_v26  ;;  %v7174_v54 = vmul.f32 %v1995_v8, %v7083_v45 }
 0xbc6   : > { %v2010_v21 = vsel %vm1008_vm1, %v7150_v3, %v2005_v24  ;;  %v2007_v48 = vsel %vm1008_vm1, %v2005_v24, %v2006_v20  ;;  %vm657_vm1 = vcmask 130048  }
 0xbc7   : > { %v2012_v23 = vmul.f32 %v2010_v21, %v6873_v55  ;;  %v2013_v25 = vmul.f32 %v2007_v48, %v6867_v52  ;;  %v2018_v53 = vmul.f32 %v2010_v21, %v6879_v59  ;;  %v2015_v62 = vmul.f32 %v2010_v21, %v6877_v57 }
 0xbc8   : > { %v2016_v52 = vmul.f32 %v2007_v48, %v6875_v56  ;;  %v7178_v39 = vmul.f32 %v2007_v48, %v7057_v10  ;;  %v2021_v4 = vmul.f32 %v2010_v21, %v6918_v19  ;;  %v2022_v11 = vmul.f32 %v2007_v48, %v6916_v18 }
 0xbc9   : > { %v6339_v60 = vpack.i.bf16 %v2012_v23, %v2011_v35  ;;  %v6344_v55 = vpack.i.bf16 %v2014_v47, %v2013_v25  ;;  %v2019_v59 = vmul.f32 %v2007_v48, %v6893_v6  ;;  %v7184_v57 = vmul.f32 %v2010_v21, %v7049_v37 }
 0xbca   : > { %v6374_v26 = vpack.i.bf16 %v7163_v27, %v7178_v39  ;;  %v7191_v56 = vmul.f32 %v2010_v21, %v7066_v16  ;;  %v7194_v10 = vmul.f32 %v2007_v48, %v7062_v13  ;;  %v7199_v6 = vmul.f32 %v2010_v21, %v7071_v22 }
 0xbcb   : > { %6340 = vrot.lane.b32.xlu0 %v6339_v60, %s6626_s14  ;;  %6345 = vrot.lane.b32.xlu1 %v6344_v55, %s6626_s14  ;;  %v6369_v18 = vpack.i.bf16 %v7184_v57, %v7166_v49  ;;  %v7202_v19 = vmul.f32 %v2007_v48, %v7087_v51  ;;  %v7205_v37 = vmul.f32 %v2010_v21, %v7096_v30 }
 0xbcc   : > { %v6354_v45 = vpack.i.bf16 %v2018_v53, %v2017_v36  ;;  %v6349_v44 = vpack.i.bf16 %v2016_v52, %v2015_v62  ;;  %v6379_v16 = vpack.i.bf16 %v7194_v10, %v7191_v56  ;;  %v2034_v13 = vmul.f32 %v2007_v48, %v7092_v28 }
 0xbcd   : > { %v6384_v63 = vpack.i.bf16 %v7199_v6, %v7171_v31  ;;  %v6389_v22 = vpack.i.bf16 %v7174_v54, %v7202_v19  ;;  %v2020_v51 = vmul.f32 %v1995_v8, %v6891_v5  ;;  %v6364_v29 = vpack.i.bf16 %v2022_v11, %v2021_v4 }
 0xbce   : > { %v6394_v30 = vpack.i.bf16 %v2034_v13, %v7205_v37 }
 0xbcf   : > { %6355 = vrot.lane.b32.xlu0 %v6354_v45, %s6626_s14  ;;  %6350 = vrot.lane.b32.xlu1 %v6349_v44, %s6626_s14  ;;  %v6359_v46 = vpack.i.bf16 %v2020_v51, %v2019_v59 }
 0xbd3   : > { %6365 = vrot.lane.b32.xlu0 %v6364_v29, %s6626_s14  ;;  %6360 = vrot.lane.b32.xlu1 %v6359_v46, %s6626_s14 }
 0xc3d   : > { %v6341_v28 = vpop.permute.xlu0 %6340  ;;  %v6346_v32 = vpop.permute.xlu1 %6345 }
 0xc3e   : > { %v6343_v2 = vunpack.i.h.bf16 %v6341_v28  ;;  %v6342_v34 = vunpack.i.l.bf16 %v6341_v28  ;;  %v6348_v40 = vunpack.i.h.bf16 %v6346_v32  ;;  %v6347_v7 = vunpack.i.l.bf16 %v6346_v32 }
 0xc40   : > { %v5949_v38 = vpack.c.bf16 %v6343_v2, %v6342_v34  ;;  %v5955_v9 = vpack.c.bf16 %v6348_v40, %v6347_v7 }
 0xc41   : > { %v6351_v5 = vpop.permute.xlu1 %6350  ;;  %v6356_v20 = vpop.permute.xlu0 %6355 }
 0xc42   : > { %5951 = vmatprep.subr.msk.bf16.mxu0 %vm6952_vm12, %v5949_v38  ;;  %v6353_v41 = vunpack.i.h.bf16 %v6351_v5  ;;  %v6352_v12 = vunpack.i.l.bf16 %v6351_v5  ;;  %v6358_v24 = vunpack.i.h.bf16 %v6356_v20  ;;  %v6357_v35 = vunpack.i.l.bf16 %v6356_v20  ;;  %v2475_v5 = vld [vmem:[#allocation4 + $0x1b0] sm:$0xff] }
 0xc43   : > { %5954 = vmatpush3.bf16.xpose.msk.msra.mxu0 %vm6952_vm12, %v5949_v38 }
 0xc44   : > { %5957 = vmatprep.subr.msk.bf16.mxu0 %vm6952_vm12, %v5955_v9  ;;  %v5961_v8 = vpack.c.bf16 %v6353_v41, %v6352_v12  ;;  %v5967_v21 = vpack.c.bf16 %v6358_v24, %v6357_v35  ;;  %v2476_v41 = vld [vmem:[#allocation4 + $0x1c0] sm:$0xff] }
 0xc45   : > { %v6361_v48 = vpop.permute.xlu1 %6360  ;;  %v6366_v25 = vpop.permute.xlu0 %6365  ;;  %v6033_v12 = vpack.c.bf16 %v2476_v41, %v2475_v5  ;;  %v2708_v5 = vld [vmem:[#allocation4 + $0x258] sm:$0xff]  ;;  %v2710_v41 = vld [vmem:[#allocation4 + $0x268] sm:$0xff] }
 0xc46   : > { %v6363_v47 = vunpack.i.h.bf16 %v6361_v48  ;;  %v6362_v36 = vunpack.i.l.bf16 %v6361_v48  ;;  %v6368_v53 = vunpack.i.h.bf16 %v6366_v25  ;;  %v6367_v62 = vunpack.i.l.bf16 %v6366_v25 }
 0xc48   : > { %v5973_v23 = vpack.c.bf16 %v6363_v47, %v6362_v36  ;;  %v5979_v31 = vpack.c.bf16 %v6368_v53, %v6367_v62  ;;  %v2478_v47 = vld [vmem:[#allocation4 + $0x1e0] sm:$0xff] }
 0xc4b   : > { %5960 = vmatpush3.bf16.xpose.msk.msra.mxu0 %vm6952_vm12, %v5955_v9 }
 0xc4c   : > { %5963 = vmatprep.subr.msk.bf16.mxu0 %vm6952_vm12, %v5961_v8 }
 0xc53   : > { %5966 = vmatpush3.bf16.xpose.msk.msra.mxu0 %vm6952_vm12, %v5961_v8 }
 0xc54   : > { %5969 = vmatprep.subr.msk.bf16.mxu0 %vm6952_vm12, %v5967_v21 }
 0xc5b   : > { %5972 = vmatpush3.bf16.xpose.msk.msra.mxu0 %vm6952_vm12, %v5967_v21 }
 0xc5c   : > { %5975 = vmatprep.subr.msk.bf16.mxu0 %vm6952_vm12, %v5973_v23 }
 0xc63   : > { %5978 = vmatpush3.bf16.xpose.msk.msra.mxu0 %vm6952_vm12, %v5973_v23 }
 0xc64   : > { %5981 = vmatprep.subr.msk.bf16.mxu0 %vm6952_vm12, %v5979_v31 }
 0xc6b   : > { %5984 = vmatpush3.bf16.xpose.msk.msra.mxu0 %vm6952_vm12, %v5979_v31  ;;  %v2479_v31 = vld [vmem:[#allocation4 + $0x590] ss:$0 sm:$0xff] }
 0xc6c   : > { %6034 = vmatprep.subr.bf16.mxu0 %v6033_v12 }
 0xc72   : > { %5522 = vmatmul.mubr.msk.f32.vlgmr.msra.gmra.mrb[14].mxu0 %vm660_vm9, %v7150_v3 }
 0xc73   : > { %6036 = vmatpush3.bf16.msra.mxu0 %v6033_v12  ;;  %v6053_v12 = vpack.c.bf16 %v2710_v41, %v2708_v5 }
 0xd45   : > { %v5523_v54 = vpop.f32.mrb[14].mxu0 }
 0xd46   : > { %v2171_v60 = vadd.f32 %v5523_v54, %v6999_v17  ;;  %v2165_v55 = vpop.f32.mrb[15].mxu0 }
 0xd47   : > { %v2166_v52 = vadd.f32 %v2165_v55, %v6999_v17 }
 0xd48   : > { %v2177_v4 = vsel %vm1270_vm7, %v2171_v60, -inf }
 0xd49   : > { %2178 = vmax.xlane.f32.xlu0 %v2177_v4  ;;  %v2174_v11 = vsel %vm1266_vm3, %v2166_v52, -inf }
 0xd4a   : > { %2175 = vmax.xlane.f32.xlu1 %v2174_v11 }
 0xd5b   : > { %6375 = vrot.lane.b32.xlu1 %v6374_v26, %s6634_s27 }
 0xd5f   : > { %6370 = vrot.lane.b32.xlu0 %v6369_v18, %s6634_s27  ;;  %6380 = vrot.lane.b32.xlu1 %v6379_v16, %s6634_s27 }
 0xd63   : > { %6385 = vrot.lane.b32.xlu0 %v6384_v63, %s6634_s27  ;;  %6390 = vrot.lane.b32.xlu1 %v6389_v22, %s6634_s27 }
 0xd67   : > { %6395 = vrot.lane.b32.xlu0 %v6394_v30, %s6634_s27 }
 0xdd6   : > { %v2179_v17 = vpop.xlane.xlu0 %2178 }
 0xdd7   : > { %v2181_v3 = vsub.f32 %v2171_v60, %v2179_v17  ;;  %v2176_v59 = vpop.xlane.xlu1 %2175 }
 0xdd8   : > { %v2180_v56 = vsub.f32 %v2166_v52, %v2176_v59 }
 0xdd9   : > { %v2184_v10 = vmul.f32 1.442695, %v2181_v3 }
 0xdda   : > { %v2182_v27 = vmul.f32 1.442695, %v2180_v56  ;;  %v6371_v39 = vpop.permute.xlu0 %6370 }
 0xddb   : > { %v6373_v26 = vunpack.i.h.bf16 %v6371_v39  ;;  %v6372_v6 = vunpack.i.l.bf16 %v6371_v39  ;;  %v6376_v57 = vpop.permute.xlu1 %6375 }
 0xddc   : > { %6495 = vpow2.f32 %v2182_v27  ;;  %v6378_v18 = vunpack.i.h.bf16 %v6376_v57  ;;  %v6377_v19 = vunpack.i.l.bf16 %v6376_v57  ;;  %v2596_v57 = vld [vmem:[#allocation4 + $0x1f8] sm:$0xff] }
 0xddd   : > { %6497 = vpow2.f32 %v2184_v10  ;;  %v6009_v49 = vpack.c.bf16 %v6373_v26, %v6372_v6 }
 0xdde   : > { %v6013_v16 = vpack.c.bf16 %v6378_v18, %v6377_v19  ;;  %v6386_v22 = vpop.permute.xlu0 %6385  ;;  %v2598_v18 = vld [vmem:[#allocation4 + $0x208] sm:$0xff]  ;;  %v2595_v19 = vld [vmem:[#allocation4 + $0x1f0] sm:$0xff] }
 0xddf   : > { %6010 = vmatprep.subr.bf16.mxu1 %v6009_v49  ;;  %v6381_v37 = vpop.permute.xlu1 %6380  ;;  %v6388_v51 = vunpack.i.h.bf16 %v6386_v22  ;;  %v6387_v30 = vunpack.i.l.bf16 %v6386_v22  ;;  %v2599_v22 = vld [vmem:[#allocation4 + $0x210] sm:$0xff] }
 0xde0   : > { %v6383_v13 = vunpack.i.h.bf16 %v6381_v37  ;;  %v6382_v63 = vunpack.i.l.bf16 %v6381_v37  ;;  %v6041_v37 = vpack.c.bf16 %v2598_v18, %v2596_v57 }
 0xde1   : > { %v6021_v28 = vpack.c.bf16 %v6388_v51, %v6387_v30  ;;  %v2601_v51 = vld [vmem:[#allocation4 + $0x220] sm:$0xff] }
 0xde2   : > { %v6017_v29 = vpack.c.bf16 %v6383_v13, %v6382_v63  ;;  %v6396_v34 = vpop.permute.xlu0 %6395  ;;  %v6047_v30 = vpack.c.bf16 %v2601_v51, %v2599_v22 }
 0xde3   : > { %v6391_v46 = vpop.permute.xlu1 %6390  ;;  %v6398_v40 = vunpack.i.h.bf16 %v6396_v34  ;;  %v6397_v7 = vunpack.i.l.bf16 %v6396_v34  ;;  %v2706_v34 = vld [vmem:[#allocation4 + $0x248] sm:$0xff] }
 0xde4   : > { %v6393_v32 = vunpack.i.h.bf16 %v6391_v46  ;;  %v6392_v2 = vunpack.i.l.bf16 %v6391_v46  ;;  %v7290_v46 = vld [vmem:[#allocation2 + $0xc0] sm:$0xff] }
 0xde5   : > { %v6029_v9 = vpack.c.bf16 %v6398_v40, %v6397_v7  ;;  %v2703_v40 = vld [vmem:[#allocation4 + $0x230] sm:$0xff]  ;;  %v2705_v7 = vld [vmem:[#allocation4 + $0x240] sm:$0xff] }
 0xde6   : > { %v6496_v45 = vpop.eup %6495  ;;  %v6025_v38 = vpack.c.bf16 %v6393_v32, %v6392_v2  ;;  %v7298_v32 = vld [vmem:[#allocation2 + $0xd8] sm:$0xff]  ;;  %v2704_v2 = vld [vmem:[#allocation4 + $0x238] sm:$0xff] }
 0xde7   : > { %v6498_v44 = vpop.eup %6497  ;;  %5548 = vmatprep.mubr.msk.f32.mxu1 %vm1266_vm3, %v6496_v45 }
 0xde8   : > { %5549 = vmatmul.mubr.msk.f32.vlgmr.msra.gmra.mrb[16].mxu1 %vm1266_vm3, %v6498_v44 }
 0xde9   : > { %6012 = vmatpush3.bf16.msra.mxu1 %v6009_v49  ;;  %5575 = vmatprep.mubr.msk.f32.mxu1 %vm1266_vm3, %v6496_v45  ;;  %v2597_v45 = vld [vmem:[#allocation4 + $0x200] sm:$0xff] }
 0xdea   : > { %6014 = vmatprep.subr.bf16.mxu1 %v6013_v16  ;;  %v6043_v13 = vpack.c.bf16 %v2597_v45, %v2595_v19 }
 0xded   : > { %6016 = vmatpush3.bf16.msra.mxu1 %v6013_v16  ;;  %v2602_v16 = vld [vmem:[#allocation4 + $0x228] sm:$0xff] }
 0xdee   : > { %6018 = vmatprep.subr.bf16.mxu1 %v6017_v29 }
 0xdf1   : > { %6020 = vmatpush3.bf16.msra.mxu1 %v6017_v29  ;;  %v7288_v29 = vld [vmem:[#allocation2 + $0xc8] sm:$0xff] }
 0xdf2   : > { %6022 = vmatprep.subr.bf16.mxu1 %v6021_v28 }
 0xdf5   : > { %6024 = vmatpush3.bf16.msra.mxu1 %v6021_v28  ;;  %v7296_v28 = vld [vmem:[#allocation2 + $0xd0] sm:$0xff] }
 0xdf6   : > { %6026 = vmatprep.subr.bf16.mxu1 %v6025_v38 }
 0xdf9   : > { %6028 = vmatpush3.bf16.msra.mxu1 %v6025_v38  ;;  %v6049_v38 = vpack.c.bf16 %v2706_v34, %v2704_v2 }
 0xdfa   : > { %6030 = vmatprep.subr.bf16.mxu1 %v6029_v9 }
 0xdfd   : > { %6032 = vmatpush3.bf16.msra.mxu1 %v6029_v9  ;;  %v6051_v9 = vpack.c.bf16 %v2705_v7, %v2703_v40 }
 0xdfe   : > { %5578 = vmatprep.subr.mxu1 %v7102_v33 }
 0xe00   : > { %5576 = vmatmul.mubr.msk.f32.vlgmr.msra.gmra.mrb[18].mxu1 %vm1266_vm3, %v6498_v44  ;;  %v2600_v44 = vld [vmem:[#allocation4 + $0x218] sm:$0xff] }
 0xe01   : > { %5579 = vmatpush3.msra.mxu1 %v7102_v33  ;;  %v2477_v33 = vld [vmem:[#allocation4 + $0x1d0] sm:$0xff]  ;;  %v6045_v63 = vpack.c.bf16 %v2602_v16, %v2600_v44 }
 0xe02   : > { %v6037_v36 = vpack.c.bf16 %v2478_v47, %v2477_v33  ;;  %6042 = vmatprep.subr.bf16.mxu1 %v6041_v37 }
 0xe04   : > { %6038 = vmatprep.subr.bf16.mxu0 %v6037_v36 }
 0xe05   : > { %6040 = vmatpush3.bf16.msra.mxu0 %v6037_v36 }
 0xe06   : > { %6050 = vmatprep.subr.bf16.mxu0 %v6049_v38 }
 0xebb   : > { %v5550_v8 = vpop.f32.mrb[16].mxu1 }
 0xebc   : > { %v2258_v20 = vpop.f32.mrb[17].mxu1 }
 0xebd   : > { %6499 = vrcp.f32 %v2258_v20  ;;  %v7306_v20 = vld [vmem:[#allocation2 + $0xe8] sm:$0xff] }
 0xebe   : > { %6501 = vrcp.f32 %v5550_v8  ;;  %v7304_v8 = vld [vmem:[#allocation2 + $0xe0] sm:$0xff] }
 0xec7   : > { %v6500_v24 = vpop.eup %6499 }
 0xec8   : > { %v6502_v35 = vpop.eup %6501  ;;  %5580 = vmatprep.mubr.msk.f32.mxu1 %vm655_vm8, %v6500_v24  ;;  %v7312_v24 = vld [vmem:[#allocation2 + $0xf0] sm:$0xff] }
 0xec9   : > { %5581 = vmatmul.mubr.msk.f32.vlgmr.msra.gmra.mrb[20].mxu1 %vm655_vm8, %v6502_v35  ;;  %v7314_v35 = vld [vmem:[#allocation2 + $0xf8] sm:$0xff] }
 0xeca   : > { %2686 = vmatprep.mubr.f32.mxu1 %v6620_v0  ;;  %6044 = vmatpush1.bf16.msra.mxu1 %v6043_v13 }
 0xecb   : > { %6046 = vmatprep.subr.bf16.mxu1 %v6045_v63 }
 0xece   : > { %6048 = vmatpush1.bf16.msra.mxu1 %v6047_v30 }
 0xecf   : > { %6057 = vmatprep.subr.bf16.mxu1 %v6622_v1 }
 0xed3   : > { %v5577_v21 = vpop.f32.mrb[18].mxu1 }
 0xed4   : > { %v2381_v48 = vpop.f32.mrb[19].mxu1 }
 0xf9c   : > { %v5582_v23 = vpop.f32.mrb[20].mxu1 }
 0xf9d   : > { %v2474_v25 = vmul.f32 %v5582_v23, %v5577_v21  ;;  %v2464_v53 = vpop.f32.mrb[21].mxu1 }
 0xf9e   : > { %v2473_v62 = vmul.f32 %v2464_v53, %v2381_v48 }
 0xfa0   : > { %5591 = vmatprep.mubr.msk.f32.mxu0 %vm660_vm9, %v2473_v62  ;;  %v2589_v62 = vld [vmem:[#allocation4 + $0x591] ss:$0 sm:$0xff] }
 0xfa1   : > { %5592 = vmatmul.mubr.msk.f32.vlgmr.msra.gmra.mrb[16].mxu0 %vm660_vm9, %v2474_v25 }
 0xfa2   : > { %6052 = vmatpush1.bf16.xpose.msra.mxu0 %v6051_v9  ;;  %v2866_v9 = vld [vmem:[#allocation4 + $0x597] ss:$0 sm:$0xff] }
 0xfa3   : > { %6054 = vmatprep.subr.bf16.mxu0 %v6053_v12 }
0x1074   : > { %v5593_v54 = vpop.f32.mrb[16].mxu0 }
0x1075   : > { %v2558_v60 = vadd.f32 %v5593_v54, %v2479_v31  ;;  %v2552_v55 = vpop.f32.mrb[17].mxu0  ;;  %v2862_v54 = vld [vmem:[#allocation4 + $0x270] sm:$0xff] }
0x1076   : > { %v2553_v52 = vadd.f32 %v2552_v55, %v2479_v31 }
0x1077   : > { %v2562_v4 = vadd.f32 %v2558_v60, %v7146_v58  ;;  %v2863_v60 = vld [vmem:[#allocation4 + $0x280] sm:$0xff] }
0x1078   : > { %v2561_v11 = vadd.f32 %v2553_v52, %v7142_v50  ;;  %v2592_v52 = vld [vmem:[#allocation4 + $0x592] ss:$0 sm:$0xff] }
0x1079   : > { %v2566_v17 = vsel %vm1660_vm11, %v2562_v4, 0.0 }
0x107a   : > { %2567 = vadd.xlane.f32.xlu0 %v2566_v17  ;;  %v2563_v3 = vsel %vm660_vm9, %v2561_v11, 0.0 }
0x107b   : > { %2564 = vadd.xlane.f32.xlu1 %v2563_v3 }
0x1107   : > { %v2568_v59 = vpop.xlane.xlu0 %2567 }
0x1108   : > { %v2570_v56 = vmul.f32 0.03125, %v2568_v59  ;;  %v2565_v10 = vpop.xlane.xlu1 %2564  ;;  %v2864_v59 = vld [vmem:[#allocation4 + $0x290] sm:$0xff] }
0x1109   : > { %v2569_v27 = vmul.f32 0.03125, %v2565_v10 }
0x110a   : > { %v7277_v39 = vsub.f32 %v2562_v4, %v2570_v56  ;;  %v2865_v56 = vld [vmem:[#allocation4 + $0x2a0] sm:$0xff] }
0x110b   : > { %v7279_v26 = vsub.f32 %v2561_v11, %v2569_v27  ;;  %v6058_v11 = vpack.c.bf16 %v2863_v60, %v2862_v54  ;;  %v6061_v10 = vpack.c.bf16 %v2865_v56, %v2864_v59 }
0x110c   : > { %v2574_v6 = vmul.f32 %v7277_v39, %v7277_v39 }
0x110d   : > { %v2573_v50 = vmul.f32 %v7279_v26, %v7279_v26 }
0x110e   : > { %v2578_v58 = vsel %vm1660_vm11, %v2574_v6, 0.0  ;;  %v2707_v6 = vld [vmem:[#allocation4 + $0x250] sm:$0xff] }
0x110f   : > { %2579 = vadd.xlane.f32.xlu1 %v2578_v58  ;;  %v2575_v49 = vsel %vm660_vm9, %v2573_v50, 0.0  ;;  %v2709_v50 = vld [vmem:[#allocation4 + $0x260] sm:$0xff] }
0x1110   : > { %2576 = vadd.xlane.f32.xlu0 %v2575_v49  ;;  %v6055_v58 = vpack.c.bf16 %v2709_v50, %v2707_v6 }
0x1112   : > { %6056 = vmatpush1.bf16.xpose.msra.mxu0 %v6055_v58 }
0x1113   : > { %6079 = vmatprep.subr.bf16.mxu0 %v6622_v1 }
0x1120   : > { %2950 = vrot.lane.b32.xlu1 %v7288_v29, %s6624_s13 }
0x1124   : > { %2952 = vrot.lane.b32.xlu1 %v7296_v28, %s6624_s13 }
0x1126   : > { %2948 = vrot.lane.b32.xlu0 %v7290_v46, %s6624_s13 }
0x1128   : > { %2956 = vrot.lane.b32.xlu1 %v7304_v8, %s6624_s13 }
0x112a   : > { %2954 = vrot.lane.b32.xlu0 %v7298_v32, %s6624_s13 }
0x112c   : > { %2960 = vrot.lane.b32.xlu1 %v7312_v24, %s6624_s13 }
0x112e   : > { %2958 = vrot.lane.b32.xlu0 %v7306_v20, %s6624_s13 }
0x1132   : > { %2962 = vrot.lane.b32.xlu0 %v7314_v35, %s6624_s13 }
0x119c   : > { %v2580_v21 = vpop.xlane.xlu1 %2579 }
0x119d   : > { %v2582_v48 = vmul.f32 0.03125, %v2580_v21  ;;  %v2577_v33 = vpop.xlane.xlu0 %2576 }
0x119e   : > { %v2581_v47 = vmul.f32 0.03125, %v2577_v33 }
0x119f   : > { %v2584_v36 = vadd.f32 1e-05, %v2582_v48 }
0x11a0   : > { %v2583_v23 = vadd.f32 1e-05, %v2581_v47  ;;  %v7345_v57 = vpop.permute.xlu1 %2950 }
0x11a1   : > { %6503 = vrsqrt.f32 %v2584_v36  ;;  %v7343_v49 = vpop.permute.xlu0 %2948 }
0x11a2   : > { %6505 = vrsqrt.f32 %v2583_v23 }
0x11a4   : > { %v7351_v45 = vpop.permute.xlu1 %2952 }
0x11a5   : > { %v7349_v37 = vpop.permute.xlu0 %2954 }
0x11a8   : > { %v7355_v7 = vpop.permute.xlu1 %2956 }
0x11a9   : > { %v7353_v30 = vpop.permute.xlu0 %2958 }
0x11ab   : > { %v6504_v25 = vpop.eup %6503 }
0x11ac   : > { %v6506_v53 = vpop.eup %6505  ;;  %v2588_v55 = vmul.f32 %v6504_v25, %v7277_v39  ;;  %v843_v39 = vld [vmem:[#allocation4 + $0x571] ss:$0 sm:$0xff]  ;;  %v7361_v47 = vpop.permute.xlu1 %2960 }
0x11ad   : > { %v2587_v31 = vmul.f32 %v6506_v53, %v7279_v26  ;;  %v7335_v26 = vadd.f32 %v6948_v42, %v843_v39  ;;  %v2604_v42 = vld [vmem:[#allocation4 + $0x595] ss:$8 sm:$0x3]  ;;  %v7359_v33 = vpop.permute.xlu0 %2962 }
0x11ae   : > { %v2591_v3 = vmul.f32 %v2589_v62, %v2588_v55  ;;  %v2609_v18 = vrot.slane %v2604_v42, %v6996_v15  ;;  %v2613_v19 = vrot.slane %v2604_v42, %v7123_v14 }
0x11af   : > { %v2590_v4 = vmul.f32 %v2589_v62, %v2587_v31 }
0x11b0   : > { %v7327_v27 = vadd.f32 %v2592_v52, %v2591_v3 }
0x11b1   : > { %v7322_v17 = vadd.f32 %v2592_v52, %v2590_v4 }
0x11b3   : > { %5070 = vmatmul.mubr.msk.f32.vlgmr.msra.gmra.mrb[22].mxu1 %vm660_vm9, %v7322_v17 }
0x11b4   : > { %6059 = vmatpush3.bf16.msra.mxu1 %v6058_v11  ;;  %2692 = vmatprep.mubr.f32.mxu1 %v6620_v0 }
0x11b5   : > { %6060 = vmatprep.subr.bf16.mxu1 %v6622_v1 }
0x11b7   : > { %5071 = vmatmul.mubr.msk.f32.gmra.mrb[24].mxu1 %vm660_vm9, %v7327_v27 }
0x11b8   : > { %6062 = vmatpush3.bf16.msra.mxu1 %v6061_v10  ;;  %5602 = vmatprep.mubr.msk.f32.mxu1 %vm6621_vm0, %v6620_v0 }
0x11b9   : > { %6063 = vmatprep.subr.bf16.mxu1 %v6622_v1 }
0x11bb   : > { %5603 = vmatmul.mubr.msk.f32.vlgmr.msra.gmra.mrb[26].mxu1 %vm660_vm9, %v7335_v26 }
0x11bc   : > { %5621 = vmatprep.mubr.msk.f32.mxu1 %vm6621_vm0, %v6620_v0 }
0x1286   : > { %v2688_v44 = vpop.f32.mrb[22].mxu1 }
0x1287   : > { %v2689_v16 = vadd.f32 %v2688_v44, %v2609_v18  ;;  %v2690_v13 = vpop.f32.mrb[23].mxu1 }
0x1288   : > { %v2691_v63 = vadd.f32 %v2690_v13, %v2613_v19 }
0x1289   : > { %v2699_v2 = vmax.f32 %v2689_v16, 0.0 }
0x128a   : > { %v2700_v22 = vmax.f32 %v2691_v63, 0.0  ;;  %v2694_v51 = vpop.f32.mrb[24].mxu1 }
0x128b   : > { %v2695_v34 = vadd.f32 %v2694_v51, %v2609_v18  ;;  %v2696_v40 = vpop.f32.mrb[25].mxu1  ;;  %v7409_v51 = vld [vmem:[#allocation2 + $0x140] sm:$0xff] }
0x128c   : > { %v2697_v38 = vadd.f32 %v2696_v40, %v2613_v19  ;;  %2776 = vmatprep.mubr.f32.mxu0 %v2700_v22 }
0x128d   : > { %2777 = vmatmul.mubr.f32.vlgmr.msra.gmra.mrb[18].mxu0 %v2699_v2  ;;  %v2701_v12 = vmax.f32 %v2695_v34, 0.0  ;;  %v2711_v2 = vld [vmem:[#allocation4 + $0x596] ss:$0 sm:$0xff] }
0x128e   : > { %v2702_v5 = vmax.f32 %v2697_v38, 0.0  ;;  %v2936_v41 = vpop.f32.mrb[26].mxu1 }
0x128f   : > { %v7357_v21 = vadd.f32 %v2936_v41, %v2866_v9  ;;  %v5604_v48 = vpop.f32.mrb[27].mxu1 }
0x1290   : > { %2781 = vmatprep.mubr.f32.mxu0 %v2702_v5 }
0x1291   : > { %2782 = vmatmul.mubr.f32.gmra.mrb[20].mxu0 %v2701_v12  ;;  %v2972_v36 = vmul.f32 %v7343_v49, %v7357_v21  ;;  %v2973_v23 = vmul.f32 %v7345_v57, %v7357_v21  ;;  %v2974_v25 = vmul.f32 %v7351_v45, %v7357_v21  ;;  %v2975_v53 = vmul.f32 %v7349_v37, %v7357_v21 }
0x1292   : > { %5640 = vmatprep.mubr.msk.f32.mxu0 %vm6621_vm0, %v6620_v0  ;;  %v2976_v31 = vmul.f32 %v7355_v7, %v7357_v21  ;;  %v2977_v54 = vmul.f32 %v7353_v30, %v7357_v21  ;;  %v2979_v60 = vmul.f32 %v7359_v33, %v7357_v21  ;;  %v2978_v55 = vmul.f32 %v7361_v47, %v7357_v21 }
0x1293   : > { %v6399_v62 = vpack.i.bf16 %v2973_v23, %v2972_v36  ;;  %v6404_v52 = vpack.i.bf16 %v2975_v53, %v2974_v25 }
0x1294   : > { %v6409_v4 = vpack.i.bf16 %v2977_v54, %v2976_v31  ;;  %v6414_v11 = vpack.i.bf16 %v2979_v60, %v2978_v55 }
0x1295   : > { %6400 = vrot.lane.b32.xlu1 %v6399_v62, %s6626_s14  ;;  %6405 = vrot.lane.b32.xlu0 %v6404_v52, %s6626_s14 }
0x1299   : > { %6410 = vrot.lane.b32.xlu1 %v6409_v4, %s6626_s14  ;;  %6415 = vrot.lane.b32.xlu0 %v6414_v11, %s6626_s14 }
0x129d   : > { %634 = vrot.lane.b32.xlu1 %v6854_v43, %s6635_s28  ;;  %637 = vrot.lane.b32.xlu0 %v6854_v43, %s6636_s29 }
0x12a1   : > { %640 = vrot.lane.b32.xlu1 %v6854_v43, %s6628_s16  ;;  %643 = vrot.lane.b32.xlu0 %v6854_v43, %s6624_s13 }
0x12a5   : > { %646 = vrot.lane.b32.xlu1 %v6854_v43, %s6637_s24  ;;  %649 = vrot.lane.b32.xlu0 %v6854_v43, %s6630_s19 }
0x12a9   : > { %652 = vrot.lane.b32.xlu1 %v6854_v43, %s6638_s25 }
0x1307   : > { %v6401_v3 = vpop.permute.xlu1 %6400  ;;  %v6406_v39 = vpop.permute.xlu0 %6405 }
0x1308   : > { %v6403_v59 = vunpack.i.h.bf16 %v6401_v3  ;;  %v6402_v56 = vunpack.i.l.bf16 %v6401_v3  ;;  %v6408_v6 = vunpack.i.h.bf16 %v6406_v39  ;;  %v6407_v50 = vunpack.i.l.bf16 %v6406_v39 }
0x130a   : > { %v6064_v10 = vpack.c.bf16 %v6403_v59, %v6402_v56  ;;  %v6068_v58 = vpack.c.bf16 %v6408_v6, %v6407_v50 }
0x130b   : > { %v6411_v42 = vpop.permute.xlu1 %6410  ;;  %v6416_v16 = vpop.permute.xlu0 %6415 }
0x130c   : > { %6066 = vmatpush3.bf16.xpose.msk.msra.mxu1 %vm6952_vm12, %v6064_v10  ;;  %v6413_v18 = vunpack.i.h.bf16 %v6411_v42  ;;  %v6412_v19 = vunpack.i.l.bf16 %v6411_v42  ;;  %v6418_v13 = vunpack.i.h.bf16 %v6416_v16  ;;  %v6417_v63 = vunpack.i.l.bf16 %v6416_v16  ;;  %v327_v42 = vld [vmem:[#allocation2 + $0x100] sm:$0xff]  ;;  %v330_v16 = vld [vmem:[#allocation2 + $0x118] sm:$0xff] }
0x130d   : > { %6067 = vmatprep.subr.bf16.mxu1 %v6622_v1 }
0x130e   : > { %v6072_v44 = vpack.c.bf16 %v6413_v18, %v6412_v19  ;;  %v6076_v22 = vpack.c.bf16 %v6418_v13, %v6417_v63  ;;  %v328_v18 = vld [vmem:[#allocation2 + $0x108] sm:$0xff]  ;;  %v331_v63 = vld [vmem:[#allocation2 + $0x120] sm:$0xff] }
0x130f   : > { %v635_v36 = vpop.permute.xlu1 %634  ;;  %v638_v25 = vpop.permute.xlu0 %637  ;;  %v7442_v19 = vpack.c.bf16 %v328_v18, %v327_v42  ;;  %v2815_v42 = vld [vmem:[#allocation4 + $0x593] ss:$0 sm:$0xff] }
0x1310   : > { %v656_v53 = vsel %vm655_vm8, %v6854_v43, %v635_v36 }
0x1311   : > { %6081 = vmatpush3.bf16.msra.mxu0 %v7442_v19 }
0x1312   : > { %6082 = vmatprep.subr.bf16.mxu0 %v6622_v1 }
0x1313   : > { %v644_v31 = vpop.permute.xlu0 %643 }
0x1314   : > { %6070 = vmatpush3.bf16.xpose.msk.msra.mxu1 %vm6952_vm12, %v6068_v58 }
0x1315   : > { %6071 = vmatprep.subr.bf16.mxu1 %v6622_v1 }
0x1317   : > { %v650_v55 = vpop.permute.xlu0 %649 }
0x131c   : > { %6074 = vmatpush3.bf16.xpose.msk.msra.mxu1 %vm6952_vm12, %v6072_v44  ;;  %v329_v44 = vld [vmem:[#allocation2 + $0x110] sm:$0xff] }
0x131d   : > { %6075 = vmatprep.subr.bf16.mxu1 %v6622_v1  ;;  %v7446_v13 = vpack.c.bf16 %v330_v16, %v329_v44  ;;  %v2818_v44 = vld [vmem:[#allocation4 + $0x594] ss:$0 sm:$0xff] }
0x131f   : > { %6084 = vmatpush3.bf16.msra.mxu0 %v7446_v13 }
0x1320   : > { %6085 = vmatprep.subr.bf16.mxu0 %v6622_v1 }
0x1324   : > { %6078 = vmatpush3.bf16.xpose.msk.msra.mxu1 %vm6952_vm12, %v6076_v22 }
0x1325   : > { %5662 = vmatprep.subr.mxu1 %v6620_v0 }
0x132b   : > { %5622 = vmatmul.mubr.msk.f32.vlgmr.msra.gmra.mrb[28].mxu1 %vm660_vm9, %v7357_v21 }
0x132c   : > { %5663 = vmatpush3.msra.mxu1 %v7409_v51  ;;  %5664 = vmatprep.mubr.msk.f32.mxu1 %vm6621_vm0, %v6620_v0 }
0x132d   : > { %6103 = vmatprep.subr.bf16.mxu1 %v6622_v1 }
0x1360   : > { %v2778_v34 = vpop.f32.mrb[18].mxu0 }
0x1361   : > { %v2779_v40 = vadd.f32 %v2778_v34, %v2711_v2  ;;  %v2780_v38 = vpop.f32.mrb[19].mxu0  ;;  %v334_v34 = vld [vmem:[#allocation2 + $0x138] sm:$0xff] }
0x1363   : > { %v2787_v9 = vadd.f32 %v2779_v40, %v7322_v17  ;;  %v641_v17 = vpop.permute.xlu1 %640 }
0x1364   : > { %v2783_v5 = vpop.f32.mrb[20].mxu0 }
0x1365   : > { %v2784_v41 = vadd.f32 %v2783_v5, %v2711_v2  ;;  %v2785_v12 = vpop.f32.mrb[21].mxu0  ;;  %v2789_v48 = vsel %vm660_vm9, %v2787_v9, 0.0  ;;  %v333_v2 = vld [vmem:[#allocation2 + $0x130] sm:$0xff] }
0x1366   : > { %2790 = vadd.xlane.f32.xlu1 %v2789_v48  ;;  %v7456_v40 = vpack.c.bf16 %v334_v34, %v333_v2 }
0x1367   : > { %v647_v23 = vpop.permute.xlu1 %646  ;;  %v2788_v50 = vadd.f32 %v2784_v41, %v7327_v27  ;;  %v332_v27 = vld [vmem:[#allocation2 + $0x128] sm:$0xff] }
0x1368   : > { %v7450_v22 = vpack.c.bf16 %v332_v27, %v331_v63 }
0x1369   : > { %v2792_v58 = vsel %vm1660_vm11, %v2788_v50, 0.0 }
0x136a   : > { %6087 = vmatpush3.bf16.msra.mxu0 %v7450_v22 }
0x136b   : > { %v653_v62 = vpop.permute.xlu1 %652  ;;  %6088 = vmatprep.subr.bf16.mxu0 %v6622_v1 }
0x136e   : > { %6090 = vmatpush3.bf16.msra.mxu0 %v7456_v40 }
0x136f   : > { %6091 = vmatprep.subr.bf16.mxu0 %v6622_v1 }
0x1377   : > { %2982 = vrot.lane.b32.xlu1 %v7288_v29, %s6634_s27  ;;  %v658_v29 = vsel %vm657_vm1, %v656_v53, %v638_v25 }
0x1378   : > { %v659_v54 = vsel %vm621_vm14, %v658_v29, %v641_v17  ;;  %vm3129_vm14 = vcmask 523264  }
0x137b   : > { %2984 = vrot.lane.b32.xlu1 %v7296_v28, %s6634_s27 }
0x137f   : > { %2988 = vrot.lane.b32.xlu1 %v7304_v8, %s6634_s27  ;;  %v661_v8 = vsel %vm660_vm9, %v659_v54, %v644_v31 }
0x1383   : > { %2992 = vrot.lane.b32.xlu1 %v7312_v24, %s6634_s27  ;;  %v663_v24 = vsel %vm662_vm13, %v661_v8, %v647_v23 }
0x1384   : > { %v664_v43 = vsel %vm625_vm2, %v663_v24, %v650_v55 }
0x1385   : > { %v666_v11 = vsel %vm665_vm15, %v664_v43, %v653_v62 }
0x1386   : > { %v7436_v59 = vrot.slane %v666_v11, %v6996_v15 }
0x13f3   : > { %v2791_v28 = vpop.xlane.xlu1 %2790 }
0x13f4   : > { %v2795_v60 = vmul.f32 0.03125, %v2791_v28 }
0x13f6   : > { %v7429_v52 = vsub.f32 %v2787_v9, %v2795_v60 }
0x13f8   : > { %v2799_v4 = vmul.f32 %v7429_v52, %v7429_v52 }
0x13fa   : > { %v2801_v3 = vsel %vm660_vm9, %v2799_v4, 0.0 }
0x13fb   : > { %2802 = vadd.xlane.f32.xlu1 %v2801_v3 }
0x13fe   : > { %v3125_v56 = vpop.f32.mrb[28].mxu1 }
0x13ff   : > { %v3126_v10 = vadd.f32 %v3125_v56, %v7436_v59  ;;  %v5623_v39 = vpop.f32.mrb[29].mxu1 }
0x1401   : > { %v3130_v6 = vsel %vm3129_vm14, %v3126_v10, -inf }
0x1402   : > { %3131 = vmax.xlane.f32.xlu0 %v3130_v6 }
0x1406   : > { %2793 = vadd.xlane.f32.xlu0 %v2792_v58 }
0x141c   : > { %2980 = vrot.lane.b32.xlu0 %v7290_v46, %s6634_s27  ;;  %v7466_v46 = vpop.permute.xlu1 %2982 }
0x141d   : > { %v3005_v3 = vmul.f32 %v7466_v46, %v7357_v21 }
0x1420   : > { %2986 = vrot.lane.b32.xlu0 %v7298_v32, %s6634_s27  ;;  %v7468_v41 = vpop.permute.xlu1 %2984 }
0x1421   : > { %v3006_v25 = vmul.f32 %v7468_v41, %v7357_v21 }
0x1424   : > { %2990 = vrot.lane.b32.xlu0 %v7306_v20, %s6634_s27  ;;  %v7476_v17 = vpop.permute.xlu1 %2988 }
0x1425   : > { %v3008_v28 = vmul.f32 %v7476_v17, %v7357_v21 }
0x1428   : > { %2994 = vrot.lane.b32.xlu0 %v7314_v35, %s6634_s27  ;;  %v7487_v29 = vpop.permute.xlu1 %2992 }
0x1429   : > { %v3010_v39 = vmul.f32 %v7487_v29, %v7357_v21 }
0x1488   : > { %v2803_v55 = vpop.xlane.xlu1 %2802 }
0x1489   : > { %v2807_v24 = vmul.f32 0.03125, %v2803_v55 }
0x148b   : > { %v2809_v4 = vadd.f32 1e-05, %v2807_v24 }
0x148f   : > { %v3132_v38 = vpop.xlane.xlu0 %3131 }
0x1490   : > { %v3133_v9 = vsub.f32 %v3126_v10, %v3132_v38 }
0x1492   : > { %v3134_v5 = vmul.f32 1.442695, %v3133_v9 }
0x1493   : > { %v2794_v12 = vpop.xlane.xlu0 %2793 }
0x1494   : > { %6507 = vpow2.f32 %v3134_v5  ;;  %v2796_v32 = vmul.f32 0.03125, %v2794_v12 }
0x1495   : > { %6509 = vrsqrt.f32 %v2809_v4 }
0x1496   : > { %v7470_v48 = vsub.f32 %v2788_v50, %v2796_v32 }
0x1497   : > { %v7472_v36 = vpop.permute.xlu0 %2980 }
0x1498   : > { %v2800_v20 = vmul.f32 %v7470_v48, %v7470_v48  ;;  %v3004_v43 = vmul.f32 %v7472_v36, %v7357_v21 }
0x149a   : > { %v2804_v35 = vsel %vm1660_vm11, %v2800_v20, 0.0  ;;  %v6419_v56 = vpack.i.bf16 %v3005_v3, %v3004_v43 }
0x149b   : > { %2805 = vadd.xlane.f32.xlu0 %v2804_v35  ;;  %v7479_v23 = vpop.permute.xlu0 %2986 }
0x149c   : > { %v3007_v53 = vmul.f32 %v7479_v23, %v7357_v21 }
0x149e   : > { %v7485_v62 = vpop.eup %6507  ;;  %v6424_v31 = vpack.i.bf16 %v3007_v53, %v3006_v25 }
0x149f   : > { %5641 = vmatmul.mubr.msk.f32.vlgmr.msra.gmra.mrb[22].mxu0 %vm3129_vm14, %v7485_v62  ;;  %v7491_v54 = vpop.permute.xlu0 %2990  ;;  %v6510_v50 = vpop.eup %6509 }
0x14a0   : > { %v3009_v60 = vmul.f32 %v7491_v54, %v7357_v21  ;;  %6425 = vrot.lane.b32.xlu1 %v6424_v31, %s6634_s27  ;;  %5659 = vmatprep.mubr.msk.f32.mxu0 %vm6621_vm0, %v6620_v0  ;;  %v2813_v58 = vmul.f32 %v6510_v50, %v7429_v52 }
0x14a2   : > { %v6429_v8 = vpack.i.bf16 %v3009_v60, %v3008_v28  ;;  %v2816_v18 = vmul.f32 %v2815_v42, %v2813_v58 }
0x14a3   : > { %v7503_v11 = vpop.permute.xlu0 %2994 }
0x14a4   : > { %6430 = vrot.lane.b32.xlu1 %v6429_v8, %s6634_s27  ;;  %v3011_v10 = vmul.f32 %v7503_v11, %v7357_v21  ;;  %v2819_v16 = vadd.f32 %v2818_v44, %v2816_v18 }
0x14a6   : > { %v6434_v6 = vpack.i.bf16 %v3011_v10, %v3010_v39  ;;  %v2821_v63 = vsel %vm660_vm9, %v2819_v16, 0.0 }
0x14b1   : > { %6420 = vrot.lane.b32.xlu0 %v6419_v56, %s6634_s27 }
0x14b5   : > { %6435 = vrot.lane.b32.xlu0 %v6434_v6, %s6634_s27 }
0x14c8   : > { %2822 = vadd.xlane.f32.xlu1 %v2821_v63 }
0x1512   : > { %v6426_v34 = vpop.permute.xlu1 %6425 }
0x1513   : > { %v6428_v12 = vunpack.i.h.bf16 %v6426_v34  ;;  %v6427_v32 = vunpack.i.l.bf16 %v6426_v34 }
0x1515   : > { %v6095_v52 = vpack.c.bf16 %v6428_v12, %v6427_v32  ;;  %v3482_v12 = vld [vmem:[#allocation4 + $0x2f0] sm:$0xff]  ;;  %v3483_v32 = vld [vmem:[#allocation4 + $0x300] sm:$0xff] }
0x1516   : > { %v6431_v35 = vpop.permute.xlu1 %6430 }
0x1517   : > { %v6433_v25 = vunpack.i.h.bf16 %v6431_v35  ;;  %v6432_v53 = vunpack.i.l.bf16 %v6431_v35  ;;  %v6110_v35 = vpack.c.bf16 %v3483_v32, %v3482_v12 }
0x1519   : > { %v6098_v60 = vpack.c.bf16 %v6433_v25, %v6432_v53 }
0x1528   : > { %v2806_v27 = vpop.xlane.xlu0 %2805 }
0x1529   : > { %v2808_v2 = vmul.f32 0.03125, %v2806_v27 }
0x152b   : > { %v2810_v38 = vadd.f32 1e-05, %v2808_v2 }
0x152c   : > { %v6421_v21 = vpop.permute.xlu0 %6420 }
0x152d   : > { %6511 = vrsqrt.f32 %v2810_v38  ;;  %v6423_v9 = vunpack.i.h.bf16 %v6421_v21  ;;  %v6422_v5 = vunpack.i.l.bf16 %v6421_v21  ;;  %v3388_v38 = vld [vmem:[#allocation4 + $0x2d0] sm:$0xff]  ;;  %v3389_v21 = vld [vmem:[#allocation4 + $0x2e0] sm:$0xff] }
0x152f   : > { %v6092_v20 = vpack.c.bf16 %v6423_v9, %v6422_v5  ;;  %v6107_v5 = vpack.c.bf16 %v3389_v21, %v3388_v38 }
0x1530   : > { %v6436_v31 = vpop.permute.xlu0 %6435 }
0x1531   : > { %6093 = vmatpush3.bf16.msra.mxu0 %v6092_v20  ;;  %v6438_v8 = vunpack.i.h.bf16 %v6436_v31  ;;  %v6437_v55 = vunpack.i.l.bf16 %v6436_v31  ;;  %v3484_v20 = vld [vmem:[#allocation4 + $0x310] sm:$0xff] }
0x1532   : > { %6094 = vmatprep.subr.bf16.mxu0 %v6622_v1 }
0x1533   : > { %v6101_v43 = vpack.c.bf16 %v6438_v8, %v6437_v55 }
0x1535   : > { %6096 = vmatpush3.bf16.msra.mxu0 %v6095_v52  ;;  %v3485_v52 = vld [vmem:[#allocation4 + $0x320] sm:$0xff] }
0x1536   : > { %6097 = vmatprep.subr.bf16.mxu0 %v6622_v1  ;;  %v6113_v25 = vpack.c.bf16 %v3485_v52, %v3484_v20  ;;  %v3563_v52 = vld [vmem:[#allocation4 + $0x360] sm:$0xff] }
0x1537   : > { %v6512_v28 = vpop.eup %6511 }
0x1538   : > { %v2814_v24 = vmul.f32 %v6512_v28, %v7470_v48 }
0x1539   : > { %6099 = vmatpush3.bf16.msra.mxu0 %v6098_v60 }
0x153a   : > { %6100 = vmatprep.subr.bf16.mxu0 %v6622_v1  ;;  %v2817_v4 = vmul.f32 %v2815_v42, %v2814_v24 }
0x153c   : > { %v2820_v3 = vadd.f32 %v2818_v44, %v2817_v4  ;;  %v3387_v44 = vld [vmem:[#allocation4 + $0x2c0] sm:$0xff] }
0x153d   : > { %6102 = vmatpush3.bf16.msra.mxu0 %v6101_v43 }
0x153e   : > { %v2824_v56 = vsel %vm1660_vm11, %v2820_v3, 0.0  ;;  %6109 = vmatprep.subr.bf16.mxu0 %v6622_v1 }
0x153f   : > { %2825 = vadd.xlane.f32.xlu0 %v2824_v56 }
0x1540   : > { %5660 = vmatmul.mubr.msk.f32.vlgmr.msra.gmra.mrb[24].mxu0 %vm3129_vm14, %v7485_v62  ;;  %v3386_v62 = vld [vmem:[#allocation4 + $0x2b0] sm:$0xff] }
0x1541   : > { %5686 = vmatprep.mubr.msk.f32.mxu0 %vm6621_vm0, %v6620_v0  ;;  %v6104_v63 = vpack.c.bf16 %v3387_v44, %v3386_v62  ;;  %6111 = vmatpush3.bf16.msra.mxu0 %v6110_v35  ;;  %v3562_v35 = vld [vmem:[#allocation4 + $0x350] sm:$0xff] }
0x1542   : > { %6112 = vmatprep.subr.bf16.mxu0 %v6622_v1 }
0x1545   : > { %6114 = vmatpush3.bf16.msra.mxu0 %v6113_v25  ;;  %v6119_v25 = vpack.c.bf16 %v3563_v52, %v3562_v35 }
0x1555   : > { %v2823_v10 = vpop.xlane.xlu1 %2822 }
0x1556   : > { %v2827_v48 = vmul.f32 0.03125, %v2823_v10 }
0x1558   : > { %v2829_v39 = vsub.f32 %v2819_v16, %v2827_v48 }
0x155a   : > { %v2831_v6 = vmul.f32 %v2829_v39, %v2829_v39 }
0x155c   : > { %v2833_v50 = vsel %vm660_vm9, %v2831_v6, 0.0  ;;  %v2847_v6 = vld [vmem:[#allocation4 + $0x572] ss:$0 sm:$0xff] }
0x155d   : > { %2834 = vadd.xlane.f32.xlu0 %v2833_v50 }
0x1572   : > { %v3205_v58 = vpop.f32.mrb[22].mxu0 }
0x1573   : > { %6513 = vrcp.f32 %v3205_v58  ;;  %v5642_v42 = vpop.f32.mrb[23].mxu0 }
0x1574   : > { %v2850_v42 = vld [vmem:[#allocation4 + $0x573] ss:$0 sm:$0xff] }
0x157d   : > { %v6514_v18 = vpop.eup %6513 }
0x157e   : > { %5665 = vmatmul.mubr.msk.f32.vlgmr.msra.gmra.mrb[30].mxu1 %vm655_vm8, %v6514_v18 }
0x157f   : > { %5675 = vmatprep.mubr.msk.f32.mxu1 %vm6621_vm0, %v6620_v0  ;;  %6105 = vmatpush3.bf16.msra.mxu1 %v6104_v63 }
0x1580   : > { %6106 = vmatprep.subr.bf16.mxu1 %v6622_v1 }
0x1583   : > { %6108 = vmatpush3.bf16.msra.mxu1 %v6107_v5 }
0x1584   : > { %6115 = vmatprep.subr.bf16.mxu1 %v6622_v1 }
0x15cc   : > { %v2826_v16 = vpop.xlane.xlu0 %2825 }
0x15cd   : > { %v2828_v27 = vmul.f32 0.03125, %v2826_v16 }
0x15cf   : > { %v2830_v2 = vsub.f32 %v2820_v3, %v2828_v27 }
0x15d1   : > { %v2832_v34 = vmul.f32 %v2830_v2, %v2830_v2 }
0x15d3   : > { %v2836_v9 = vsel %vm1660_vm11, %v2832_v34, 0.0 }
0x15d4   : > { %2837 = vadd.xlane.f32.xlu1 %v2836_v9 }
0x15ea   : > { %v2835_v55 = vpop.xlane.xlu0 %2834 }
0x15eb   : > { %v2839_v24 = vmul.f32 0.03125, %v2835_v55 }
0x15ed   : > { %v2841_v4 = vadd.f32 1e-05, %v2839_v24  ;;  %v3486_v24 = vld [vmem:[#allocation4 + $0x5a1] ss:$0 sm:$0xff] }
0x15ef   : > { %6515 = vrsqrt.f32 %v2841_v4 }
0x15f9   : > { %v6516_v10 = vpop.eup %6515 }
0x15fa   : > { %v2845_v48 = vmul.f32 %v6516_v10, %v2829_v39  ;;  %v3560_v39 = vld [vmem:[#allocation4 + $0x330] sm:$0xff] }
0x15fc   : > { %v2848_v50 = vmul.f32 %v2847_v6, %v2845_v48 }
0x15fe   : > { %v2851_v62 = vadd.f32 %v2850_v42, %v2848_v50 }
0x1600   : > { %v2853_v16 = vsel %vm660_vm9, %v2851_v62, -inf }
0x1613   : > { %v3307_v53 = vpop.f32.mrb[24].mxu0 }
0x1614   : > { %v5661_v31 = vpop.f32.mrb[25].mxu0 }
0x1651   : > { %v3381_v28 = vpop.f32.mrb[30].mxu1 }
0x1652   : > { %v3385_v60 = vmul.f32 %v3381_v28, %v3307_v53  ;;  %v5666_v8 = vpop.f32.mrb[31].mxu1  ;;  %v3390_v53 = vld [vmem:[#allocation4 + $0x5a0] ss:$0 sm:$0xff] }
0x1654   : > { %5676 = vmatmul.mubr.msk.f32.vlgmr.msra.gmra.mrb[32].mxu1 %vm660_vm9, %v3385_v60 }
0x1655   : > { %5697 = vmatprep.mubr.msk.f32.mxu1 %vm6621_vm0, %v6620_v0 }
0x1661   : > { %v2838_v43 = vpop.xlane.xlu1 %2837 }
0x1662   : > { %v2840_v3 = vmul.f32 0.03125, %v2838_v43 }
0x1664   : > { %v2842_v56 = vadd.f32 1e-05, %v2840_v3 }
0x1666   : > { %6517 = vrsqrt.f32 %v2842_v56 }
0x1670   : > { %v6518_v58 = vpop.eup %6517 }
0x1671   : > { %v2846_v18 = vmul.f32 %v6518_v58, %v2830_v2  ;;  %v3561_v2 = vld [vmem:[#allocation4 + $0x340] sm:$0xff] }
0x1672   : > { %v6116_v20 = vpack.c.bf16 %v3561_v2, %v3560_v39 }
0x1673   : > { %v2849_v44 = vmul.f32 %v2847_v6, %v2846_v18 }
0x1674   : > { %6117 = vmatpush3.bf16.msra.mxu1 %v6116_v20 }
0x1675   : > { %v2852_v63 = vadd.f32 %v2850_v42, %v2849_v44  ;;  %6118 = vmatprep.subr.bf16.mxu1 %v6622_v1  ;;  %v3564_v44 = vld [vmem:[#allocation4 + $0x5a2] ss:$0 sm:$0xff] }
0x1677   : > { %v2854_v27 = vsel %vm1660_vm11, %v2852_v63, -inf }
0x1678   : > { %v2855_v34 = vmax.f32 %v2853_v16, %v2854_v27  ;;  %6120 = vmatpush3.bf16.msra.mxu1 %v6119_v25  ;;  %v3478_v16 = vld [vmem:[#allocation4 + $0x5a3] ss:$0 sm:$0xff] }
0x167a   : > { %v2856_v38 = vrot.slane %v2855_v34, 4 }
0x167c   : > { %v2857_v21 = vmax.f32 %v2855_v34, %v2856_v38  ;;  %v3480_v38 = vld [vmem:[#allocation4 + $0x5a4] ss:$0 sm:$0xff] }
0x167e   : > { %v2858_v9 = vrot.slane %v2857_v21, 2 }
0x1680   : > { %v2859_v5 = vmax.f32 %v2857_v21, %v2858_v9 }
0x1682   : > { %v2860_v12 = vrot.slane %v2859_v5, 1 }
0x1684   : > { %v7538_v32 = vmax.f32 %v2859_v5, %v2860_v12 }
0x1686   : > { %5687 = vmatmul.mubr.msk.f32.vlgmr.msra.gmra.mrb[26].mxu0 %vm660_vm9, %v7538_v32 }
0x1687   : > { %3748 = vmatprep.mubr.f32.mxu0 %v6620_v0 }
0x1727   : > { %v3460_v31 = vpop.f32.mrb[32].mxu1 }
0x1728   : > { %v3461_v28 = vadd.f32 %v3460_v31, %v3390_v53  ;;  %v5677_v60 = vpop.f32.mrb[33].mxu1  ;;  %v3661_v53 = vld [vmem:[#allocation4 + $0x378] sm:$0xff]  ;;  %v3663_v31 = vld [vmem:[#allocation4 + $0x388] sm:$0xff] }
0x1729   : > { %v6121_v60 = vpack.c.bf16 %v3663_v31, %v3661_v53 }
0x172a   : > { %v3464_v8 = vadd.f32 %v3461_v28, %v7335_v26  ;;  %v3660_v28 = vld [vmem:[#allocation4 + $0x370] sm:$0xff] }
0x172b   : > { %6122 = vmatprep.subr.bf16.mxu0 %v6121_v60 }
0x172c   : > { %v3465_v55 = vsel %vm660_vm9, %v3464_v8, 0.0 }
0x172d   : > { %3466 = vadd.xlane.f32.xlu0 %v3465_v55  ;;  %v3665_v55 = vld [vmem:[#allocation4 + $0x398] sm:$0xff] }
0x1759   : > { %v3556_v4 = vpop.f32.mrb[26].mxu0 }
0x175a   : > { %v3557_v43 = vadd.f32 %v3556_v4, %v3486_v24  ;;  %v5688_v3 = vpop.f32.mrb[27].mxu0  ;;  %v3667_v24 = vld [vmem:[#allocation4 + $0x3a8] sm:$0xff] }
0x175b   : > { %v3664_v3 = vld [vmem:[#allocation4 + $0x390] sm:$0xff] }
0x175c   : > { %5698 = vmatmul.mubr.msk.f32.vlgmr.msra.gmra.mrb[34].mxu1 %vm660_vm9, %v3557_v43  ;;  %v6125_v43 = vpack.c.bf16 %v3667_v24, %v3665_v55  ;;  %v3765_v24 = vld [vmem:[#allocation4 + $0x5b2] ss:$0 sm:$0xff] }
0x17ba   : > { %v3467_v56 = vpop.xlane.xlu0 %3466 }
0x17bb   : > { %v3468_v10 = vmul.f32 0.03125, %v3467_v56  ;;  %v3666_v56 = vld [vmem:[#allocation4 + $0x3a0] sm:$0xff] }
0x17bd   : > { %v3469_v48 = vsub.f32 %v3464_v8, %v3468_v10  ;;  %v3662_v8 = vld [vmem:[#allocation4 + $0x380] sm:$0xff]  ;;  %v6127_v10 = vpack.c.bf16 %v3666_v56, %v3664_v3 }
0x17be   : > { %v6123_v4 = vpack.c.bf16 %v3662_v8, %v3660_v28 }
0x17bf   : > { %v3470_v6 = vmul.f32 %v3469_v48, %v3469_v48 }
0x17c0   : > { %6124 = vmatpush1.bf16.msra.mxu0 %v6123_v4 }
0x17c1   : > { %v3471_v50 = vsel %vm660_vm9, %v3470_v6, 0.0  ;;  %6126 = vmatprep.subr.bf16.mxu0 %v6125_v43  ;;  %v3760_v6 = vld [vmem:[#allocation4 + $0x3c8] sm:$0xff] }
0x17c2   : > { %3472 = vadd.xlane.f32.xlu1 %v3471_v50  ;;  %v3757_v50 = vld [vmem:[#allocation4 + $0x3b0] sm:$0xff] }
0x17c4   : > { %6128 = vmatpush1.bf16.msra.mxu0 %v6127_v10 }
0x17c5   : > { %6137 = vmatprep.subr.bf16.mxu0 %v6622_v1 }
0x182f   : > { %v3634_v58 = vpop.f32.mrb[34].mxu1 }
0x1830   : > { %v5699_v42 = vpop.f32.mrb[35].mxu1  ;;  %v3635_v27 = vadd.f32 %v3634_v58, %v3564_v44 }
0x1831   : > { %v3759_v42 = vld [vmem:[#allocation4 + $0x3c0] sm:$0xff] }
0x1832   : > { %v3641_v9 = vrot.slane %v3635_v27, %v6996_v15 }
0x184f   : > { %v3473_v18 = vpop.xlane.xlu1 %3472 }
0x1850   : > { %v3474_v26 = vmul.f32 0.03125, %v3473_v18  ;;  %v3762_v18 = vld [vmem:[#allocation4 + $0x3d8] sm:$0xff] }
0x1852   : > { %v3475_v62 = vadd.f32 1e-05, %v3474_v26  ;;  %v3764_v26 = vld [vmem:[#allocation4 + $0x3e8] sm:$0xff] }
0x1853   : > { %v6133_v44 = vpack.c.bf16 %v3764_v26, %v3762_v18  ;;  %v3857_v18 = vld [vmem:[#allocation4 + $0x420] sm:$0xff] }
0x1854   : > { %6519 = vrsqrt.f32 %v3475_v62  ;;  %v6131_v62 = vpack.c.bf16 %v3759_v42, %v3757_v50  ;;  %v3854_v50 = vld [vmem:[#allocation4 + $0x3f0] sm:$0xff] }
0x185e   : > { %v6520_v63 = vpop.eup %6519 }
0x185f   : > { %v3477_v34 = vmul.f32 %v6520_v63, %v3469_v48  ;;  %v3758_v48 = vld [vmem:[#allocation4 + $0x3b8] sm:$0xff] }
0x1860   : > { %v6129_v58 = vpack.c.bf16 %v3760_v6, %v3758_v48 }
0x1861   : > { %v3479_v21 = vmul.f32 %v3478_v16, %v3477_v34 }
0x1862   : > { %6130 = vmatprep.subr.bf16.mxu1 %v6129_v58  ;;  %v3855_v58 = vld [vmem:[#allocation4 + $0x400] sm:$0xff] }
0x1863   : > { %v3481_v5 = vadd.f32 %v3480_v38, %v3479_v21  ;;  %6132 = vmatpush1.bf16.xpose.msra.mxu1 %v6131_v62  ;;  %v3656_v38 = vld [vmem:[#allocation4 + $0x5a5] ss:$0 sm:$0xff]  ;;  %v6138_v42 = vpack.c.bf16 %v3855_v58, %v3854_v50 }
0x1864   : > { %6134 = vmatprep.subr.bf16.mxu1 %v6133_v44 }
0x1865   : > { %v3642_v12 = vadd.f32 %v3641_v9, %v3481_v5  ;;  %v3658_v9 = vld [vmem:[#allocation4 + $0x5a6] ss:$0 sm:$0xff] }
0x1867   : > { %v3643_v39 = vsel %vm660_vm9, %v3642_v12, 0.0 }
0x1868   : > { %3644 = vadd.xlane.f32.xlu0 %v3643_v39  ;;  %v3761_v39 = vld [vmem:[#allocation4 + $0x3d0] sm:$0xff] }
0x18f5   : > { %v3645_v2 = vpop.xlane.xlu0 %3644 }
0x18f6   : > { %v3646_v20 = vmul.f32 0.03125, %v3645_v2  ;;  %v3763_v2 = vld [vmem:[#allocation4 + $0x3e0] sm:$0xff] }
0x18f8   : > { %v3647_v35 = vsub.f32 %v3642_v12, %v3646_v20  ;;  %v6135_v20 = vpack.c.bf16 %v3763_v2, %v3761_v39 }
0x18fa   : > { %v3648_v52 = vmul.f32 %v3647_v35, %v3647_v35  ;;  %6136 = vmatpush1.bf16.xpose.msra.mxu1 %v6135_v20 }
0x18fb   : > { %6159 = vmatprep.subr.bf16.mxu1 %v6622_v1 }
0x18fc   : > { %v3649_v25 = vsel %vm660_vm9, %v3648_v52, 0.0  ;;  %v3669_v52 = vld [vmem:[#allocation4 + $0x5b1] ss:$8 sm:$0x3] }
0x18fd   : > { %3650 = vadd.xlane.f32.xlu1 %v3649_v25  ;;  %v3674_v25 = vrot.slane %v3669_v52, %v6996_v15  ;;  %v3678_v53 = vrot.slane %v3669_v52, %v7123_v14 }
0x198a   : > { %v3651_v63 = vpop.xlane.xlu1 %3650 }
0x198b   : > { %v3652_v16 = vmul.f32 0.03125, %v3651_v63 }
0x198d   : > { %v3653_v27 = vadd.f32 1e-05, %v3652_v16 }
0x198f   : > { %6521 = vrsqrt.f32 %v3653_v27  ;;  %v3850_v27 = vld [vmem:[#allocation4 + $0x5a7] ss:$0 sm:$0xff] }
0x1999   : > { %v6522_v34 = vpop.eup %6521 }
0x199a   : > { %v3655_v21 = vmul.f32 %v6522_v34, %v3647_v35 }
0x199c   : > { %v3657_v5 = vmul.f32 %v3656_v38, %v3655_v21  ;;  %v3852_v38 = vld [vmem:[#allocation4 + $0x5b0] ss:$0 sm:$0xff] }
0x199e   : > { %v3659_v12 = vadd.f32 %v3658_v9, %v3657_v5  ;;  %v3858_v5 = vld [vmem:[#allocation4 + $0x5b3] ss:$0 sm:$0xff] }
0x19a0   : > { %5088 = vmatmul.mubr.msk.f32.vlgmr.msra.gmra.mrb[28].mxu0 %vm660_vm9, %v3659_v12 }
0x19a1   : > { %5708 = vmatprep.mubr.msk.f32.mxu0 %vm6621_vm0, %v6620_v0  ;;  %6139 = vmatpush3.bf16.msra.mxu0 %v6138_v42 }
0x19a2   : > { %6140 = vmatprep.subr.bf16.mxu0 %v6622_v1 }
0x1a73   : > { %v3750_v35 = vpop.f32.mrb[28].mxu0 }
0x1a74   : > { %v3751_v31 = vadd.f32 %v3750_v35, %v3674_v25  ;;  %v3752_v28 = vpop.f32.mrb[29].mxu0 }
0x1a75   : > { %v3753_v60 = vadd.f32 %v3752_v28, %v3678_v53 }
0x1a76   : > { %v3755_v55 = vmax.f32 %v3751_v31, 0.0 }
0x1a77   : > { %v3756_v8 = vmax.f32 %v3753_v60, 0.0 }
0x1a79   : > { %3830 = vmatprep.mubr.f32.mxu1 %v3756_v8 }
0x1a7a   : > { %3831 = vmatmul.mubr.f32.vlgmr.msra.gmra.mrb[36].mxu1 %v3755_v55 }
0x1a7b   : > { %6161 = vmatpush3.bf16.msra.mxu1 %v7442_v19  ;;  %5746 = vmatprep.mubr.msk.f32.mxu1 %vm6621_vm0, %v6620_v0 }
0x1a7c   : > { %6162 = vmatprep.subr.bf16.mxu1 %v6622_v1 }
0x1a7f   : > { %6164 = vmatpush3.bf16.msra.mxu1 %v7446_v13 }
0x1a80   : > { %6165 = vmatprep.subr.bf16.mxu1 %v6622_v1 }
0x1a83   : > { %6167 = vmatpush3.bf16.msra.mxu1 %v7450_v22 }
0x1a84   : > { %6168 = vmatprep.subr.bf16.mxu1 %v6622_v1 }
0x1a87   : > { %6170 = vmatpush3.bf16.msra.mxu1 %v7456_v40  ;;  %v3856_v40 = vld [vmem:[#allocation4 + $0x410] sm:$0xff] }
0x1a88   : > { %6171 = vmatprep.subr.bf16.mxu1 %v6622_v1  ;;  %v6141_v26 = vpack.c.bf16 %v3857_v18, %v3856_v40 }
0x1a8a   : > { %6142 = vmatpush3.bf16.msra.mxu0 %v6141_v26 }
0x1a8b   : > { %6143 = vmatprep.subr.bf16.mxu0 %v6622_v1 }
0x1b4d   : > { %v3832_v4 = vpop.f32.mrb[36].mxu1 }
0x1b4e   : > { %v3833_v19 = vadd.f32 %v3832_v4, %v3765_v24  ;;  %v3834_v43 = vpop.f32.mrb[37].mxu1 }
0x1b50   : > { %v3836_v3 = vadd.f32 %v3833_v19, %v3659_v12 }
0x1b52   : > { %v3837_v56 = vsel %vm660_vm9, %v3836_v3, 0.0 }
0x1b53   : > { %3838 = vadd.xlane.f32.xlu0 %v3837_v56 }
0x1be0   : > { %v3839_v10 = vpop.xlane.xlu0 %3838 }
0x1be1   : > { %v3840_v13 = vmul.f32 0.03125, %v3839_v10 }
0x1be3   : > { %v3841_v48 = vsub.f32 %v3836_v3, %v3840_v13 }
0x1be5   : > { %v3842_v6 = vmul.f32 %v3841_v48, %v3841_v48 }
0x1be7   : > { %v3843_v22 = vsel %vm660_vm9, %v3842_v6, 0.0 }
0x1be8   : > { %3844 = vadd.xlane.f32.xlu1 %v3843_v22 }
0x1c75   : > { %v3845_v62 = vpop.xlane.xlu1 %3844 }
0x1c76   : > { %v3846_v44 = vmul.f32 0.03125, %v3845_v62 }
0x1c78   : > { %v3847_v63 = vadd.f32 1e-05, %v3846_v44 }
0x1c7a   : > { %6523 = vrsqrt.f32 %v3847_v63 }
0x1c84   : > { %v6524_v16 = vpop.eup %6523 }
0x1c85   : > { %v3849_v34 = vmul.f32 %v6524_v16, %v3841_v48 }
0x1c87   : > { %v3851_v21 = vmul.f32 %v3850_v27, %v3849_v34 }
0x1c89   : > { %v7572_v9 = vadd.f32 %v3852_v38, %v3851_v21 }
0x1c8b   : > { %5709 = vmatmul.mubr.msk.f32.vlgmr.msra.gmra.mrb[30].mxu0 %vm660_vm9, %v7572_v9 }
0x1c8c   : > { %5727 = vmatprep.mubr.msk.f32.mxu0 %vm6621_vm0, %v6620_v0 }
0x1d5e   : > { %v3928_v12 = vpop.f32.mrb[30].mxu0 }
0x1d5f   : > { %v3929_v39 = vadd.f32 %v3928_v12, %v3858_v5  ;;  %v5710_v2 = vpop.f32.mrb[31].mxu0 }
0x1d61   : > { %v3934_v20 = vmul.f32 %v3929_v39, %v7351_v45  ;;  %v3935_v52 = vmul.f32 %v3929_v39, %v7349_v37  ;;  %v3932_v25 = vmul.f32 %v3929_v39, %v7343_v49  ;;  %v3933_v53 = vmul.f32 %v3929_v39, %v7345_v57 }
0x1d62   : > { %v3936_v35 = vmul.f32 %v3929_v39, %v7355_v7  ;;  %v3937_v31 = vmul.f32 %v3929_v39, %v7353_v30  ;;  %v3938_v8 = vmul.f32 %v3929_v39, %v7361_v47  ;;  %v3939_v55 = vmul.f32 %v3929_v39, %v7359_v33 }
0x1d63   : > { %v6444_v28 = vpack.i.bf16 %v3935_v52, %v3934_v20  ;;  %v6439_v60 = vpack.i.bf16 %v3933_v53, %v3932_v25  ;;  %v3940_v49 = vmul.f32 %v3929_v39, %v7472_v36  ;;  %v3941_v57 = vmul.f32 %v3929_v39, %v7466_v46 }
0x1d64   : > { %v6449_v45 = vpack.i.bf16 %v3937_v31, %v3936_v35  ;;  %v6454_v37 = vpack.i.bf16 %v3939_v55, %v3938_v8  ;;  %v3942_v7 = vmul.f32 %v3929_v39, %v7468_v41  ;;  %v3943_v47 = vmul.f32 %v3929_v39, %v7479_v23  ;;  %v4413_v31 = vld [vmem:[#allocation4 + $0x470] sm:$0xff] }
0x1d65   : > { %6445 = vrot.lane.b32.xlu1 %v6444_v28, %s6626_s14  ;;  %6440 = vrot.lane.b32.xlu0 %v6439_v60, %s6626_s14  ;;  %v6459_v30 = vpack.i.bf16 %v3941_v57, %v3940_v49  ;;  %v3944_v24 = vmul.f32 %v3929_v39, %v7476_v17  ;;  %v3945_v4 = vmul.f32 %v3929_v39, %v7491_v54  ;;  %v4414_v28 = vld [vmem:[#allocation4 + $0x480] sm:$0xff]  ;;  %v4415_v55 = vld [vmem:[#allocation4 + $0x490] sm:$0xff] }
0x1d66   : > { %v6464_v33 = vpack.i.bf16 %v3943_v47, %v3942_v7  ;;  %v3946_v46 = vmul.f32 %v3929_v39, %v7487_v29  ;;  %v3947_v19 = vmul.f32 %v3929_v39, %v7503_v11  ;;  %v6190_v8 = vpack.c.bf16 %v4414_v28, %v4413_v31  ;;  %v4318_v7 = vld [vmem:[#allocation4 + $0x440] sm:$0xff] }
0x1d67   : > { %v6469_v36 = vpack.i.bf16 %v3945_v4, %v3944_v24  ;;  %v4320_v24 = vld [vmem:[#allocation4 + $0x460] sm:$0xff] }
0x1d68   : > { %v6474_v43 = vpack.i.bf16 %v3947_v19, %v3946_v46 }
0x1d69   : > { %6450 = vrot.lane.b32.xlu1 %v6449_v45, %s6626_s14  ;;  %6455 = vrot.lane.b32.xlu0 %v6454_v37, %s6626_s14  ;;  %v4416_v45 = vld [vmem:[#allocation4 + $0x4a0] sm:$0xff] }
0x1d6a   : > { %v6193_v37 = vpack.c.bf16 %v4416_v45, %v4415_v55  ;;  %v4591_v55 = vld [vmem:[#allocation4 + $0x508] sm:$0xff]  ;;  %v4588_v45 = vld [vmem:[#allocation4 + $0x4f0] sm:$0xff] }
0x1d6d   : > { %6460 = vrot.lane.b32.xlu0 %v6459_v30, %s6634_s27  ;;  %v4317_v30 = vld [vmem:[#allocation4 + $0x430] sm:$0xff] }
0x1d6e   : > { %v6184_v47 = vpack.c.bf16 %v4318_v7, %v4317_v30  ;;  %v4595_v30 = vld [vmem:[#allocation4 + $0x528] sm:$0xff] }
0x1d71   : > { %6465 = vrot.lane.b32.xlu0 %v6464_v33, %s6634_s27  ;;  %v4319_v33 = vld [vmem:[#allocation4 + $0x450] sm:$0xff] }
0x1d75   : > { %6470 = vrot.lane.b32.xlu0 %v6469_v36, %s6634_s27  ;;  %v6187_v36 = vpack.c.bf16 %v4320_v24, %v4319_v33  ;;  %v4592_v33 = vld [vmem:[#allocation4 + $0x510] sm:$0xff]  ;;  %v4594_v24 = vld [vmem:[#allocation4 + $0x520] sm:$0xff] }
0x1d79   : > { %6475 = vrot.lane.b32.xlu0 %v6474_v43, %s6634_s27 }
0x1dd7   : > { %v6441_v41 = vpop.permute.xlu0 %6440  ;;  %v6446_v10 = vpop.permute.xlu1 %6445 }
0x1dd8   : > { %v6443_v23 = vunpack.i.h.bf16 %v6441_v41  ;;  %v6442_v3 = vunpack.i.l.bf16 %v6441_v41  ;;  %v6448_v17 = vunpack.i.h.bf16 %v6446_v10  ;;  %v6447_v54 = vunpack.i.l.bf16 %v6446_v10  ;;  %v4488_v41 = vld [vmem:[#allocation4 + $0x4b0] sm:$0xff] }
0x1dda   : > { %v6144_v56 = vpack.c.bf16 %v6443_v23, %v6442_v3  ;;  %v6148_v29 = vpack.c.bf16 %v6448_v17, %v6447_v54  ;;  %v4489_v23 = vld [vmem:[#allocation4 + $0x4c0] sm:$0xff]  ;;  %v4490_v54 = vld [vmem:[#allocation4 + $0x4d0] sm:$0xff] }
0x1ddb   : > { %v6451_v13 = vpop.permute.xlu1 %6450  ;;  %v6456_v22 = vpop.permute.xlu0 %6455 }
0x1ddc   : > { %6146 = vmatpush3.bf16.xpose.msk.msra.mxu0 %vm6952_vm12, %v6144_v56  ;;  %v6453_v11 = vunpack.i.h.bf16 %v6451_v13  ;;  %v6452_v48 = vunpack.i.l.bf16 %v6451_v13  ;;  %v6458_v50 = vunpack.i.h.bf16 %v6456_v22  ;;  %v6457_v58 = vunpack.i.l.bf16 %v6456_v22 }
0x1ddd   : > { %6147 = vmatprep.subr.bf16.mxu0 %v6622_v1  ;;  %v6196_v56 = vpack.c.bf16 %v4489_v23, %v4488_v41  ;;  %v4690_v41 = vld [vmem:[#allocation4 + $0x558] sm:$0xff]  ;;  %v4692_v23 = vld [vmem:[#allocation4 + $0x568] sm:$0xff] }
0x1dde   : > { %v6152_v6 = vpack.c.bf16 %v6453_v11, %v6452_v48  ;;  %v6156_v40 = vpack.c.bf16 %v6458_v50, %v6457_v58  ;;  %v4417_v11 = vld [vmem:[#allocation4 + $0x5b5] ss:$0 sm:$0xff] }
0x1ddf   : > { %v6461_v63 = vpop.permute.xlu0 %6460 }
0x1de0   : > { %v6463_v34 = vunpack.i.h.bf16 %v6461_v63 }
0x1de3   : > { %v6466_v27 = vpop.permute.xlu0 %6465 }
0x1de4   : > { %6150 = vmatpush3.bf16.xpose.msk.msra.mxu0 %vm6952_vm12, %v6148_v29  ;;  %v6468_v12 = vunpack.i.h.bf16 %v6466_v27  ;;  %v4491_v29 = vld [vmem:[#allocation4 + $0x4e0] sm:$0xff] }
0x1de5   : > { %6151 = vmatprep.subr.bf16.mxu0 %v6622_v1  ;;  %v6199_v13 = vpack.c.bf16 %v4491_v29, %v4490_v54 }
0x1de7   : > { %v6471_v38 = vpop.permute.xlu0 %6470 }
0x1de8   : > { %v6473_v2 = vunpack.i.h.bf16 %v6471_v38  ;;  %v6472_v20 = vunpack.i.l.bf16 %v6471_v38  ;;  %v4492_v38 = vld [vmem:[#allocation4 + $0x5b6] ss:$0 sm:$0xff] }
0x1dea   : > { %v6178_v25 = vpack.c.bf16 %v6473_v2, %v6472_v20 }
0x1deb   : > { %v6476_v52 = vpop.permute.xlu0 %6475 }
0x1dec   : > { %6154 = vmatpush3.bf16.xpose.msk.msra.mxu0 %vm6952_vm12, %v6152_v6  ;;  %v6478_v53 = vunpack.i.h.bf16 %v6476_v52  ;;  %v6477_v35 = vunpack.i.l.bf16 %v6476_v52  ;;  %v4321_v6 = vld [vmem:[#allocation4 + $0x5b4] ss:$0 sm:$0xff] }
0x1ded   : > { %6155 = vmatprep.subr.bf16.mxu0 %v6622_v1 }
0x1dee   : > { %v6181_v60 = vpack.c.bf16 %v6478_v53, %v6477_v35 }
0x1df4   : > { %6158 = vmatpush3.bf16.xpose.msk.msra.mxu0 %vm6952_vm12, %v6156_v40 }
0x1df5   : > { %5768 = vmatprep.subr.mxu0 %v6620_v0 }
0x1dfb   : > { %5728 = vmatmul.mubr.msk.f32.vlgmr.msra.gmra.mrb[32].mxu0 %vm660_vm9, %v3929_v39  ;;  %v6467_v39 = vunpack.i.l.bf16 %v6466_v27 }
0x1dfc   : > { %5769 = vmatpush3.msra.mxu0 %v7409_v51  ;;  %5770 = vmatprep.mubr.msk.f32.mxu0 %vm6621_vm0, %v6620_v0  ;;  %v6462_v51 = vunpack.i.l.bf16 %v6461_v63 }
0x1dfd   : > { %6183 = vmatprep.subr.bf16.mxu0 %v6622_v1 }
0x1dfe   : > { %v6172_v5 = vpack.c.bf16 %v6463_v34, %v6462_v51 }
0x1ece   : > { %v4057_v42 = vpop.f32.mrb[32].mxu0 }
0x1ecf   : > { %v4058_v18 = vadd.f32 %v4057_v42, %v7436_v59  ;;  %v5729_v26 = vpop.f32.mrb[33].mxu0  ;;  %v6175_v59 = vpack.c.bf16 %v6468_v12, %v6467_v39  ;;  %v4411_v39 = vld [vmem:[#allocation4 + $0x5c0] ss:$0 sm:$0xff] }
0x1ed1   : > { %v4061_v62 = vsel %vm3129_vm14, %v4058_v18, -inf }
0x1ed2   : > { %4062 = vmax.xlane.f32.xlu1 %v4061_v62 }
0x1f5f   : > { %v4063_v61 = vpop.xlane.xlu1 %4062 }
0x1f60   : > { %v4064_v44 = vsub.f32 %v4058_v18, %v4063_v61 }
0x1f62   : > { %v4065_v16 = vmul.f32 1.442695, %v4064_v44 }
0x1f64   : > { %6525 = vpow2.f32 %v4065_v16 }
0x1f6e   : > { %v6526_v21 = vpop.eup %6525 }
0x1f6f   : > { %5747 = vmatmul.mubr.msk.f32.vlgmr.msra.gmra.mrb[38].mxu1 %vm3129_vm14, %v6526_v21 }
0x1f70   : > { %6173 = vmatpush3.bf16.msra.mxu1 %v6172_v5  ;;  %5765 = vmatprep.mubr.msk.f32.mxu1 %vm6621_vm0, %v6620_v0  ;;  %v4409_v5 = vld [vmem:[#allocation4 + $0x5b7] ss:$0 sm:$0xff] }
0x1f71   : > { %6174 = vmatprep.subr.bf16.mxu1 %v6622_v1 }
0x1f74   : > { %6176 = vmatpush3.bf16.msra.mxu1 %v6175_v59 }
0x1f75   : > { %6177 = vmatprep.subr.bf16.mxu1 %v6622_v1 }
0x1f78   : > { %6179 = vmatpush3.bf16.msra.mxu1 %v6178_v25 }
0x1f79   : > { %6180 = vmatprep.subr.bf16.mxu1 %v6622_v1 }
0x1f7c   : > { %6182 = vmatpush3.bf16.msra.mxu1 %v6181_v60 }
0x1f7d   : > { %6189 = vmatprep.subr.bf16.mxu1 %v6622_v1 }
0x1f7f   : > { %5766 = vmatmul.mubr.msk.f32.vlgmr.msra.gmra.mrb[40].mxu1 %vm3129_vm14, %v6526_v21 }
0x1f80   : > { %6191 = vmatpush3.bf16.msra.mxu1 %v6190_v8  ;;  %5792 = vmatprep.mubr.msk.f32.mxu1 %vm6621_vm0, %v6620_v0  ;;  %v4589_v8 = vld [vmem:[#allocation4 + $0x4f8] sm:$0xff] }
0x1f81   : > { %6192 = vmatprep.subr.bf16.mxu1 %v6622_v1 }
0x1f84   : > { %6194 = vmatpush3.bf16.msra.mxu1 %v6193_v37  ;;  %v6201_v37 = vpack.c.bf16 %v4591_v55, %v4589_v8 }
0x1f86   : > { %6202 = vmatprep.subr.bf16.mxu1 %v6201_v37 }
0x1f87   : > { %5793 = vmatmul.mubr.msk.f32.vlgmr.msra.gmra.mrb[42].mxu1 %vm660_vm9, %v7538_v32 }
0x1f88   : > { %4676 = vmatprep.mubr.f32.mxu1 %v6620_v0 }
0x2042   : > { %v4136_v49 = vpop.f32.mrb[38].mxu1 }
0x2043   : > { %6527 = vrcp.f32 %v4136_v49  ;;  %v5748_v57 = vpop.f32.mrb[39].mxu1  ;;  %v4590_v49 = vld [vmem:[#allocation4 + $0x500] sm:$0xff] }
0x2044   : > { %v4593_v57 = vld [vmem:[#allocation4 + $0x518] sm:$0xff]  ;;  %v6203_v7 = vpack.c.bf16 %v4590_v49, %v4588_v45 }
0x2046   : > { %6204 = vmatpush1.bf16.msra.mxu1 %v6203_v7  ;;  %v4801_v7 = vld [vmem:[#allocation4 + $0x50] sm:$0xff] }
0x204d   : > { %v6528_v4 = vpop.eup %6527 }
0x204e   : > { %5771 = vmatmul.mubr.msk.f32.vlgmr.msra.gmra.mrb[34].mxu0 %vm655_vm8, %v6528_v4  ;;  %v6207_v4 = vpack.c.bf16 %v4594_v24, %v4592_v33  ;;  %v4802_v33 = vld [vmem:[#allocation4 + $0x60] sm:$0xff] }
0x204f   : > { %6185 = vmatpush3.bf16.msra.mxu0 %v6184_v47  ;;  %5781 = vmatprep.mubr.msk.f32.mxu0 %vm6621_vm0, %v6620_v0  ;;  %v6205_v47 = vpack.c.bf16 %v4595_v30, %v4593_v57  ;;  %v4799_v57 = vld [vmem:[#allocation4 + $0x30] sm:$0xff]  ;;  %v4800_v30 = vld [vmem:[#allocation4 + $0x40] sm:$0xff]  ;;  %v6221_v24 = vpack.c.bf16 %v4802_v33, %v4801_v7 }
0x2050   : > { %6186 = vmatprep.subr.bf16.mxu0 %v6622_v1 }
0x2051   : > { %6206 = vmatprep.subr.bf16.mxu1 %v6205_v47  ;;  %v6218_v47 = vpack.c.bf16 %v4800_v30, %v4799_v57 }
0x2052   : > { %v4238_v32 = vpop.f32.mrb[40].mxu1  ;;  %6208 = vmatpush1.bf16.msra.mxu1 %v6207_v4 }
0x2053   : > { %v5767_v46 = vpop.f32.mrb[41].mxu1  ;;  %6188 = vmatpush3.bf16.msra.mxu0 %v6187_v36  ;;  %v4686_v36 = vld [vmem:[#allocation4 + $0x538] sm:$0xff]  ;;  %6217 = vmatprep.subr.bf16.mxu1 %v6622_v1 }
0x2054   : > { %6195 = vmatprep.subr.bf16.mxu0 %v6622_v1  ;;  %v4685_v46 = vld [vmem:[#allocation4 + $0x530] sm:$0xff] }
0x205a   : > { %v4484_v19 = vpop.f32.mrb[42].mxu1 }
0x205b   : > { %v5794_v43 = vpop.f32.mrb[43].mxu1  ;;  %v4485_v48 = vadd.f32 %v4484_v19, %v4417_v11 }
0x205c   : > { %v4687_v43 = vld [vmem:[#allocation4 + $0x540] sm:$0xff] }
0x2121   : > { %v4312_v3 = vpop.f32.mrb[34].mxu0 }
0x2122   : > { %v4316_v10 = vmul.f32 %v4312_v3, %v4238_v32  ;;  %v5772_v17 = vpop.f32.mrb[35].mxu0  ;;  %v4688_v32 = vld [vmem:[#allocation4 + $0x548] sm:$0xff]  ;;  %v6211_v3 = vpack.c.bf16 %v4687_v43, %v4685_v46 }
0x2123   : > { %v6209_v19 = vpack.c.bf16 %v4688_v32, %v4686_v36 }
0x2124   : > { %5782 = vmatmul.mubr.msk.f32.vlgmr.msra.gmra.mrb[36].mxu0 %vm660_vm9, %v4316_v10 }
0x2125   : > { %6197 = vmatpush3.bf16.msra.mxu0 %v6196_v56  ;;  %5803 = vmatprep.mubr.msk.f32.mxu0 %vm6621_vm0, %v6620_v0  ;;  %v6213_v56 = vpack.c.bf16 %v4692_v23, %v4690_v41  ;;  %v4797_v41 = vld [vmem:[#allocation4 + $0x575] ss:$0 sm:$0xff] }
0x2126   : > { %6198 = vmatprep.subr.bf16.mxu0 %v6622_v1 }
0x2129   : > { %6200 = vmatpush3.bf16.msra.mxu0 %v6199_v13  ;;  %v4584_v13 = vld [vmem:[#allocation4 + $0x5c1] ss:$0 sm:$0xff] }
0x212a   : > { %6210 = vmatprep.subr.bf16.mxu0 %v6209_v19  ;;  %v4795_v19 = vld [vmem:[#allocation4 + $0x574] ss:$0 sm:$0xff] }
0x212c   : > { %5804 = vmatmul.mubr.msk.f32.vlgmr.msra.gmra.mrb[38].mxu0 %vm660_vm9, %v4485_v48  ;;  %v4586_v48 = vld [vmem:[#allocation4 + $0x5c2] ss:$0 sm:$0xff] }
0x2132   : > { %6212 = vmatpush1.bf16.xpose.msra.mxu0 %v6211_v3 }
0x2133   : > { %6214 = vmatprep.subr.bf16.mxu0 %v6213_v56  ;;  %v4803_v56 = vld [vmem:[#allocation4 + $0x576] ss:$0 sm:$0xff] }
0x21f7   : > { %v4391_v22 = vpop.f32.mrb[36].mxu0 }
0x21f8   : > { %v4392_v50 = vadd.f32 %v4391_v22, %v4321_v6  ;;  %v5783_v58 = vpop.f32.mrb[37].mxu0 }
0x21f9   : > { %v4691_v58 = vld [vmem:[#allocation4 + $0x560] sm:$0xff] }
0x21fa   : > { %v4395_v40 = vadd.f32 %v4392_v50, %v7572_v9  ;;  %v4689_v50 = vld [vmem:[#allocation4 + $0x550] sm:$0xff] }
0x21fc   : > { %v4396_v42 = vsel %vm660_vm9, %v4395_v40, 0.0 }
0x21fd   : > { %4397 = vadd.xlane.f32.xlu0 %v4396_v42  ;;  %v4597_v42 = vld [vmem:[#allocation4 + $0x5c5] ss:$8 sm:$0x3] }
0x21ff   : > { %v4562_v18 = vpop.f32.mrb[38].mxu0 }
0x2200   : > { %v5805_v26 = vpop.f32.mrb[39].mxu0  ;;  %v4563_v9 = vadd.f32 %v4562_v18, %v4492_v38  ;;  %v4602_v18 = vrot.slane %v4597_v42, %v6996_v15 }
0x2201   : > { %v4606_v26 = vrot.slane %v4597_v42, %v7123_v14 }
0x2202   : > { %v4569_v2 = vrot.slane %v4563_v9, %v6996_v15 }
0x228a   : > { %v4398_v62 = vpop.xlane.xlu0 %4397 }
0x228b   : > { %v4399_v61 = vmul.f32 0.03125, %v4398_v62 }
0x228d   : > { %v4400_v44 = vsub.f32 %v4395_v40, %v4399_v61  ;;  %v6215_v40 = vpack.c.bf16 %v4691_v58, %v4689_v50 }
0x228f   : > { %v4401_v63 = vmul.f32 %v4400_v44, %v4400_v44  ;;  %6216 = vmatpush1.bf16.xpose.msra.mxu0 %v6215_v40 }
0x2291   : > { %v4402_v16 = vsel %vm660_vm9, %v4401_v63, 0.0 }
0x2292   : > { %4403 = vadd.xlane.f32.xlu1 %v4402_v16 }
0x231f   : > { %v4404_v27 = vpop.xlane.xlu1 %4403 }
0x2320   : > { %v4405_v34 = vmul.f32 0.03125, %v4404_v27 }
0x2322   : > { %v4406_v51 = vadd.f32 1e-05, %v4405_v34  ;;  %v4693_v34 = vld [vmem:[#allocation4 + $0x5c6] ss:$0 sm:$0xff] }
0x2324   : > { %6529 = vrsqrt.f32 %v4406_v51 }
0x232e   : > { %v6530_v21 = vpop.eup %6529 }
0x232f   : > { %v4408_v12 = vmul.f32 %v6530_v21, %v4400_v44 }
0x2331   : > { %v4410_v59 = vmul.f32 %v4409_v5, %v4408_v12 }
0x2333   : > { %v4412_v20 = vadd.f32 %v4411_v39, %v4410_v59 }
0x2335   : > { %v4570_v52 = vadd.f32 %v4569_v2, %v4412_v20 }
0x2337   : > { %v4571_v25 = vsel %vm660_vm9, %v4570_v52, 0.0 }
0x2338   : > { %4572 = vadd.xlane.f32.xlu1 %v4571_v25  ;;  %v4778_v25 = vld [vmem:[#allocation4 + $0x5c3] ss:$0 sm:$0xff] }
0x23c5   : > { %v4573_v53 = vpop.xlane.xlu1 %4572 }
0x23c6   : > { %v4574_v35 = vmul.f32 0.03125, %v4573_v53 }
0x23c8   : > { %v4575_v31 = vsub.f32 %v4570_v52, %v4574_v35  ;;  %v4780_v35 = vld [vmem:[#allocation4 + $0x5c4] ss:$0 sm:$0xff] }
0x23ca   : > { %v4576_v28 = vmul.f32 %v4575_v31, %v4575_v31 }
0x23cc   : > { %v4577_v60 = vsel %vm660_vm9, %v4576_v28, 0.0 }
0x23cd   : > { %4578 = vadd.xlane.f32.xlu1 %v4577_v60 }
0x245a   : > { %v4579_v10 = vpop.xlane.xlu1 %4578 }
0x245b   : > { %v4580_v17 = vmul.f32 0.03125, %v4579_v10 }
0x245d   : > { %v4581_v54 = vadd.f32 1e-05, %v4580_v17 }
0x245f   : > { %6531 = vrsqrt.f32 %v4581_v54 }
0x2469   : > { %v6532_v29 = vpop.eup %6531 }
0x246a   : > { %v4583_v11 = vmul.f32 %v6532_v29, %v4575_v31 }
0x246c   : > { %v4585_v6 = vmul.f32 %v4584_v13, %v4583_v11 }
0x246e   : > { %v4587_v22 = vadd.f32 %v4586_v48, %v4585_v6 }
0x2470   : > { %5105 = vmatmul.mubr.msk.f32.vlgmr.msra.gmra.mrb[44].mxu1 %vm660_vm9, %v4587_v22 }
0x2471   : > { %5814 = vmatprep.mubr.msk.f32.mxu1 %vm6621_vm0, %v6620_v0  ;;  %6219 = vmatpush3.bf16.msra.mxu1 %v6218_v47 }
0x2472   : > { %6220 = vmatprep.subr.bf16.mxu1 %v6622_v1 }
0x2475   : > { %6222 = vmatpush3.bf16.msra.mxu1 %v6221_v24 }
0x2543   : > { %v4678_v62 = vpop.f32.mrb[44].mxu1 }
0x2544   : > { %v4679_v61 = vadd.f32 %v4678_v62, %v4602_v18  ;;  %v4680_v44 = vpop.f32.mrb[45].mxu1 }
0x2545   : > { %v4681_v63 = vadd.f32 %v4680_v44, %v4606_v26 }
0x2546   : > { %v4683_v27 = vmax.f32 %v4679_v61, 0.0 }
0x2547   : > { %v4684_v16 = vmax.f32 %v4681_v63, 0.0 }
0x2549   : > { %4758 = vmatprep.mubr.f32.mxu0 %v4684_v16 }
0x254a   : > { %4759 = vmatmul.mubr.f32.vlgmr.msra.gmra.mrb[40].mxu0 %v4683_v27 }
0x261d   : > { %v4760_v51 = vpop.f32.mrb[40].mxu0 }
0x261e   : > { %v4761_v0 = vadd.f32 %v4760_v51, %v4693_v34  ;;  %v4762_v38 = vpop.f32.mrb[41].mxu0 }
0x2620   : > { %v4764_v21 = vadd.f32 %v4761_v0, %v4587_v22 }
0x2622   : > { %v4765_v5 = vsel %vm660_vm9, %v4764_v21, 0.0 }
0x2623   : > { %4766 = vadd.xlane.f32.xlu1 %v4765_v5 }
0x26b0   : > { %v4767_v9 = vpop.xlane.xlu1 %4766 }
0x26b1   : > { %v4768_v15 = vmul.f32 0.03125, %v4767_v9 }
0x26b3   : > { %v4769_v12 = vsub.f32 %v4764_v21, %v4768_v15 }
0x26b5   : > { %v4770_v14 = vmul.f32 %v4769_v12, %v4769_v12 }
0x26b7   : > { %v4771_v39 = vsel %vm660_vm9, %v4770_v14, 0.0 }
0x26b8   : > { %4772 = vadd.xlane.f32.xlu0 %v4771_v39 }
0x2745   : > { %v4773_v59 = vpop.xlane.xlu0 %4772 }
0x2746   : > { %v4774_v2 = vmul.f32 0.03125, %v4773_v59 }
0x2748   : > { %v4775_v20 = vadd.f32 1e-05, %v4774_v2 }
0x274a   : > { %6533 = vrsqrt.f32 %v4775_v20 }
0x2754   : > { %v6534_v52 = vpop.eup %6533 }
0x2755   : > { %v4777_v53 = vmul.f32 %v6534_v52, %v4769_v12 }
0x2757   : > { %v4779_v31 = vmul.f32 %v4778_v25, %v4777_v53 }
0x2759   : > { %v4781_v28 = vadd.f32 %v4780_v35, %v4779_v31 }
0x275b   : > { %v4782_v60 = vsel %vm660_vm9, %v4781_v28, 0.0 }
0x275c   : > { %4783 = vadd.xlane.f32.xlu1 %v4782_v60 }
0x27e9   : > { %v4784_v8 = vpop.xlane.xlu1 %4783 }
0x27ea   : > { %v4785_v55 = vmul.f32 0.03125, %v4784_v8 }
0x27ec   : > { %v4786_v45 = vsub.f32 %v4781_v28, %v4785_v55 }
0x27ee   : > { %v4787_v37 = vmul.f32 %v4786_v45, %v4786_v45 }
0x27f0   : > { %v4788_v49 = vsel %vm660_vm9, %v4787_v37, 0.0 }
0x27f1   : > { %4789 = vadd.xlane.f32.xlu0 %v4788_v49 }
0x287e   : > { %v4790_v4 = vpop.xlane.xlu0 %4789 }
0x287f   : > { %v4791_v36 = vmul.f32 0.03125, %v4790_v4 }
0x2881   : > { %v4792_v32 = vadd.f32 1e-05, %v4791_v36 }
0x2883   : > { %6535 = vrsqrt.f32 %v4792_v32 }
0x288d   : > { %v6536_v46 = vpop.eup %6535 }
0x288e   : > { %v4794_v43 = vmul.f32 %v6536_v46, %v4786_v45 }
0x2890   : > { %v4796_v23 = vmul.f32 %v4795_v19, %v4794_v43 }
0x2892   : > { %v4798_v3 = vadd.f32 %v4797_v41, %v4796_v23 }
0x2894   : > { %5815 = vmatmul.mubr.msk.f32.vlgmr.msra.gmra.mrb[46].mxu1 %vm660_vm9, %v4798_v3  ;;  %vm4888_vm9 = vcmask 31744  }
0x2967   : > { %v4873_v10 = vpop.f32.mrb[46].mxu1 }
0x2968   : > { %v4874_v17 = vadd.f32 %v4873_v10, %v4803_v56  ;;  %v5816_v54 = vpop.f32.mrb[47].mxu1 }
0x296a   : > { %v4878_v29 = vmin.f32 %v4874_v17, 20.0  ;;  %vm4877_vm0 = vcmp.gt.f32.partialorder %v4874_v17, 20.0 }
0x296c   : > { %v4879_v1 = vmul.f32 1.442695, %v4878_v29 }
0x296e   : > { %6537 = vpow2.f32 %v4879_v1 }
0x2978   : > { %v6538_v13 = vpop.eup %6537 }
0x2979   : > { %v4881_v11 = vadd.f32 1.0, %v6538_v13 }
0x297b   : > { %6539 = vlog2.f32 %v4881_v11 }
0x2985   : > { %v6540_v48 = vpop.eup %6539 }
0x2986   : > { %v4883_v6 = vmul.f32 0.6931472, %v6540_v48 }
0x2988   : > { %v4884_v22 = vsel %vm4877_vm0, %v4874_v17, %v4883_v6 }
0x2989   : > { %v4885_v50 = vmul.f32 0.99, %v4884_v22 }
0x298b   : > { %v4886_v58 = vadd.f32 0.01, %v4885_v50 }
0x298d   : > { %v4887_v40 = vsel %vm356_vm10, %v4874_v17, %v4886_v58 }
0x298e   : > { %4889 = vst.msk [vmem:[%s289_s7] sm:$0xff] %vm4888_vm9, %v4887_v40 }
0x298f PF: > { %s17_s18 = sadd.s32 1, %s6612_s18  }
0x2990   : > { %p14_p5 = scmp.ge.s32.totalorder %s17_s18, 4  }
0x2992   :  { %16 = sbr.rel (!%p14_p5) target bundleno = 2 (0x2), region = 89 }
0x2999   :  { %4909 = vsyncpa [#allocation3], 1 }
0x299a   :  { %4911 = vsyncpa [#allocation3 + $0x1], 1 }
0x299b   :  { %4912 = vsyncpa [#allocation5], 1 }

</bundles_post_ra>
